<compile_context>
chip_gen: v6e
topology: v6e:2x2x1
jax: 0.10.0
libtpu: 0.0.40
codegen_flags: <defaults>
</compile_context>

<pallas_src>
import functools

import numpy as np
import jax
import jax.numpy as jnp
from jax.experimental import pallas as pl
from jax.experimental.pallas import tpu as pltpu

BN_EPS = 1e-5


# ---------------------------------------------------------------------------
# Pallas kernels: matmul (MXU, bf16 in / f32 acc) + fused epilogue
# ---------------------------------------------------------------------------
def _gemm_kernel(x_ref, w_ref, scale_ref, shift_ref, o_ref, *, relu):
    acc = jnp.dot(x_ref[...], w_ref[...], preferred_element_type=jnp.float32)
    acc = acc * scale_ref[...] + shift_ref[...]
    if relu:
        acc = jnp.maximum(acc, 0.0)
    o_ref[...] = acc.astype(o_ref.dtype)


def _gemm_mask_kernel(x_ref, w_ref, scale_ref, shift_ref, mask_ref, o_ref):
    # Per-channel ReLU mask (1.0 -> relu, 0.0 -> identity): used for the fused
    # conv1 (relu, no BN) + downsample (BN, no relu) GEMM.
    acc = jnp.dot(x_ref[...], w_ref[...], preferred_element_type=jnp.float32)
    acc = acc * scale_ref[...] + shift_ref[...]
    m = mask_ref[...]
    acc = m * jnp.maximum(acc, 0.0) + (1.0 - m) * acc
    o_ref[...] = acc.astype(o_ref.dtype)


def _gemm_res_kernel(x_ref, w_ref, scale_ref, shift_ref, r_ref, o_ref, *, relu):
    acc = jnp.dot(x_ref[...], w_ref[...], preferred_element_type=jnp.float32)
    acc = acc * scale_ref[...] + shift_ref[...] + r_ref[...].astype(jnp.float32)
    if relu:
        acc = jnp.maximum(acc, 0.0)
    o_ref[...] = acc.astype(o_ref.dtype)


# ---------------------------------------------------------------------------
# Pallas wrapper
# ---------------------------------------------------------------------------
def _block_m(M, cap=1024):
    """Largest multiple-of-128 tile dividing M, kept <= M//2 when possible so
    the 'parallel' grid axis has >= 2 steps (v7x has two TensorCores)."""
    if M % 128 != 0:
        return M  # full-array block (small M, e.g. the FC layer)
    limit = min(cap, M // 2) if M >= 256 else M
    best = 128
    for c in range(128, limit + 1, 128):
        if M % c == 0:
            best = c
    return best


def gemm_fused(x2d, w2d, scale, shift, *, residual=None, relu=False,
               relu_mask=None):
    """(M,K)@(K,Cout) * scale + shift [+ residual] [relu / per-channel relu].

    Operands are cast to bf16 (MXU native path); accumulation and the epilogue
    are f32. Tiled over M only (K and Cout are small in this network and stay
    resident in VMEM).
    """
    M, K = x2d.shape
    _, Cout = w2d.shape
    bm = _block_m(M)
    grid = (M // bm,)

    x2d = x2d.astype(jnp.bfloat16)
    w2d = w2d.astype(jnp.bfloat16)
    scale2 = scale.reshape(1, Cout).astype(jnp.float32)
    shift2 = shift.reshape(1, Cout).astype(jnp.float32)

    in_specs = [
        pl.BlockSpec((bm, K), lambda i: (i, 0)),
        pl.BlockSpec((K, Cout), lambda i: (0, 0)),
        pl.BlockSpec((1, Cout), lambda i: (0, 0)),
        pl.BlockSpec((1, Cout), lambda i: (0, 0)),
    ]
    args = [x2d, w2d, scale2, shift2]

    if relu_mask is not None:
        in_specs.append(pl.BlockSpec((1, Cout), lambda i: (0, 0)))
        args.append(relu_mask.reshape(1, Cout).astype(jnp.float32))
        kernel = _gemm_mask_kernel
    elif residual is not None:
        in_specs.append(pl.BlockSpec((bm, Cout), lambda i: (i, 0)))
        args.append(residual.astype(jnp.bfloat16))
        kernel = functools.partial(_gemm_res_kernel, relu=relu)
    else:
        kernel = functools.partial(_gemm_kernel, relu=relu)

    return pl.pallas_call(
        kernel,
        out_shape=jax.ShapeDtypeStruct((M, Cout), jnp.float32),
        grid=grid,
        in_specs=in_specs,
        out_specs=pl.BlockSpec((bm, Cout), lambda i: (i, 0)),
        compiler_params=pltpu.CompilerParams(dimension_semantics=("parallel",)),
    )(*args)


# ---------------------------------------------------------------------------
# Glue: im2col (bf16), max pool (shifted-max tree), adaptive avg pool (matmul)
# ---------------------------------------------------------------------------
def im2col(x, kh, kw, stride, pad):
    """x: NHWC -> (N*Ho*Wo, kh*kw*C) in bf16, plus (Ho, Wo)."""
    N, H, W, C = x.shape
    Ho = (H + 2 * pad - kh) // stride + 1
    Wo = (W + 2 * pad - kw) // stride + 1
    xp = jnp.pad(x.astype(jnp.bfloat16),
                 ((0, 0), (pad, pad), (pad, pad), (0, 0)))
    cols = [xp[:, i:i + stride * Ho:stride, j:j + stride * Wo:stride, :]
            for i in range(kh) for j in range(kw)]
    patches = jnp.concatenate(cols, axis=-1)          # (N, Ho, Wo, kh*kw*C)
    return patches.reshape(N * Ho * Wo, kh * kw * C), Ho, Wo


def conv2d_fused(x, w2d, scale, shift, kh, kw, stride, pad, *,
                 relu=False, relu_mask=None, residual=None):
    """x: NHWC; w2d: pre-reshaped (kh*kw*Cin, Cout) bf16 GEMM weight."""
    N = x.shape[0]
    Cout = w2d.shape[1]
    x2d, Ho, Wo = im2col(x, kh, kw, stride, pad)
    res2d = residual.reshape(N * Ho * Wo, Cout) if residual is not None else None
    out = gemm_fused(x2d, w2d, scale, shift,
                     residual=res2d, relu=relu, relu_mask=relu_mask)
    return out.reshape(N, Ho, Wo, Cout)


def max_pool2d(x, k=3, stride=2, pad=1):
    """3x3/stride-2 max pool as a shifted-maximum tree (XLA fuses; no 9x blowup)."""
    N, H, W, C = x.shape
    Ho = (H + 2 * pad - k) // stride + 1
    Wo = (W + 2 * pad - k) // stride + 1
    xp = jnp.pad(x, ((0, 0), (pad, pad), (pad, pad), (0, 0)),
                 constant_values=-jnp.inf)  # PyTorch ignores pad in the max
    out = None
    for i in range(k):
        for j in range(k):
            s = xp[:, i:i + stride * Ho:stride, j:j + stride * Wo:stride, :]
            out = s if out is None else jnp.maximum(out, s)
    return out


def adaptive_avg_pool2d(x, out_size=7):
    """AdaptiveAvgPool2d via a single (H*W, out*out) pooling-matrix matmul."""
    N, H, W, C = x.shape

    def bins(n_in):
        return [((o * n_in) // out_size, -(-((o + 1) * n_in) // out_size))
                for o in range(out_size)]

    P = np.zeros((H * W, out_size * out_size), np.float32)
    for oi, (h0, h1) in enumerate(bins(H)):
        for oj, (w0, w1) in enumerate(bins(W)):
            cnt = (h1 - h0) * (w1 - w0)
            for hh in range(h0, h1):
                P[hh * W + w0:hh * W + w1, oi * out_size + oj] = 1.0 / cnt
    y = jnp.einsum('nsc,sb->nbc', x.reshape(N, H * W, C), jnp.asarray(P))
    return y.reshape(N, out_size, out_size, C)


# ---------------------------------------------------------------------------
# Parameter init (deterministic, synthetic) + one-time inference prep
# ---------------------------------------------------------------------------
def _fold_bn(gamma, beta, rmean, rvar):
    scale = gamma / jnp.sqrt(rvar + BN_EPS)
    shift = beta - rmean * scale
    return scale, shift


def _init_conv(key, cout, cin, kh, kw):
    fan_in = cin * kh * kw
    return jax.random.normal(key, (cout, cin, kh, kw), jnp.float32) / np.sqrt(fan_in)


def _init_bn(key, c):
    k1, k2, k3, k4 = jax.random.split(key, 4)
    gamma = 1.0 + 0.1 * jax.random.normal(k1, (c,), jnp.float32)
    beta = 0.1 * jax.random.normal(k2, (c,), jnp.float32)
    rmean = 0.1 * jax.random.normal(k3, (c,), jnp.float32)
    rvar = 1.0 + 0.1 * jax.random.uniform(k4, (c,), jnp.float32)
    return _fold_bn(gamma, beta, rmean, rvar)


def _init_block(key, inplanes, planes):
    ks = jax.random.split(key, 5)
    w1 = _init_conv(ks[0], planes, inplanes, 3, 3)   # Res2DBlock.bn1 unused in forward
    w2 = _init_conv(ks[1], planes, planes, 3, 3)
    s2, b2 = _init_bn(ks[2], planes)
    wd = _init_conv(ks[3], planes, inplanes, 1, 1)
    sd, bd = _init_bn(ks[4], planes)
    return dict(w1=w1, w2=w2, s2=s2, b2=b2, wd=wd, sd=sd, bd=bd)


def init_resnet_params(key, FN=16, num_classes=8):
    keys = jax.random.split(key, 16)
    params = {}
    params["c1_w"] = _init_conv(keys[0], FN, 1, 7, 7)
    params["bn1_s"], params["bn1_b"] = _init_bn(keys[1], FN)
    params["layer1"] = [_init_block(keys[2 + i], FN, FN) for i in range(3)]
    layer2 = [_init_block(keys[5], FN, 2 * FN)]
    layer2 += [_init_block(keys[6 + i], 2 * FN, 2 * FN) for i in range(3)]
    params["layer2"] = layer2
    params["fc_w"] = jax.random.normal(keys[10], (num_classes, FN * 98),
                                       jnp.float32) / np.sqrt(FN * 98)
    params["fc_b"] = 0.1 * jax.random.normal(keys[11], (num_classes,), jnp.float32)
    return params


def _w_to_gemm(w):
    """(Cout, Cin, kh, kw) PyTorch layout -> (kh*kw*Cin, Cout) GEMM weight."""
    cout, cin, kh, kw = w.shape
    return jnp.transpose(w, (2, 3, 1, 0)).reshape(kh * kw * cin, cout)


def prepare_params(params):
    """One-time inference prep: fuse conv1 + 1x1 downsample into a single
    3x3 GEMM weight (1x1 embedded at the center tap, zero elsewhere), build the
    per-channel scale / shift / relu-mask epilogue vectors, reshape weights to
    GEMM layout and cast them to bf16."""
    p = {"c1_w": _w_to_gemm(params["c1_w"]).astype(jnp.bfloat16),
         "c1_scale": params["bn1_s"], "c1_shift": params["bn1_b"]}
    for name in ("layer1", "layer2"):
        blocks = []
        for bp in params[name]:
            planes, inplanes = bp["w1"].shape[0], bp["w1"].shape[1]
            wd3 = jnp.zeros((planes, inplanes, 3, 3), jnp.float32)
            wd3 = wd3.at[:, :, 1, 1].set(bp["wd"][:, :, 0, 0])
            w_a = jnp.concatenate([bp["w1"], wd3], axis=0)       # (2p, cin, 3, 3)
            ones = jnp.ones((planes,), jnp.float32)
            zeros = jnp.zeros((planes,), jnp.float32)
            blocks.append(dict(
                # conv1 half: no BN (faithful), relu; downsample half: BN, no relu
                wa=_w_to_gemm(w_a).astype(jnp.bfloat16),
                sa=jnp.concatenate([ones, bp["sd"]]),
                ba=jnp.concatenate([zeros, bp["bd"]]),
                ma=jnp.concatenate([ones, zeros]),
                wb=_w_to_gemm(bp["w2"]).astype(jnp.bfloat16),
                sb=bp["s2"], bb=bp["b2"],
            ))
        p[name] = blocks
    p["fc_w"] = jnp.transpose(params["fc_w"]).astype(jnp.bfloat16)  # (in, out)
    p["fc_b"] = params["fc_b"]
    return p


# ---------------------------------------------------------------------------
# Forward pass
# ---------------------------------------------------------------------------
def res2d_block(x, bp, stride):
    planes = bp["wb"].shape[1]
    # Single GEMM producing [conv1->relu | downsample 1x1-conv->BN] on the lane
    # axis (2*planes channels): halves patch reads, denser lane utilization.
    comb = conv2d_fused(x, bp["wa"], bp["sa"], bp["ba"], 3, 3, stride, 1,
                        relu_mask=bp["ma"])
    out = comb[..., :planes]
    identity = comb[..., planes:]
    # conv2 -> bn2 -> +identity -> relu, fused in one Pallas GEMM epilogue.
    return conv2d_fused(out, bp["wb"], bp["sb"], bp["bb"], 3, 3, 1, 1,
                        relu=True, residual=identity)


def resnet_forward(p, x_nchw):
    # x_nchw: (N, 1, H, W) PyTorch-style input
    x = jnp.transpose(x_nchw, (0, 2, 3, 1)).astype(jnp.float32)   # -> NHWC
    # c1 (7x7/2) -> bn1 -> relu, fused
    x = conv2d_fused(x, p["c1_w"], p["c1_scale"], p["c1_shift"], 7, 7, 2, 3,
                     relu=True)
    # maxpool 3x3 / stride 2 / pad 1
    x = max_pool2d(x, 3, 2, 1)
    # layer1 (stride 1) and layer2 (first block stride 2)
    for bp in p["layer1"]:
        x = res2d_block(x, bp, 1)
    for i, bp in enumerate(p["layer2"]):
        x = res2d_block(x, bp, 2 if i == 0 else 1)
    # adaptive avg pool to 7x7 (single matmul)
    x = adaptive_avg_pool2d(x, 7)                                  # (N,7,7,2*FN)
    # PyTorch flattens NCHW -> (N, C*7*7)
    feat = jnp.transpose(x, (0, 3, 1, 2)).reshape(x.shape[0], -1)
    # fc (Pallas GEMM, scale=1, shift=bias)
    nclass = p["fc_w"].shape[1]
    logits = gemm_fused(feat, p["fc_w"], jnp.ones((nclass,), jnp.float32),
                        p["fc_b"], relu=False)
    # p_dropout=None -> no dropout
    return logits


if __name__ == "__main__":
    FN = 16
    num_classes = 8
    N, H, W = 2, 64, 64  # 64x64 -> c1:32 -> maxpool:16 -> layer2:8 -> avgpool:7

    key = jax.random.PRNGKey(0)
    k_in, k_params = jax.random.split(key)
    x = jax.random.normal(k_in, (N, 1, H, W), jnp.float32)
    params = init_resnet_params(k_params, FN=FN, num_classes=num_classes)
    fused_params = prepare_params(params)   # one-time inference prep

    fwd = jax.jit(resnet_forward)
    y = fwd(fused_params, x)
    y = jax.block_until_ready(y)

    assert y.shape == (N, num_classes), y.shape
    assert bool(jnp.all(jnp.isfinite(y)))
    print("KERNEL_OK")
</pallas_src>

<mosaic_0001>
module attributes {stable_mosaic.version = 11 : i64} {
  func.func @_gemm_kernel(%arg0: i32, %arg1: memref<1024x49xbf16, #tpu.memory_space<vmem>>, %arg2: memref<49x16xbf16, #tpu.memory_space<vmem>>, %arg3: memref<1x16xf32, #tpu.memory_space<vmem>>, %arg4: memref<1x16xf32, #tpu.memory_space<vmem>>, %arg5: memref<1024x16xf32, #tpu.memory_space<vmem>>) attributes {dimension_semantics = [#tpu.dimension_semantics<parallel>], iteration_bounds = array<i64: 2>, scalar_prefetch = 0 : i64, scratch_operands = 0 : i64, tpu.core_type = #tpu.core_type<tc>, window_params = [{transform_indices = @transform_0, window_bounds = array<i64: 1024, 49>}, {pipeline_mode = #tpu.pipeline_mode<synchronous>, transform_indices = @transform_1, window_bounds = array<i64: 49, 16>}, {pipeline_mode = #tpu.pipeline_mode<synchronous>, transform_indices = @transform_2, window_bounds = array<i64: 1, 16>}, {pipeline_mode = #tpu.pipeline_mode<synchronous>, transform_indices = @transform_3, window_bounds = array<i64: 1, 16>}, {transform_indices = @transform_4, window_bounds = array<i64: 1024, 16>}]} {
    %c0 = arith.constant 0 : index
    %c0_0 = arith.constant 0 : index
    %0 = vector.load %arg1[%c0, %c0_0] : memref<1024x49xbf16, #tpu.memory_space<vmem>>, vector<1024x49xbf16>
    %c0_1 = arith.constant 0 : index
    %c0_2 = arith.constant 0 : index
    %1 = vector.load %arg2[%c0_1, %c0_2] : memref<49x16xbf16, #tpu.memory_space<vmem>>, vector<49x16xbf16>
    %cst = arith.constant dense<0.000000e+00> : vector<1024x16xf32>
    %2 = tpu.matmul %0, %1, %cst {dimension_numbers = #tpu.dot_dimension_numbers<[1], [0], [0], [1], [0, 0, 1, 1], [], []>} : vector<1024x49xbf16>, vector<49x16xbf16>, vector<1024x16xf32> -> vector<1024x16xf32>
    %c0_3 = arith.constant 0 : index
    %c0_4 = arith.constant 0 : index
    %3 = vector.load %arg3[%c0_3, %c0_4] : memref<1x16xf32, #tpu.memory_space<vmem>>, vector<1x16xf32>
    %4 = vector.broadcast %3 : vector<1x16xf32> to vector<1024x16xf32>
    %5 = arith.mulf %2, %4 : vector<1024x16xf32>
    %c0_5 = arith.constant 0 : index
    %c0_6 = arith.constant 0 : index
    %6 = vector.load %arg4[%c0_5, %c0_6] : memref<1x16xf32, #tpu.memory_space<vmem>>, vector<1x16xf32>
    %7 = vector.broadcast %6 : vector<1x16xf32> to vector<1024x16xf32>
    %8 = arith.addf %5, %7 : vector<1024x16xf32>
    %cst_7 = arith.constant 0.000000e+00 : f32
    %9 = vector.broadcast %cst_7 : f32 to vector<1024x16xf32>
    %10 = arith.maximumf %8, %9 : vector<1024x16xf32>
    %c0_8 = arith.constant 0 : index
    %c0_9 = arith.constant 0 : index
    %11 = vector.load %arg5[%c0_8, %c0_9] : memref<1024x16xf32, #tpu.memory_space<vmem>>, vector<1024x16xf32>
    tpu.vector_store %arg5[%c0_8, %c0_9], %10 {strides = array<i32>} : memref<1024x16xf32, #tpu.memory_space<vmem>>, vector<1024x16xf32>,
    return
  }
  func.func @transform_0(%arg0: i32) -> (i32, i32) {
    %c0_i32 = arith.constant 0 : i32
    %c0_i32_0 = arith.constant 0 : i32
    return %arg0, %c0_i32 : i32, i32
  }
  func.func @transform_1(%arg0: i32) -> (i32, i32) {
    %c0_i32 = arith.constant 0 : i32
    %c0_i32_0 = arith.constant 0 : i32
    %c0_i32_1 = arith.constant 0 : i32
    return %c0_i32, %c0_i32_0 : i32, i32
  }
  func.func @transform_2(%arg0: i32) -> (i32, i32) {
    %c0_i32 = arith.constant 0 : i32
    %c0_i32_0 = arith.constant 0 : i32
    %c0_i32_1 = arith.constant 0 : i32
    return %c0_i32, %c0_i32_0 : i32, i32
  }
  func.func @transform_3(%arg0: i32) -> (i32, i32) {
    %c0_i32 = arith.constant 0 : i32
    %c0_i32_0 = arith.constant 0 : i32
    %c0_i32_1 = arith.constant 0 : i32
    return %c0_i32, %c0_i32_0 : i32, i32
  }
  func.func @transform_4(%arg0: i32) -> (i32, i32) {
    %c0_i32 = arith.constant 0 : i32
    %c0_i32_0 = arith.constant 0 : i32
    return %arg0, %c0_i32 : i32, i32
  }
}

module attributes {stable_mosaic.version = 11 : i64} {
  func.func @_gemm_mask_kernel(%arg0: i32, %arg1: memref<256x144xbf16, #tpu.memory_space<vmem>>, %arg2: memref<144x32xbf16, #tpu.memory_space<vmem>>, %arg3: memref<1x32xf32, #tpu.memory_space<vmem>>, %arg4: memref<1x32xf32, #tpu.memory_space<vmem>>, %arg5: memref<1x32xf32, #tpu.memory_space<vmem>>, %arg6: memref<256x32xf32, #tpu.memory_space<vmem>>) attributes {dimension_semantics = [#tpu.dimension_semantics<parallel>], iteration_bounds = array<i64: 2>, scalar_prefetch = 0 : i64, scratch_operands = 0 : i64, tpu.core_type = #tpu.core_type<tc>, window_params = [{transform_indices = @transform_0, window_bounds = array<i64: 256, 144>}, {pipeline_mode = #tpu.pipeline_mode<synchronous>, transform_indices = @transform_1, window_bounds = array<i64: 144, 32>}, {pipeline_mode = #tpu.pipeline_mode<synchronous>, transform_indices = @transform_2, window_bounds = array<i64: 1, 32>}, {pipeline_mode = #tpu.pipeline_mode<synchronous>, transform_indices = @transform_3, window_bounds = array<i64: 1, 32>}, {pipeline_mode = #tpu.pipeline_mode<synchronous>, transform_indices = @transform_4, window_bounds = array<i64: 1, 32>}, {transform_indices = @transform_5, window_bounds = array<i64: 256, 32>}]} {
    %c0 = arith.constant 0 : index
    %c0_0 = arith.constant 0 : index
    %0 = vector.load %arg1[%c0, %c0_0] : memref<256x144xbf16, #tpu.memory_space<vmem>>, vector<256x144xbf16>
    %c0_1 = arith.constant 0 : index
    %c0_2 = arith.constant 0 : index
    %1 = vector.load %arg2[%c0_1, %c0_2] : memref<144x32xbf16, #tpu.memory_space<vmem>>, vector<144x32xbf16>
    %cst = arith.constant dense<0.000000e+00> : vector<256x32xf32>
    %2 = tpu.matmul %0, %1, %cst {dimension_numbers = #tpu.dot_dimension_numbers<[1], [0], [0], [1], [0, 0, 1, 1], [], []>} : vector<256x144xbf16>, vector<144x32xbf16>, vector<256x32xf32> -> vector<256x32xf32>
    %c0_3 = arith.constant 0 : index
    %c0_4 = arith.constant 0 : index
    %3 = vector.load %arg3[%c0_3, %c0_4] : memref<1x32xf32, #tpu.memory_space<vmem>>, vector<1x32xf32>
    %4 = vector.broadcast %3 : vector<1x32xf32> to vector<256x32xf32>
    %5 = arith.mulf %2, %4 : vector<256x32xf32>
    %c0_5 = arith.constant 0 : index
    %c0_6 = arith.constant 0 : index
    %6 = vector.load %arg4[%c0_5, %c0_6] : memref<1x32xf32, #tpu.memory_space<vmem>>, vector<1x32xf32>
    %7 = vector.broadcast %6 : vector<1x32xf32> to vector<256x32xf32>
    %8 = arith.addf %5, %7 : vector<256x32xf32>
    %c0_7 = arith.constant 0 : index
    %c0_8 = arith.constant 0 : index
    %9 = vector.load %arg5[%c0_7, %c0_8] : memref<1x32xf32, #tpu.memory_space<vmem>>, vector<1x32xf32>
    %cst_9 = arith.constant 0.000000e+00 : f32
    %10 = vector.broadcast %cst_9 : f32 to vector<256x32xf32>
    %11 = arith.maximumf %8, %10 : vector<256x32xf32>
    %12 = vector.broadcast %9 : vector<1x32xf32> to vector<256x32xf32>
    %13 = arith.mulf %12, %11 : vector<256x32xf32>
    %cst_10 = arith.constant 1.000000e+00 : f32
    %14 = vector.broadcast %cst_10 : f32 to vector<1x32xf32>
    %15 = arith.subf %14, %9 : vector<1x32xf32>
    %16 = vector.broadcast %15 : vector<1x32xf32> to vector<256x32xf32>
    %17 = arith.mulf %16, %8 : vector<256x32xf32>
    %18 = arith.addf %13, %17 : vector<256x32xf32>
    %c0_11 = arith.constant 0 : index
    %c0_12 = arith.constant 0 : index
    %19 = vector.load %arg6[%c0_11, %c0_12] : memref<256x32xf32, #tpu.memory_space<vmem>>, vector<256x32xf32>
    tpu.vector_store %arg6[%c0_11, %c0_12], %18 {strides = array<i32>} : memref<256x32xf32, #tpu.memory_space<vmem>>, vector<256x32xf32>,
    return
  }
  func.func @transform_0(%arg0: i32) -> (i32, i32) {
    %c0_i32 = arith.constant 0 : i32
    %c0_i32_0 = arith.constant 0 : i32
    return %arg0, %c0_i32 : i32, i32
  }
  func.func @transform_1(%arg0: i32) -> (i32, i32) {
    %c0_i32 = arith.constant 0 : i32
    %c0_i32_0 = arith.constant 0 : i32
    %c0_i32_1 = arith.constant 0 : i32
    return %c0_i32, %c0_i32_0 : i32, i32
  }
  func.func @transform_2(%arg0: i32) -> (i32, i32) {
    %c0_i32 = arith.constant 0 : i32
    %c0_i32_0 = arith.constant 0 : i32
    %c0_i32_1 = arith.constant 0 : i32
    return %c0_i32, %c0_i32_0 : i32, i32
  }
  func.func @transform_3(%arg0: i32) -> (i32, i32) {
    %c0_i32 = arith.constant 0 : i32
    %c0_i32_0 = arith.constant 0 : i32
    %c0_i32_1 = arith.constant 0 : i32
    return %c0_i32, %c0_i32_0 : i32, i32
  }
  func.func @transform_4(%arg0: i32) -> (i32, i32) {
    %c0_i32 = arith.constant 0 : i32
    %c0_i32_0 = arith.constant 0 : i32
    %c0_i32_1 = arith.constant 0 : i32
    return %c0_i32, %c0_i32_0 : i32, i32
  }
  func.func @transform_5(%arg0: i32) -> (i32, i32) {
    %c0_i32 = arith.constant 0 : i32
    %c0_i32_0 = arith.constant 0 : i32
    return %arg0, %c0_i32 : i32, i32
  }
}

module attributes {stable_mosaic.version = 11 : i64} {
  func.func @_gemm_res_kernel(%arg0: i32, %arg1: memref<256x144xbf16, #tpu.memory_space<vmem>>, %arg2: memref<144x16xbf16, #tpu.memory_space<vmem>>, %arg3: memref<1x16xf32, #tpu.memory_space<vmem>>, %arg4: memref<1x16xf32, #tpu.memory_space<vmem>>, %arg5: memref<256x16xbf16, #tpu.memory_space<vmem>>, %arg6: memref<256x16xf32, #tpu.memory_space<vmem>>) attributes {dimension_semantics = [#tpu.dimension_semantics<parallel>], iteration_bounds = array<i64: 2>, scalar_prefetch = 0 : i64, scratch_operands = 0 : i64, tpu.core_type = #tpu.core_type<tc>, window_params = [{transform_indices = @transform_0, window_bounds = array<i64: 256, 144>}, {pipeline_mode = #tpu.pipeline_mode<synchronous>, transform_indices = @transform_1, window_bounds = array<i64: 144, 16>}, {pipeline_mode = #tpu.pipeline_mode<synchronous>, transform_indices = @transform_2, window_bounds = array<i64: 1, 16>}, {pipeline_mode = #tpu.pipeline_mode<synchronous>, transform_indices = @transform_3, window_bounds = array<i64: 1, 16>}, {transform_indices = @transform_4, window_bounds = array<i64: 256, 16>}, {transform_indices = @transform_5, window_bounds = array<i64: 256, 16>}]} {
    %c0 = arith.constant 0 : index
    %c0_0 = arith.constant 0 : index
    %0 = vector.load %arg1[%c0, %c0_0] : memref<256x144xbf16, #tpu.memory_space<vmem>>, vector<256x144xbf16>
    %c0_1 = arith.constant 0 : index
    %c0_2 = arith.constant 0 : index
    %1 = vector.load %arg2[%c0_1, %c0_2] : memref<144x16xbf16, #tpu.memory_space<vmem>>, vector<144x16xbf16>
    %cst = arith.constant dense<0.000000e+00> : vector<256x16xf32>
    %2 = tpu.matmul %0, %1, %cst {dimension_numbers = #tpu.dot_dimension_numbers<[1], [0], [0], [1], [0, 0, 1, 1], [], []>} : vector<256x144xbf16>, vector<144x16xbf16>, vector<256x16xf32> -> vector<256x16xf32>
    %c0_3 = arith.constant 0 : index
    %c0_4 = arith.constant 0 : index
    %3 = vector.load %arg3[%c0_3, %c0_4] : memref<1x16xf32, #tpu.memory_space<vmem>>, vector<1x16xf32>
    %4 = vector.broadcast %3 : vector<1x16xf32> to vector<256x16xf32>
    %5 = arith.mulf %2, %4 : vector<256x16xf32>
    %c0_5 = arith.constant 0 : index
    %c0_6 = arith.constant 0 : index
    %6 = vector.load %arg4[%c0_5, %c0_6] : memref<1x16xf32, #tpu.memory_space<vmem>>, vector<1x16xf32>
    %7 = vector.broadcast %6 : vector<1x16xf32> to vector<256x16xf32>
    %8 = arith.addf %5, %7 : vector<256x16xf32>
    %c0_7 = arith.constant 0 : index
    %c0_8 = arith.constant 0 : index
    %9 = vector.load %arg5[%c0_7, %c0_8] : memref<256x16xbf16, #tpu.memory_space<vmem>>, vector<256x16xbf16>
    %10 = arith.extf %9 : vector<256x16xbf16> to vector<256x16xf32>
    %11 = arith.addf %8, %10 : vector<256x16xf32>
    %cst_9 = arith.constant 0.000000e+00 : f32
    %12 = vector.broadcast %cst_9 : f32 to vector<256x16xf32>
    %13 = arith.maximumf %11, %12 : vector<256x16xf32>
    %c0_10 = arith.constant 0 : index
    %c0_11 = arith.constant 0 : index
    %14 = vector.load %arg6[%c0_10, %c0_11] : memref<256x16xf32, #tpu.memory_space<vmem>>, vector<256x16xf32>
    tpu.vector_store %arg6[%c0_10, %c0_11], %13 {strides = array<i32>} : memref<256x16xf32, #tpu.memory_space<vmem>>, vector<256x16xf32>,
    return
  }
  func.func @transform_0(%arg0: i32) -> (i32, i32) {
    %c0_i32 = arith.constant 0 : i32
    %c0_i32_0 = arith.constant 0 : i32
    return %arg0, %c0_i32 : i32, i32
  }
  func.func @transform_1(%arg0: i32) -> (i32, i32) {
    %c0_i32 = arith.constant 0 : i32
    %c0_i32_0 = arith.constant 0 : i32
    %c0_i32_1 = arith.constant 0 : i32
    return %c0_i32, %c0_i32_0 : i32, i32
  }
  func.func @transform_2(%arg0: i32) -> (i32, i32) {
    %c0_i32 = arith.constant 0 : i32
    %c0_i32_0 = arith.constant 0 : i32
    %c0_i32_1 = arith.constant 0 : i32
    return %c0_i32, %c0_i32_0 : i32, i32
  }
  func.func @transform_3(%arg0: i32) -> (i32, i32) {
    %c0_i32 = arith.constant 0 : i32
    %c0_i32_0 = arith.constant 0 : i32
    %c0_i32_1 = arith.constant 0 : i32
    return %c0_i32, %c0_i32_0 : i32, i32
  }
  func.func @transform_4(%arg0: i32) -> (i32, i32) {
    %c0_i32 = arith.constant 0 : i32
    %c0_i32_0 = arith.constant 0 : i32
    return %arg0, %c0_i32 : i32, i32
  }
  func.func @transform_5(%arg0: i32) -> (i32, i32) {
    %c0_i32 = arith.constant 0 : i32
    %c0_i32_0 = arith.constant 0 : i32
    return %arg0, %c0_i32 : i32, i32
  }
}

module attributes {stable_mosaic.version = 11 : i64} {
  func.func @_gemm_mask_kernel(%arg0: i32, %arg1: memref<128x144xbf16, #tpu.memory_space<vmem>>, %arg2: memref<144x64xbf16, #tpu.memory_space<vmem>>, %arg3: memref<1x64xf32, #tpu.memory_space<vmem>>, %arg4: memref<1x64xf32, #tpu.memory_space<vmem>>, %arg5: memref<1x64xf32, #tpu.memory_space<vmem>>, %arg6: memref<128x64xf32, #tpu.memory_space<vmem>>) attributes {dimension_semantics = [#tpu.dimension_semantics<parallel>], iteration_bounds = array<i64: 1>, scalar_prefetch = 0 : i64, scratch_operands = 0 : i64, tpu.core_type = #tpu.core_type<tc>, window_params = [{transform_indices = @transform_0, window_bounds = array<i64: 128, 144>}, {pipeline_mode = #tpu.pipeline_mode<synchronous>, transform_indices = @transform_1, window_bounds = array<i64: 144, 64>}, {pipeline_mode = #tpu.pipeline_mode<synchronous>, transform_indices = @transform_2, window_bounds = array<i64: 1, 64>}, {pipeline_mode = #tpu.pipeline_mode<synchronous>, transform_indices = @transform_3, window_bounds = array<i64: 1, 64>}, {pipeline_mode = #tpu.pipeline_mode<synchronous>, transform_indices = @transform_4, window_bounds = array<i64: 1, 64>}, {transform_indices = @transform_5, window_bounds = array<i64: 128, 64>}]} {
    %c0 = arith.constant 0 : index
    %c0_0 = arith.constant 0 : index
    %0 = vector.load %arg1[%c0, %c0_0] : memref<128x144xbf16, #tpu.memory_space<vmem>>, vector<128x144xbf16>
    %c0_1 = arith.constant 0 : index
    %c0_2 = arith.constant 0 : index
    %1 = vector.load %arg2[%c0_1, %c0_2] : memref<144x64xbf16, #tpu.memory_space<vmem>>, vector<144x64xbf16>
    %cst = arith.constant dense<0.000000e+00> : vector<128x64xf32>
    %2 = tpu.matmul %0, %1, %cst {dimension_numbers = #tpu.dot_dimension_numbers<[1], [0], [0], [1], [0, 0, 1, 1], [], []>} : vector<128x144xbf16>, vector<144x64xbf16>, vector<128x64xf32> -> vector<128x64xf32>
    %c0_3 = arith.constant 0 : index
    %c0_4 = arith.constant 0 : index
    %3 = vector.load %arg3[%c0_3, %c0_4] : memref<1x64xf32, #tpu.memory_space<vmem>>, vector<1x64xf32>
    %4 = vector.broadcast %3 : vector<1x64xf32> to vector<128x64xf32>
    %5 = arith.mulf %2, %4 : vector<128x64xf32>
    %c0_5 = arith.constant 0 : index
    %c0_6 = arith.constant 0 : index
    %6 = vector.load %arg4[%c0_5, %c0_6] : memref<1x64xf32, #tpu.memory_space<vmem>>, vector<1x64xf32>
    %7 = vector.broadcast %6 : vector<1x64xf32> to vector<128x64xf32>
    %8 = arith.addf %5, %7 : vector<128x64xf32>
    %c0_7 = arith.constant 0 : index
    %c0_8 = arith.constant 0 : index
    %9 = vector.load %arg5[%c0_7, %c0_8] : memref<1x64xf32, #tpu.memory_space<vmem>>, vector<1x64xf32>
    %cst_9 = arith.constant 0.000000e+00 : f32
    %10 = vector.broadcast %cst_9 : f32 to vector<128x64xf32>
    %11 = arith.maximumf %8, %10 : vector<128x64xf32>
    %12 = vector.broadcast %9 : vector<1x64xf32> to vector<128x64xf32>
    %13 = arith.mulf %12, %11 : vector<128x64xf32>
    %cst_10 = arith.constant 1.000000e+00 : f32
    %14 = vector.broadcast %cst_10 : f32 to vector<1x64xf32>
    %15 = arith.subf %14, %9 : vector<1x64xf32>
    %16 = vector.broadcast %15 : vector<1x64xf32> to vector<128x64xf32>
    %17 = arith.mulf %16, %8 : vector<128x64xf32>
    %18 = arith.addf %13, %17 : vector<128x64xf32>
    %c0_11 = arith.constant 0 : index
    %c0_12 = arith.constant 0 : index
    %19 = vector.load %arg6[%c0_11, %c0_12] : memref<128x64xf32, #tpu.memory_space<vmem>>, vector<128x64xf32>
    tpu.vector_store %arg6[%c0_11, %c0_12], %18 {strides = array<i32>} : memref<128x64xf32, #tpu.memory_space<vmem>>, vector<128x64xf32>,
    return
  }
  func.func @transform_0(%arg0: i32) -> (i32, i32) {
    %c0_i32 = arith.constant 0 : i32
    %c0_i32_0 = arith.constant 0 : i32
    return %arg0, %c0_i32 : i32, i32
  }
  func.func @transform_1(%arg0: i32) -> (i32, i32) {
    %c0_i32 = arith.constant 0 : i32
    %c0_i32_0 = arith.constant 0 : i32
    %c0_i32_1 = arith.constant 0 : i32
    return %c0_i32, %c0_i32_0 : i32, i32
  }
  func.func @transform_2(%arg0: i32) -> (i32, i32) {
    %c0_i32 = arith.constant 0 : i32
    %c0_i32_0 = arith.constant 0 : i32
    %c0_i32_1 = arith.constant 0 : i32
    return %c0_i32, %c0_i32_0 : i32, i32
  }
  func.func @transform_3(%arg0: i32) -> (i32, i32) {
    %c0_i32 = arith.constant 0 : i32
    %c0_i32_0 = arith.constant 0 : i32
    %c0_i32_1 = arith.constant 0 : i32
    return %c0_i32, %c0_i32_0 : i32, i32
  }
  func.func @transform_4(%arg0: i32) -> (i32, i32) {
    %c0_i32 = arith.constant 0 : i32
    %c0_i32_0 = arith.constant 0 : i32
    %c0_i32_1 = arith.constant 0 : i32
    return %c0_i32, %c0_i32_0 : i32, i32
  }
  func.func @transform_5(%arg0: i32) -> (i32, i32) {
    %c0_i32 = arith.constant 0 : i32
    %c0_i32_0 = arith.constant 0 : i32
    return %arg0, %c0_i32 : i32, i32
  }
}

module attributes {stable_mosaic.version = 11 : i64} {
  func.func @_gemm_res_kernel(%arg0: i32, %arg1: memref<128x288xbf16, #tpu.memory_space<vmem>>, %arg2: memref<288x32xbf16, #tpu.memory_space<vmem>>, %arg3: memref<1x32xf32, #tpu.memory_space<vmem>>, %arg4: memref<1x32xf32, #tpu.memory_space<vmem>>, %arg5: memref<128x32xbf16, #tpu.memory_space<vmem>>, %arg6: memref<128x32xf32, #tpu.memory_space<vmem>>) attributes {dimension_semantics = [#tpu.dimension_semantics<parallel>], iteration_bounds = array<i64: 1>, scalar_prefetch = 0 : i64, scratch_operands = 0 : i64, tpu.core_type = #tpu.core_type<tc>, window_params = [{transform_indices = @transform_0, window_bounds = array<i64: 128, 288>}, {pipeline_mode = #tpu.pipeline_mode<synchronous>, transform_indices = @transform_1, window_bounds = array<i64: 288, 32>}, {pipeline_mode = #tpu.pipeline_mode<synchronous>, transform_indices = @transform_2, window_bounds = array<i64: 1, 32>}, {pipeline_mode = #tpu.pipeline_mode<synchronous>, transform_indices = @transform_3, window_bounds = array<i64: 1, 32>}, {transform_indices = @transform_4, window_bounds = array<i64: 128, 32>}, {transform_indices = @transform_5, window_bounds = array<i64: 128, 32>}]} {
    %c0 = arith.constant 0 : index
    %c0_0 = arith.constant 0 : index
    %0 = vector.load %arg1[%c0, %c0_0] : memref<128x288xbf16, #tpu.memory_space<vmem>>, vector<128x288xbf16>
    %c0_1 = arith.constant 0 : index
    %c0_2 = arith.constant 0 : index
    %1 = vector.load %arg2[%c0_1, %c0_2] : memref<288x32xbf16, #tpu.memory_space<vmem>>, vector<288x32xbf16>
    %cst = arith.constant dense<0.000000e+00> : vector<128x32xf32>
    %2 = tpu.matmul %0, %1, %cst {dimension_numbers = #tpu.dot_dimension_numbers<[1], [0], [0], [1], [0, 0, 1, 1], [], []>} : vector<128x288xbf16>, vector<288x32xbf16>, vector<128x32xf32> -> vector<128x32xf32>
    %c0_3 = arith.constant 0 : index
    %c0_4 = arith.constant 0 : index
    %3 = vector.load %arg3[%c0_3, %c0_4] : memref<1x32xf32, #tpu.memory_space<vmem>>, vector<1x32xf32>
    %4 = vector.broadcast %3 : vector<1x32xf32> to vector<128x32xf32>
    %5 = arith.mulf %2, %4 : vector<128x32xf32>
    %c0_5 = arith.constant 0 : index
    %c0_6 = arith.constant 0 : index
    %6 = vector.load %arg4[%c0_5, %c0_6] : memref<1x32xf32, #tpu.memory_space<vmem>>, vector<1x32xf32>
    %7 = vector.broadcast %6 : vector<1x32xf32> to vector<128x32xf32>
    %8 = arith.addf %5, %7 : vector<128x32xf32>
    %c0_7 = arith.constant 0 : index
    %c0_8 = arith.constant 0 : index
    %9 = vector.load %arg5[%c0_7, %c0_8] : memref<128x32xbf16, #tpu.memory_space<vmem>>, vector<128x32xbf16>
    %10 = arith.extf %9 : vector<128x32xbf16> to vector<128x32xf32>
    %11 = arith.addf %8, %10 : vector<128x32xf32>
    %cst_9 = arith.constant 0.000000e+00 : f32
    %12 = vector.broadcast %cst_9 : f32 to vector<128x32xf32>
    %13 = arith.maximumf %11, %12 : vector<128x32xf32>
    %c0_10 = arith.constant 0 : index
    %c0_11 = arith.constant 0 : index
    %14 = vector.load %arg6[%c0_10, %c0_11] : memref<128x32xf32, #tpu.memory_space<vmem>>, vector<128x32xf32>
    tpu.vector_store %arg6[%c0_10, %c0_11], %13 {strides = array<i32>} : memref<128x32xf32, #tpu.memory_space<vmem>>, vector<128x32xf32>,
    return
  }
  func.func @transform_0(%arg0: i32) -> (i32, i32) {
    %c0_i32 = arith.constant 0 : i32
    %c0_i32_0 = arith.constant 0 : i32
    return %arg0, %c0_i32 : i32, i32
  }
  func.func @transform_1(%arg0: i32) -> (i32, i32) {
    %c0_i32 = arith.constant 0 : i32
    %c0_i32_0 = arith.constant 0 : i32
    %c0_i32_1 = arith.constant 0 : i32
    return %c0_i32, %c0_i32_0 : i32, i32
  }
  func.func @transform_2(%arg0: i32) -> (i32, i32) {
    %c0_i32 = arith.constant 0 : i32
    %c0_i32_0 = arith.constant 0 : i32
    %c0_i32_1 = arith.constant 0 : i32
    return %c0_i32, %c0_i32_0 : i32, i32
  }
  func.func @transform_3(%arg0: i32) -> (i32, i32) {
    %c0_i32 = arith.constant 0 : i32
    %c0_i32_0 = arith.constant 0 : i32
    %c0_i32_1 = arith.constant 0 : i32
    return %c0_i32, %c0_i32_0 : i32, i32
  }
  func.func @transform_4(%arg0: i32) -> (i32, i32) {
    %c0_i32 = arith.constant 0 : i32
    %c0_i32_0 = arith.constant 0 : i32
    return %arg0, %c0_i32 : i32, i32
  }
  func.func @transform_5(%arg0: i32) -> (i32, i32) {
    %c0_i32 = arith.constant 0 : i32
    %c0_i32_0 = arith.constant 0 : i32
    return %arg0, %c0_i32 : i32, i32
  }
}

module attributes {stable_mosaic.version = 11 : i64} {
  func.func @_gemm_mask_kernel(%arg0: i32, %arg1: memref<128x288xbf16, #tpu.memory_space<vmem>>, %arg2: memref<288x64xbf16, #tpu.memory_space<vmem>>, %arg3: memref<1x64xf32, #tpu.memory_space<vmem>>, %arg4: memref<1x64xf32, #tpu.memory_space<vmem>>, %arg5: memref<1x64xf32, #tpu.memory_space<vmem>>, %arg6: memref<128x64xf32, #tpu.memory_space<vmem>>) attributes {dimension_semantics = [#tpu.dimension_semantics<parallel>], iteration_bounds = array<i64: 1>, scalar_prefetch = 0 : i64, scratch_operands = 0 : i64, tpu.core_type = #tpu.core_type<tc>, window_params = [{transform_indices = @transform_0, window_bounds = array<i64: 128, 288>}, {pipeline_mode = #tpu.pipeline_mode<synchronous>, transform_indices = @transform_1, window_bounds = array<i64: 288, 64>}, {pipeline_mode = #tpu.pipeline_mode<synchronous>, transform_indices = @transform_2, window_bounds = array<i64: 1, 64>}, {pipeline_mode = #tpu.pipeline_mode<synchronous>, transform_indices = @transform_3, window_bounds = array<i64: 1, 64>}, {pipeline_mode = #tpu.pipeline_mode<synchronous>, transform_indices = @transform_4, window_bounds = array<i64: 1, 64>}, {transform_indices = @transform_5, window_bounds = array<i64: 128, 64>}]} {
    %c0 = arith.constant 0 : index
    %c0_0 = arith.constant 0 : index
    %0 = vector.load %arg1[%c0, %c0_0] : memref<128x288xbf16, #tpu.memory_space<vmem>>, vector<128x288xbf16>
    %c0_1 = arith.constant 0 : index
    %c0_2 = arith.constant 0 : index
    %1 = vector.load %arg2[%c0_1, %c0_2] : memref<288x64xbf16, #tpu.memory_space<vmem>>, vector<288x64xbf16>
    %cst = arith.constant dense<0.000000e+00> : vector<128x64xf32>
    %2 = tpu.matmul %0, %1, %cst {dimension_numbers = #tpu.dot_dimension_numbers<[1], [0], [0], [1], [0, 0, 1, 1], [], []>} : vector<128x288xbf16>, vector<288x64xbf16>, vector<128x64xf32> -> vector<128x64xf32>
    %c0_3 = arith.constant 0 : index
    %c0_4 = arith.constant 0 : index
    %3 = vector.load %arg3[%c0_3, %c0_4] : memref<1x64xf32, #tpu.memory_space<vmem>>, vector<1x64xf32>
    %4 = vector.broadcast %3 : vector<1x64xf32> to vector<128x64xf32>
    %5 = arith.mulf %2, %4 : vector<128x64xf32>
    %c0_5 = arith.constant 0 : index
    %c0_6 = arith.constant 0 : index
    %6 = vector.load %arg4[%c0_5, %c0_6] : memref<1x64xf32, #tpu.memory_space<vmem>>, vector<1x64xf32>
    %7 = vector.broadcast %6 : vector<1x64xf32> to vector<128x64xf32>
    %8 = arith.addf %5, %7 : vector<128x64xf32>
    %c0_7 = arith.constant 0 : index
    %c0_8 = arith.constant 0 : index
    %9 = vector.load %arg5[%c0_7, %c0_8] : memref<1x64xf32, #tpu.memory_space<vmem>>, vector<1x64xf32>
    %cst_9 = arith.constant 0.000000e+00 : f32
    %10 = vector.broadcast %cst_9 : f32 to vector<128x64xf32>
    %11 = arith.maximumf %8, %10 : vector<128x64xf32>
    %12 = vector.broadcast %9 : vector<1x64xf32> to vector<128x64xf32>
    %13 = arith.mulf %12, %11 : vector<128x64xf32>
    %cst_10 = arith.constant 1.000000e+00 : f32
    %14 = vector.broadcast %cst_10 : f32 to vector<1x64xf32>
    %15 = arith.subf %14, %9 : vector<1x64xf32>
    %16 = vector.broadcast %15 : vector<1x64xf32> to vector<128x64xf32>
    %17 = arith.mulf %16, %8 : vector<128x64xf32>
    %18 = arith.addf %13, %17 : vector<128x64xf32>
    %c0_11 = arith.constant 0 : index
    %c0_12 = arith.constant 0 : index
    %19 = vector.load %arg6[%c0_11, %c0_12] : memref<128x64xf32, #tpu.memory_space<vmem>>, vector<128x64xf32>
    tpu.vector_store %arg6[%c0_11, %c0_12], %18 {strides = array<i32>} : memref<128x64xf32, #tpu.memory_space<vmem>>, vector<128x64xf32>,
    return
  }
  func.func @transform_0(%arg0: i32) -> (i32, i32) {
    %c0_i32 = arith.constant 0 : i32
    %c0_i32_0 = arith.constant 0 : i32
    return %arg0, %c0_i32 : i32, i32
  }
  func.func @transform_1(%arg0: i32) -> (i32, i32) {
    %c0_i32 = arith.constant 0 : i32
    %c0_i32_0 = arith.constant 0 : i32
    %c0_i32_1 = arith.constant 0 : i32
    return %c0_i32, %c0_i32_0 : i32, i32
  }
  func.func @transform_2(%arg0: i32) -> (i32, i32) {
    %c0_i32 = arith.constant 0 : i32
    %c0_i32_0 = arith.constant 0 : i32
    %c0_i32_1 = arith.constant 0 : i32
    return %c0_i32, %c0_i32_0 : i32, i32
  }
  func.func @transform_3(%arg0: i32) -> (i32, i32) {
    %c0_i32 = arith.constant 0 : i32
    %c0_i32_0 = arith.constant 0 : i32
    %c0_i32_1 = arith.constant 0 : i32
    return %c0_i32, %c0_i32_0 : i32, i32
  }
  func.func @transform_4(%arg0: i32) -> (i32, i32) {
    %c0_i32 = arith.constant 0 : i32
    %c0_i32_0 = arith.constant 0 : i32
    %c0_i32_1 = arith.constant 0 : i32
    return %c0_i32, %c0_i32_0 : i32, i32
  }
  func.func @transform_5(%arg0: i32) -> (i32, i32) {
    %c0_i32 = arith.constant 0 : i32
    %c0_i32_0 = arith.constant 0 : i32
    return %arg0, %c0_i32 : i32, i32
  }
}

module attributes {stable_mosaic.version = 11 : i64} {
  func.func @_gemm_kernel(%arg0: i32, %arg1: memref<2x1568xbf16, #tpu.memory_space<vmem>>, %arg2: memref<1568x8xbf16, #tpu.memory_space<vmem>>, %arg3: memref<1x8xf32, #tpu.memory_space<vmem>>, %arg4: memref<1x8xf32, #tpu.memory_space<vmem>>, %arg5: memref<2x8xf32, #tpu.memory_space<vmem>>) attributes {dimension_semantics = [#tpu.dimension_semantics<parallel>], iteration_bounds = array<i64: 1>, scalar_prefetch = 0 : i64, scratch_operands = 0 : i64, tpu.core_type = #tpu.core_type<tc>, window_params = [{transform_indices = @transform_0, window_bounds = array<i64: 2, 1568>}, {pipeline_mode = #tpu.pipeline_mode<synchronous>, transform_indices = @transform_1, window_bounds = array<i64: 1568, 8>}, {pipeline_mode = #tpu.pipeline_mode<synchronous>, transform_indices = @transform_2, window_bounds = array<i64: 1, 8>}, {pipeline_mode = #tpu.pipeline_mode<synchronous>, transform_indices = @transform_3, window_bounds = array<i64: 1, 8>}, {transform_indices = @transform_4, window_bounds = array<i64: 2, 8>}]} {
    %c0 = arith.constant 0 : index
    %c0_0 = arith.constant 0 : index
    %0 = vector.load %arg1[%c0, %c0_0] : memref<2x1568xbf16, #tpu.memory_space<vmem>>, vector<2x1568xbf16>
    %c0_1 = arith.constant 0 : index
    %c0_2 = arith.constant 0 : index
    %1 = vector.load %arg2[%c0_1, %c0_2] : memref<1568x8xbf16, #tpu.memory_space<vmem>>, vector<1568x8xbf16>
    %cst = arith.constant dense<0.000000e+00> : vector<2x8xf32>
    %2 = tpu.matmul %0, %1, %cst {dimension_numbers = #tpu.dot_dimension_numbers<[1], [0], [0], [1], [0, 0, 1, 1], [], []>} : vector<2x1568xbf16>, vector<1568x8xbf16>, vector<2x8xf32> -> vector<2x8xf32>
    %c0_3 = arith.constant 0 : index
    %c0_4 = arith.constant 0 : index
    %3 = vector.load %arg3[%c0_3, %c0_4] : memref<1x8xf32, #tpu.memory_space<vmem>>, vector<1x8xf32>
    %4 = vector.broadcast %3 : vector<1x8xf32> to vector<2x8xf32>
    %5 = arith.mulf %2, %4 : vector<2x8xf32>
    %c0_5 = arith.constant 0 : index
    %c0_6 = arith.constant 0 : index
    %6 = vector.load %arg4[%c0_5, %c0_6] : memref<1x8xf32, #tpu.memory_space<vmem>>, vector<1x8xf32>
    %7 = vector.broadcast %6 : vector<1x8xf32> to vector<2x8xf32>
    %8 = arith.addf %5, %7 : vector<2x8xf32>
    %c0_7 = arith.constant 0 : index
    %c0_8 = arith.constant 0 : index
    %9 = vector.load %arg5[%c0_7, %c0_8] : memref<2x8xf32, #tpu.memory_space<vmem>>, vector<2x8xf32>
    tpu.vector_store %arg5[%c0_7, %c0_8], %8 {strides = array<i32>} : memref<2x8xf32, #tpu.memory_space<vmem>>, vector<2x8xf32>,
    return
  }
  func.func @transform_0(%arg0: i32) -> (i32, i32) {
    %c0_i32 = arith.constant 0 : i32
    %c0_i32_0 = arith.constant 0 : i32
    return %arg0, %c0_i32 : i32, i32
  }
  func.func @transform_1(%arg0: i32) -> (i32, i32) {
    %c0_i32 = arith.constant 0 : i32
    %c0_i32_0 = arith.constant 0 : i32
    %c0_i32_1 = arith.constant 0 : i32
    return %c0_i32, %c0_i32_0 : i32, i32
  }
  func.func @transform_2(%arg0: i32) -> (i32, i32) {
    %c0_i32 = arith.constant 0 : i32
    %c0_i32_0 = arith.constant 0 : i32
    %c0_i32_1 = arith.constant 0 : i32
    return %c0_i32, %c0_i32_0 : i32, i32
  }
  func.func @transform_3(%arg0: i32) -> (i32, i32) {
    %c0_i32 = arith.constant 0 : i32
    %c0_i32_0 = arith.constant 0 : i32
    %c0_i32_1 = arith.constant 0 : i32
    return %c0_i32, %c0_i32_0 : i32, i32
  }
  func.func @transform_4(%arg0: i32) -> (i32, i32) {
    %c0_i32 = arith.constant 0 : i32
    %c0_i32_0 = arith.constant 0 : i32
    return %arg0, %c0_i32 : i32, i32
  }
}

</mosaic_0001>

<bundles_post_ra>
// kernel: resnet_forward.16
= control target key start
LH: loop header
LB: loop body
LE: loop exit
PB: predicated region body
PF: predicated region fallthrough
CT: control target
= control target key end

     0   :  { %s2475_s15 = smov 0   ;;  %s3172_s0 = inlined_call_operand.vmem [shape: bf16[2048,49], index: 0, kind: input, shape index: {}]   ;;  %s3173_s1 = inlined_call_operand.vmem [shape: bf16[49,16], index: 1, kind: input, shape index: {}]   ;;  %s3174_s2 = inlined_call_operand.vmem [shape: f32[1,16], index: 2, kind: input, shape index: {}]   ;;  %s3175_s3 = inlined_call_operand.vmem [shape: f32[1,16], index: 3, kind: input, shape index: {}]   ;;  %s3176_s4 = inlined_call_operand.vmem [shape: f32[2048,16], index: 4, kind: output, shape index: {}]  }
   0x1 LB: > { %s2005_s16 = sadd.s32 4294967295, %s2447_s15   ;;  %p2009_p0 = scmp.ge.s32.totalorder %s2447_s15, 1  ;;  %s2447_s15 = sphi %s2475_s15, %s14_s15  }
   0x2   : > { %p163_p1 = scmp.lt.s32.totalorder %s2447_s15, 3 }
   0x4   : > { %p164_p2 = pnand %p2009_p0, %p163_p1 }
   0x5   : > { %s2010_s21 = sshll.u32 (!%p164_p2), %s2005_s16, 7 }
   0x6   : > { %167 = sbr.rel (%p164_p2) target bundleno = 357 (0x165), region = 36  ;;  %p190_p3 = scmp.lt.s32.totalorder (!%p164_p2), %s2010_s21, 255 }
   0xb   : > { %v2371_v0 = vld [vmem:[%s3173_s1 + $0x18] ss:$0 sps:$4 sm:$0x11]   ;;  %vm871_vm0 = vcmask 1040384   ;;  %v2449_v1 = vmov 0   ;;  %v2372_v4 = vld [vmem:[%s3173_s1 + $0x10] sm:$0xff]  }
   0xc   : > { %v873_v2 = vsel %vm871_vm0, 65535, %v2449_v1  ;;  %s3178_s21 = smov (!%p190_p3, %s2010_s21), 255  ;;  %v2373_v5 = vld [vmem:[%s3173_s1 + $0x8] sm:$0xff]   ;;  %v2374_v6 = vld [vmem:[%s3173_s1] sm:$0xff]   ;;  %vm678_vm1 = vcmask 400384   ;;  %vm1820_vm2 = vcmask 130048  }
   0xd   : > { %v875_v3 = vand.u32 %v2371_v0, %v873_v2  ;;  %s2011_s24 = sshll.u32 %s3178_s21, 2  ;;  %s2013_s8 = sshll.u32 %s3178_s21, 3 }
   0xe   : > { %s2501_s29 = scalar_lea.vmem %s3172_s0, %s2011_s24  ;;  %s2651_s11 = scalar_lea.vmem %s3176_s4, %s2013_s8 }
   0xf   : > { %2218 = vmatprep.subr.bf16.mxu0 %v875_v3  ;;  %2354 = vmatprep.subr.bf16.mxu1 %v875_v3  ;;  %v2375_v7 = vld [vmem:[%s2501_s29] sm:$0xff]   ;;  %v2377_v9 = vld [vmem:[%s2501_s29 + $0x8] sm:$0xff]   ;;  %v2379_v11 = vld [vmem:[%s2501_s29 + $0x10] sm:$0xff]  }
  0x10   : > { %2219 = vmatpush3.bf16.msra.mxu0 %v875_v3  ;;  %2358 = vmatpush3.bf16.msra.mxu1 %v875_v3  ;;  %v2376_v8 = vld [vmem:[%s2501_s29 + $0x100] sm:$0xff]   ;;  %v2378_v10 = vld [vmem:[%s2501_s29 + $0x108] sm:$0xff]   ;;  %v2380_v12 = vld [vmem:[%s2501_s29 + $0x110] sm:$0xff]  }
  0x11   : > { %2220 = vmatprep.subr.bf16.mxu0 %v2372_v4  ;;  %2355 = vmatprep.subr.bf16.mxu1 %v2372_v4  ;;  %v2381_v13 = vld [vmem:[%s2501_s29 + $0x18] sm:$0xff]   ;;  %v2383_v15 = vld [vmem:[%s2501_s29 + $0x20] sm:$0xff]   ;;  %v2385_v17 = vld [vmem:[%s2501_s29 + $0x28] sm:$0xff]  }
  0x12   : > { %2226 = vmatprep.mubr.msk.bf16.mxu0 %vm678_vm1, %v2375_v7  ;;  %2290 = vmatprep.mubr.msk.bf16.mxu1 %vm678_vm1, %v2376_v8  ;;  %v2382_v14 = vld [vmem:[%s2501_s29 + $0x118] sm:$0xff]   ;;  %v2384_v16 = vld [vmem:[%s2501_s29 + $0x120] sm:$0xff]   ;;  %v2386_v18 = vld [vmem:[%s2501_s29 + $0x128] sm:$0xff]  }
  0x13   : > { %v2387_v19 = vld [vmem:[%s2501_s29 + $0x30] sm:$0xff]   ;;  %v2389_v21 = vld [vmem:[%s2501_s29 + $0x38] sm:$0xff]   ;;  %v2391_v23 = vld [vmem:[%s2501_s29 + $0x40] sm:$0xff]  }
  0x14   : > { %2221 = vmatpush3.bf16.msra.mxu0 %v2372_v4  ;;  %2359 = vmatpush3.bf16.msra.mxu1 %v2372_v4  ;;  %v2388_v20 = vld [vmem:[%s2501_s29 + $0x130] sm:$0xff]   ;;  %v2390_v22 = vld [vmem:[%s2501_s29 + $0x138] sm:$0xff]   ;;  %v2392_v24 = vld [vmem:[%s2501_s29 + $0x140] sm:$0xff]  }
  0x15   : > { %2222 = vmatprep.subr.bf16.mxu0 %v2373_v5  ;;  %2356 = vmatprep.subr.bf16.mxu1 %v2373_v5  ;;  %v2393_v25 = vld [vmem:[%s2501_s29 + $0x48] sm:$0xff]   ;;  %v2395_v27 = vld [vmem:[%s2501_s29 + $0x50] sm:$0xff]   ;;  %v2397_v29 = vld [vmem:[%s2501_s29 + $0x58] sm:$0xff]  }
  0x16   : > { %v2394_v26 = vld [vmem:[%s2501_s29 + $0x148] sm:$0xff]   ;;  %v2396_v28 = vld [vmem:[%s2501_s29 + $0x150] sm:$0xff]   ;;  %v2398_v30 = vld [vmem:[%s2501_s29 + $0x158] sm:$0xff]  }
  0x17   : > { %v2399_v31 = vld [vmem:[%s2501_s29 + $0x60] sm:$0xff]   ;;  %v2401_v33 = vld [vmem:[%s2501_s29 + $0x68] sm:$0xff]   ;;  %v2403_v35 = vld [vmem:[%s2501_s29 + $0x70] sm:$0xff]  }
  0x18   : > { %2223 = vmatpush3.bf16.msra.mxu0 %v2373_v5  ;;  %2360 = vmatpush3.bf16.msra.mxu1 %v2373_v5  ;;  %v2400_v32 = vld [vmem:[%s2501_s29 + $0x160] sm:$0xff]   ;;  %v2402_v34 = vld [vmem:[%s2501_s29 + $0x168] sm:$0xff]   ;;  %v2404_v36 = vld [vmem:[%s2501_s29 + $0x170] sm:$0xff]  }
  0x19   : > { %2224 = vmatprep.subr.bf16.mxu0 %v2374_v6  ;;  %2357 = vmatprep.subr.bf16.mxu1 %v2374_v6  ;;  %v2405_v37 = vld [vmem:[%s2501_s29 + $0x78] sm:$0xff]   ;;  %v2407_v39 = vld [vmem:[%s2501_s29 + $0x80] sm:$0xff]   ;;  %v2409_v41 = vld [vmem:[%s2501_s29 + $0x88] sm:$0xff]  }
  0x1a   : > { %v2406_v38 = vld [vmem:[%s2501_s29 + $0x178] sm:$0xff]   ;;  %v2408_v40 = vld [vmem:[%s2501_s29 + $0x180] sm:$0xff]   ;;  %v2410_v42 = vld [vmem:[%s2501_s29 + $0x188] sm:$0xff]  }
  0x1b   : > { %v2411_v43 = vld [vmem:[%s2501_s29 + $0x90] sm:$0xff]   ;;  %v2413_v45 = vld [vmem:[%s2501_s29 + $0x98] sm:$0xff]   ;;  %v2415_v47 = vld [vmem:[%s2501_s29 + $0xa0] sm:$0xff]  }
  0x1c   : > { %2225 = vmatpush3.bf16.msra.mxu0 %v2374_v6  ;;  %2361 = vmatpush3.bf16.msra.mxu1 %v2374_v6  ;;  %v2412_v44 = vld [vmem:[%s2501_s29 + $0x190] sm:$0xff]   ;;  %v2414_v46 = vld [vmem:[%s2501_s29 + $0x198] sm:$0xff]   ;;  %v2416_v48 = vld [vmem:[%s2501_s29 + $0x1a0] sm:$0xff]  }
  0x1d   : > { %v2417_v49 = vld [vmem:[%s2501_s29 + $0xa8] sm:$0xff]   ;;  %v2419_v51 = vld [vmem:[%s2501_s29 + $0xb0] sm:$0xff]   ;;  %v2421_v53 = vld [vmem:[%s2501_s29 + $0xb8] sm:$0xff]  }
  0x1e   : > { %v2418_v50 = vld [vmem:[%s2501_s29 + $0x1a8] sm:$0xff]   ;;  %v2420_v52 = vld [vmem:[%s2501_s29 + $0x1b0] sm:$0xff]   ;;  %v2422_v54 = vld [vmem:[%s2501_s29 + $0x1b8] sm:$0xff]  }
  0x1f   : > { %2227 = vmatmul.mubr.msk.bf16.vlgmr.msra.gmra.mxu0 %vm678_vm1, %v2377_v9  ;;  %2291 = vmatmul.mubr.msk.bf16.vlgmr.msra.gmra.mxu1 %vm678_vm1, %v2378_v10  ;;  %v2423_v55 = vld [vmem:[%s2501_s29 + $0xc0] sm:$0xff]   ;;  %v2425_v57 = vld [vmem:[%s2501_s29 + $0xc8] sm:$0xff]   ;;  %v2427_v59 = vld [vmem:[%s2501_s29 + $0xd0] sm:$0xff]  }
  0x20   : > { %2230 = vmatprep.mubr.msk.bf16.mxu0 %vm678_vm1, %v2379_v11  ;;  %2294 = vmatprep.mubr.msk.bf16.mxu1 %vm678_vm1, %v2380_v12  ;;  %v2424_v56 = vld [vmem:[%s2501_s29 + $0x1c0] sm:$0xff]   ;;  %v2426_v58 = vld [vmem:[%s2501_s29 + $0x1c8] sm:$0xff]   ;;  %v2428_v60 = vld [vmem:[%s2501_s29 + $0x1d0] sm:$0xff]  }
  0x21   : > { %v2429_v61 = vld [vmem:[%s2501_s29 + $0xd8] sm:$0xff]   ;;  %v2431_v63 = vld [vmem:[%s2501_s29 + $0xe0] sm:$0xff]   ;;  %v2433_v1 = vld [vmem:[%s2501_s29 + $0xe8] sm:$0xff]  }
  0x22   : > { %v2430_v62 = vld [vmem:[%s2501_s29 + $0x1d8] sm:$0xff]   ;;  %v2432_v0 = vld [vmem:[%s2501_s29 + $0x1e0] sm:$0xff]   ;;  %v2434_v2 = vld [vmem:[%s2501_s29 + $0x1e8] sm:$0xff]  }
  0x23   : > { %v2435_v3 = vld [vmem:[%s2501_s29 + $0xf0] sm:$0xff]   ;;  %v2437_v5 = vld [vmem:[%s2501_s29 + $0xf8] sm:$0xff]   ;;  %v2634_v7 = vld [vmem:[%s3174_s2] ss:$0 sm:$0xff] }
  0x24   : > { %v2436_v4 = vld [vmem:[%s2501_s29 + $0x1f0] sm:$0xff]   ;;  %v2438_v6 = vld [vmem:[%s2501_s29 + $0x1f8] sm:$0xff]   ;;  %v2639_v9 = vld [vmem:[%s3175_s3] ss:$0 sm:$0xff] }
  0x27   : > { %2231 = vmatmul.mubr.msk.bf16.gmra.mxu0 %vm678_vm1, %v2381_v13  ;;  %2295 = vmatmul.mubr.msk.bf16.gmra.mxu1 %vm678_vm1, %v2382_v14 }
  0x28   : > { %2234 = vmatprep.mubr.msk.bf16.mxu0 %vm678_vm1, %v2383_v15  ;;  %2298 = vmatprep.mubr.msk.bf16.mxu1 %vm678_vm1, %v2384_v16 }
  0x2f   : > { %2235 = vmatmul.mubr.msk.bf16.gmra.mxu0 %vm678_vm1, %v2385_v17  ;;  %2299 = vmatmul.mubr.msk.bf16.gmra.mxu1 %vm678_vm1, %v2386_v18 }
  0x30   : > { %2238 = vmatprep.mubr.msk.bf16.mxu0 %vm678_vm1, %v2387_v19  ;;  %2302 = vmatprep.mubr.msk.bf16.mxu1 %vm678_vm1, %v2388_v20 }
  0x37   : > { %2239 = vmatmul.mubr.msk.bf16.gmra.mxu0 %vm678_vm1, %v2389_v21  ;;  %2303 = vmatmul.mubr.msk.bf16.gmra.mxu1 %vm678_vm1, %v2390_v22 }
  0x38   : > { %2242 = vmatprep.mubr.msk.bf16.mxu0 %vm678_vm1, %v2391_v23  ;;  %2306 = vmatprep.mubr.msk.bf16.mxu1 %vm678_vm1, %v2392_v24 }
  0x3f   : > { %2243 = vmatmul.mubr.msk.bf16.gmra.mxu0 %vm678_vm1, %v2393_v25  ;;  %2307 = vmatmul.mubr.msk.bf16.gmra.mxu1 %vm678_vm1, %v2394_v26 }
  0x40   : > { %2246 = vmatprep.mubr.msk.bf16.mxu0 %vm678_vm1, %v2395_v27  ;;  %2310 = vmatprep.mubr.msk.bf16.mxu1 %vm678_vm1, %v2396_v28 }
  0x47   : > { %2247 = vmatmul.mubr.msk.bf16.gmra.mxu0 %vm678_vm1, %v2397_v29  ;;  %2311 = vmatmul.mubr.msk.bf16.gmra.mxu1 %vm678_vm1, %v2398_v30 }
  0x48   : > { %2250 = vmatprep.mubr.msk.bf16.mxu0 %vm678_vm1, %v2399_v31  ;;  %2314 = vmatprep.mubr.msk.bf16.mxu1 %vm678_vm1, %v2400_v32 }
  0x4f   : > { %2251 = vmatmul.mubr.msk.bf16.gmra.mxu0 %vm678_vm1, %v2401_v33  ;;  %2315 = vmatmul.mubr.msk.bf16.gmra.mxu1 %vm678_vm1, %v2402_v34 }
  0x50   : > { %2254 = vmatprep.mubr.msk.bf16.mxu0 %vm678_vm1, %v2403_v35  ;;  %2318 = vmatprep.mubr.msk.bf16.mxu1 %vm678_vm1, %v2404_v36 }
  0x57   : > { %2255 = vmatmul.mubr.msk.bf16.gmra.mxu0 %vm678_vm1, %v2405_v37  ;;  %2319 = vmatmul.mubr.msk.bf16.gmra.mxu1 %vm678_vm1, %v2406_v38 }
  0x58   : > { %2258 = vmatprep.mubr.msk.bf16.mxu0 %vm678_vm1, %v2407_v39  ;;  %2322 = vmatprep.mubr.msk.bf16.mxu1 %vm678_vm1, %v2408_v40 }
  0x5f   : > { %2259 = vmatmul.mubr.msk.bf16.gmra.mxu0 %vm678_vm1, %v2409_v41  ;;  %2323 = vmatmul.mubr.msk.bf16.gmra.mxu1 %vm678_vm1, %v2410_v42 }
  0x60   : > { %2262 = vmatprep.mubr.msk.bf16.mxu0 %vm678_vm1, %v2411_v43  ;;  %2326 = vmatprep.mubr.msk.bf16.mxu1 %vm678_vm1, %v2412_v44 }
  0x67   : > { %2263 = vmatmul.mubr.msk.bf16.gmra.mxu0 %vm678_vm1, %v2413_v45  ;;  %2327 = vmatmul.mubr.msk.bf16.gmra.mxu1 %vm678_vm1, %v2414_v46 }
  0x68   : > { %2266 = vmatprep.mubr.msk.bf16.mxu0 %vm678_vm1, %v2415_v47  ;;  %2330 = vmatprep.mubr.msk.bf16.mxu1 %vm678_vm1, %v2416_v48 }
  0x6f   : > { %2267 = vmatmul.mubr.msk.bf16.gmra.mxu0 %vm678_vm1, %v2417_v49  ;;  %2331 = vmatmul.mubr.msk.bf16.gmra.mxu1 %vm678_vm1, %v2418_v50 }
  0x70   : > { %2270 = vmatprep.mubr.msk.bf16.mxu0 %vm678_vm1, %v2419_v51  ;;  %2334 = vmatprep.mubr.msk.bf16.mxu1 %vm678_vm1, %v2420_v52 }
  0x77   : > { %2271 = vmatmul.mubr.msk.bf16.gmra.mxu0 %vm678_vm1, %v2421_v53  ;;  %2335 = vmatmul.mubr.msk.bf16.gmra.mxu1 %vm678_vm1, %v2422_v54 }
  0x78   : > { %2274 = vmatprep.mubr.msk.bf16.mxu0 %vm678_vm1, %v2423_v55  ;;  %2338 = vmatprep.mubr.msk.bf16.mxu1 %vm678_vm1, %v2424_v56 }
  0x7f   : > { %2275 = vmatmul.mubr.msk.bf16.gmra.mxu0 %vm678_vm1, %v2425_v57  ;;  %2339 = vmatmul.mubr.msk.bf16.gmra.mxu1 %vm678_vm1, %v2426_v58 }
  0x80   : > { %2278 = vmatprep.mubr.msk.bf16.mxu0 %vm678_vm1, %v2427_v59  ;;  %2342 = vmatprep.mubr.msk.bf16.mxu1 %vm678_vm1, %v2428_v60 }
  0x87   : > { %2279 = vmatmul.mubr.msk.bf16.gmra.mxu0 %vm678_vm1, %v2429_v61  ;;  %2343 = vmatmul.mubr.msk.bf16.gmra.mxu1 %vm678_vm1, %v2430_v62 }
  0x88   : > { %2282 = vmatprep.mubr.msk.bf16.mxu0 %vm678_vm1, %v2431_v63  ;;  %2346 = vmatprep.mubr.msk.bf16.mxu1 %vm678_vm1, %v2432_v0 }
  0x8f   : > { %2283 = vmatmul.mubr.msk.bf16.gmra.mxu0 %vm678_vm1, %v2433_v1  ;;  %2347 = vmatmul.mubr.msk.bf16.gmra.mxu1 %vm678_vm1, %v2434_v2 }
  0x90   : > { %2286 = vmatprep.mubr.msk.bf16.mxu0 %vm678_vm1, %v2435_v3  ;;  %2350 = vmatprep.mubr.msk.bf16.mxu1 %vm678_vm1, %v2436_v4 }
  0x97   : > { %2287 = vmatmul.mubr.msk.bf16.gmra.mxu0 %vm678_vm1, %v2437_v5  ;;  %2351 = vmatmul.mubr.msk.bf16.gmra.mxu1 %vm678_vm1, %v2438_v6 }
  0xdf   : > { %v2228_v8 = vpop.f32.mrf.mxu0  ;;  %v2292_v10 = vpop.f32.mrf.mxu1 }
  0xe0   : > { %v1431_v11 = vmul.f32 %v2228_v8, %v2634_v7  ;;  %v1495_v12 = vmul.f32 %v2292_v10, %v2634_v7 }
  0xe1   : > { %v911_v13 = vpop.f32.mrf.mxu0  ;;  %v1167_v14 = vpop.f32.mrf.mxu1 }
  0xe2   : > { %v1566_v15 = vadd.f32 %v2639_v9, %v1431_v11  ;;  %v1630_v16 = vadd.f32 %v2639_v9, %v1495_v12  ;;  %v1429_v17 = vmul.f32 %v2634_v7, %v911_v13  ;;  %v1493_v18 = vmul.f32 %v2634_v7, %v1167_v14 }
  0xe3   : > { %v2229_v19 = vpop.f32.mrf.mxu0  ;;  %v2293_v20 = vpop.f32.mrf.mxu1 }
  0xe4   : > { %v1694_v21 = vmax.f32 %v1566_v15, 0.0  ;;  %v1758_v22 = vmax.f32 %v1630_v16, 0.0  ;;  %v1564_v23 = vadd.f32 %v2639_v9, %v1429_v17  ;;  %v1628_v24 = vadd.f32 %v2639_v9, %v1493_v18 }
  0xe5   : > { %v1432_v25 = vmul.f32 %v2229_v19, %v2634_v7  ;;  %v1496_v26 = vmul.f32 %v2293_v20, %v2634_v7  ;;  %v914_v27 = vpop.f32.mrf.mxu0  ;;  %v1170_v28 = vpop.f32.mrf.mxu1 }
  0xe6   : > { %1823 = vst.msk [vmem:[%s2651_s11 + $0x10] sm:$0xff] %vm1820_vm2, %v1694_v21  ;;  %1887 = vst.msk [vmem:[%s2651_s11 + $0x210] sm:$0xff] %vm1820_vm2, %v1758_v22  ;;  %v1692_v29 = vmax.f32 %v1564_v23, 0.0  ;;  %v1756_v30 = vmax.f32 %v1628_v24, 0.0  ;;  %v1430_v31 = vmul.f32 %v2634_v7, %v914_v27  ;;  %v1494_v32 = vmul.f32 %v2634_v7, %v1170_v28 }
  0xe7   : > { %v1567_v33 = vadd.f32 %v2639_v9, %v1432_v25  ;;  %v1631_v34 = vadd.f32 %v2639_v9, %v1496_v26  ;;  %v2232_v35 = vpop.f32.mrf.mxu0  ;;  %v2296_v36 = vpop.f32.mrf.mxu1 }
  0xe8   : > { %1821 = vst.msk [vmem:[%s2651_s11] sm:$0xff] %vm1820_vm2, %v1692_v29  ;;  %1885 = vst.msk [vmem:[%s2651_s11 + $0x200] sm:$0xff] %vm1820_vm2, %v1756_v30  ;;  %v1565_v37 = vadd.f32 %v2639_v9, %v1430_v31  ;;  %v1629_v38 = vadd.f32 %v2639_v9, %v1494_v32  ;;  %v1435_v39 = vmul.f32 %v2232_v35, %v2634_v7 }
  0xe9   : > { %v1499_v40 = vmul.f32 %v2296_v36, %v2634_v7  ;;  %v1695_v41 = vmax.f32 %v1567_v33, 0.0  ;;  %v1759_v42 = vmax.f32 %v1631_v34, 0.0  ;;  %v927_v43 = vpop.f32.mrf.mxu0  ;;  %v1183_v44 = vpop.f32.mrf.mxu1 }
  0xea   : > { %v1693_v45 = vmax.f32 %v1565_v37, 0.0  ;;  %v1757_v46 = vmax.f32 %v1629_v38, 0.0  ;;  %v1570_v47 = vadd.f32 %v2639_v9, %v1435_v39  ;;  %v1433_v49 = vmul.f32 %v2634_v7, %v927_v43 }
  0xeb   : > { %v1634_v48 = vadd.f32 %v2639_v9, %v1499_v40  ;;  %1824 = vst.msk [vmem:[%s2651_s11 + $0x18] sm:$0xff] %vm1820_vm2, %v1695_v41  ;;  %1888 = vst.msk [vmem:[%s2651_s11 + $0x218] sm:$0xff] %vm1820_vm2, %v1759_v42  ;;  %v1497_v50 = vmul.f32 %v2634_v7, %v1183_v44  ;;  %v2233_v51 = vpop.f32.mrf.mxu0  ;;  %v2297_v52 = vpop.f32.mrf.mxu1 }
  0xec   : > { %1822 = vst.msk [vmem:[%s2651_s11 + $0x8] sm:$0xff] %vm1820_vm2, %v1693_v45  ;;  %1886 = vst.msk [vmem:[%s2651_s11 + $0x208] sm:$0xff] %vm1820_vm2, %v1757_v46  ;;  %v1698_v53 = vmax.f32 %v1570_v47, 0.0  ;;  %v1436_v55 = vmul.f32 %v2233_v51, %v2634_v7  ;;  %v1500_v56 = vmul.f32 %v2297_v52, %v2634_v7  ;;  %v1568_v57 = vadd.f32 %v2639_v9, %v1433_v49 }
  0xed   : > { %v1762_v54 = vmax.f32 %v1634_v48, 0.0  ;;  %v1632_v58 = vadd.f32 %v2639_v9, %v1497_v50  ;;  %v930_v59 = vpop.f32.mrf.mxu0  ;;  %v1186_v60 = vpop.f32.mrf.mxu1 }
  0xee   : > { %1827 = vst.msk [vmem:[%s2651_s11 + $0x30] sm:$0xff] %vm1820_vm2, %v1698_v53  ;;  %v1571_v61 = vadd.f32 %v2639_v9, %v1436_v55  ;;  %v1635_v62 = vadd.f32 %v2639_v9, %v1500_v56  ;;  %v1434_v63 = vmul.f32 %v2634_v7, %v930_v59  ;;  %v1498_v0 = vmul.f32 %v2634_v7, %v1186_v60 }
  0xef   : > { %1891 = vst.msk [vmem:[%s2651_s11 + $0x230] sm:$0xff] %vm1820_vm2, %v1762_v54  ;;  %v1696_v1 = vmax.f32 %v1568_v57, 0.0  ;;  %v1760_v2 = vmax.f32 %v1632_v58, 0.0  ;;  %v2236_v3 = vpop.f32.mrf.mxu0  ;;  %v2300_v4 = vpop.f32.mrf.mxu1 }
  0xf0   : > { %v1699_v5 = vmax.f32 %v1571_v61, 0.0  ;;  %v1763_v6 = vmax.f32 %v1635_v62, 0.0  ;;  %v1569_v8 = vadd.f32 %v2639_v9, %v1434_v63  ;;  %v1633_v10 = vadd.f32 %v2639_v9, %v1498_v0 }
  0xf1   : > { %1825 = vst.msk [vmem:[%s2651_s11 + $0x20] sm:$0xff] %vm1820_vm2, %v1696_v1  ;;  %1889 = vst.msk [vmem:[%s2651_s11 + $0x220] sm:$0xff] %vm1820_vm2, %v1760_v2  ;;  %v1439_v11 = vmul.f32 %v2236_v3, %v2634_v7  ;;  %v1503_v12 = vmul.f32 %v2300_v4, %v2634_v7  ;;  %v943_v13 = vpop.f32.mrf.mxu0  ;;  %v1199_v14 = vpop.f32.mrf.mxu1 }
  0xf2   : > { %1828 = vst.msk [vmem:[%s2651_s11 + $0x38] sm:$0xff] %vm1820_vm2, %v1699_v5  ;;  %1892 = vst.msk [vmem:[%s2651_s11 + $0x238] sm:$0xff] %vm1820_vm2, %v1763_v6  ;;  %v1697_v15 = vmax.f32 %v1569_v8, 0.0  ;;  %v1761_v16 = vmax.f32 %v1633_v10, 0.0  ;;  %v1437_v17 = vmul.f32 %v2634_v7, %v943_v13  ;;  %v1501_v18 = vmul.f32 %v2634_v7, %v1199_v14 }
  0xf3   : > { %v1574_v19 = vadd.f32 %v2639_v9, %v1439_v11  ;;  %v1638_v20 = vadd.f32 %v2639_v9, %v1503_v12  ;;  %v2237_v21 = vpop.f32.mrf.mxu0  ;;  %v2301_v22 = vpop.f32.mrf.mxu1 }
  0xf4   : > { %1826 = vst.msk [vmem:[%s2651_s11 + $0x28] sm:$0xff] %vm1820_vm2, %v1697_v15  ;;  %1890 = vst.msk [vmem:[%s2651_s11 + $0x228] sm:$0xff] %vm1820_vm2, %v1761_v16  ;;  %v1572_v23 = vadd.f32 %v2639_v9, %v1437_v17  ;;  %v1636_v24 = vadd.f32 %v2639_v9, %v1501_v18  ;;  %v1440_v25 = vmul.f32 %v2237_v21, %v2634_v7 }
  0xf5   : > { %v1504_v26 = vmul.f32 %v2301_v22, %v2634_v7  ;;  %v1702_v27 = vmax.f32 %v1574_v19, 0.0  ;;  %v1766_v28 = vmax.f32 %v1638_v20, 0.0  ;;  %v946_v29 = vpop.f32.mrf.mxu0  ;;  %v1202_v30 = vpop.f32.mrf.mxu1 }
  0xf6   : > { %v1700_v31 = vmax.f32 %v1572_v23, 0.0  ;;  %v1764_v32 = vmax.f32 %v1636_v24, 0.0  ;;  %v1575_v33 = vadd.f32 %v2639_v9, %v1440_v25  ;;  %v1438_v35 = vmul.f32 %v2634_v7, %v946_v29 }
  0xf7   : > { %v1639_v34 = vadd.f32 %v2639_v9, %v1504_v26  ;;  %1831 = vst.msk [vmem:[%s2651_s11 + $0x50] sm:$0xff] %vm1820_vm2, %v1702_v27  ;;  %1895 = vst.msk [vmem:[%s2651_s11 + $0x250] sm:$0xff] %vm1820_vm2, %v1766_v28  ;;  %v1502_v36 = vmul.f32 %v2634_v7, %v1202_v30  ;;  %v2240_v37 = vpop.f32.mrf.mxu0  ;;  %v2304_v38 = vpop.f32.mrf.mxu1 }
  0xf8   : > { %1829 = vst.msk [vmem:[%s2651_s11 + $0x40] sm:$0xff] %vm1820_vm2, %v1700_v31  ;;  %1893 = vst.msk [vmem:[%s2651_s11 + $0x240] sm:$0xff] %vm1820_vm2, %v1764_v32  ;;  %v1703_v39 = vmax.f32 %v1575_v33, 0.0  ;;  %v1443_v41 = vmul.f32 %v2240_v37, %v2634_v7  ;;  %v1507_v42 = vmul.f32 %v2304_v38, %v2634_v7  ;;  %v1573_v43 = vadd.f32 %v2639_v9, %v1438_v35 }
  0xf9   : > { %v1767_v40 = vmax.f32 %v1639_v34, 0.0  ;;  %v1637_v44 = vadd.f32 %v2639_v9, %v1502_v36  ;;  %v959_v45 = vpop.f32.mrf.mxu0  ;;  %v1215_v46 = vpop.f32.mrf.mxu1 }
  0xfa   : > { %1832 = vst.msk [vmem:[%s2651_s11 + $0x58] sm:$0xff] %vm1820_vm2, %v1703_v39  ;;  %v1578_v47 = vadd.f32 %v2639_v9, %v1443_v41  ;;  %v1642_v48 = vadd.f32 %v2639_v9, %v1507_v42  ;;  %v1441_v49 = vmul.f32 %v2634_v7, %v959_v45  ;;  %v1505_v50 = vmul.f32 %v2634_v7, %v1215_v46 }
  0xfb   : > { %1896 = vst.msk [vmem:[%s2651_s11 + $0x258] sm:$0xff] %vm1820_vm2, %v1767_v40  ;;  %v1701_v51 = vmax.f32 %v1573_v43, 0.0  ;;  %v1765_v52 = vmax.f32 %v1637_v44, 0.0  ;;  %v2241_v53 = vpop.f32.mrf.mxu0  ;;  %v2305_v54 = vpop.f32.mrf.mxu1 }
  0xfc   : > { %v1706_v55 = vmax.f32 %v1578_v47, 0.0  ;;  %v1770_v56 = vmax.f32 %v1642_v48, 0.0  ;;  %v1576_v57 = vadd.f32 %v2639_v9, %v1441_v49  ;;  %v1640_v58 = vadd.f32 %v2639_v9, %v1505_v50 }
  0xfd   : > { %1830 = vst.msk [vmem:[%s2651_s11 + $0x48] sm:$0xff] %vm1820_vm2, %v1701_v51  ;;  %1894 = vst.msk [vmem:[%s2651_s11 + $0x248] sm:$0xff] %vm1820_vm2, %v1765_v52  ;;  %v1444_v59 = vmul.f32 %v2241_v53, %v2634_v7  ;;  %v1508_v60 = vmul.f32 %v2305_v54, %v2634_v7  ;;  %v962_v61 = vpop.f32.mrf.mxu0  ;;  %v1218_v62 = vpop.f32.mrf.mxu1 }
  0xfe   : > { %1835 = vst.msk [vmem:[%s2651_s11 + $0x70] sm:$0xff] %vm1820_vm2, %v1706_v55  ;;  %1899 = vst.msk [vmem:[%s2651_s11 + $0x270] sm:$0xff] %vm1820_vm2, %v1770_v56  ;;  %v1704_v63 = vmax.f32 %v1576_v57, 0.0  ;;  %v1768_v0 = vmax.f32 %v1640_v58, 0.0  ;;  %v1442_v1 = vmul.f32 %v2634_v7, %v962_v61  ;;  %v1506_v2 = vmul.f32 %v2634_v7, %v1218_v62 }
  0xff   : > { %v1579_v3 = vadd.f32 %v2639_v9, %v1444_v59  ;;  %v1643_v4 = vadd.f32 %v2639_v9, %v1508_v60  ;;  %v2244_v5 = vpop.f32.mrf.mxu0  ;;  %v2308_v6 = vpop.f32.mrf.mxu1 }
 0x100   : > { %1833 = vst.msk [vmem:[%s2651_s11 + $0x60] sm:$0xff] %vm1820_vm2, %v1704_v63  ;;  %1897 = vst.msk [vmem:[%s2651_s11 + $0x260] sm:$0xff] %vm1820_vm2, %v1768_v0  ;;  %v1577_v8 = vadd.f32 %v2639_v9, %v1442_v1  ;;  %v1641_v10 = vadd.f32 %v2639_v9, %v1506_v2  ;;  %v1447_v11 = vmul.f32 %v2244_v5, %v2634_v7 }
 0x101   : > { %v1511_v12 = vmul.f32 %v2308_v6, %v2634_v7  ;;  %v1707_v13 = vmax.f32 %v1579_v3, 0.0  ;;  %v1771_v14 = vmax.f32 %v1643_v4, 0.0  ;;  %v975_v15 = vpop.f32.mrf.mxu0  ;;  %v1231_v16 = vpop.f32.mrf.mxu1 }
 0x102   : > { %v1705_v17 = vmax.f32 %v1577_v8, 0.0  ;;  %v1769_v18 = vmax.f32 %v1641_v10, 0.0  ;;  %v1582_v19 = vadd.f32 %v2639_v9, %v1447_v11  ;;  %v1445_v21 = vmul.f32 %v2634_v7, %v975_v15 }
 0x103   : > { %v1646_v20 = vadd.f32 %v2639_v9, %v1511_v12  ;;  %1836 = vst.msk [vmem:[%s2651_s11 + $0x78] sm:$0xff] %vm1820_vm2, %v1707_v13  ;;  %1900 = vst.msk [vmem:[%s2651_s11 + $0x278] sm:$0xff] %vm1820_vm2, %v1771_v14  ;;  %v1509_v22 = vmul.f32 %v2634_v7, %v1231_v16  ;;  %v2245_v23 = vpop.f32.mrf.mxu0  ;;  %v2309_v24 = vpop.f32.mrf.mxu1 }
 0x104   : > { %1834 = vst.msk [vmem:[%s2651_s11 + $0x68] sm:$0xff] %vm1820_vm2, %v1705_v17  ;;  %1898 = vst.msk [vmem:[%s2651_s11 + $0x268] sm:$0xff] %vm1820_vm2, %v1769_v18  ;;  %v1710_v25 = vmax.f32 %v1582_v19, 0.0  ;;  %v1448_v27 = vmul.f32 %v2245_v23, %v2634_v7  ;;  %v1512_v28 = vmul.f32 %v2309_v24, %v2634_v7  ;;  %v1580_v29 = vadd.f32 %v2639_v9, %v1445_v21 }
 0x105   : > { %v1774_v26 = vmax.f32 %v1646_v20, 0.0  ;;  %v1644_v30 = vadd.f32 %v2639_v9, %v1509_v22  ;;  %v978_v31 = vpop.f32.mrf.mxu0  ;;  %v1234_v32 = vpop.f32.mrf.mxu1 }
 0x106   : > { %1839 = vst.msk [vmem:[%s2651_s11 + $0x90] sm:$0xff] %vm1820_vm2, %v1710_v25  ;;  %v1583_v33 = vadd.f32 %v2639_v9, %v1448_v27  ;;  %v1647_v34 = vadd.f32 %v2639_v9, %v1512_v28  ;;  %v1446_v35 = vmul.f32 %v2634_v7, %v978_v31  ;;  %v1510_v36 = vmul.f32 %v2634_v7, %v1234_v32 }
 0x107   : > { %1903 = vst.msk [vmem:[%s2651_s11 + $0x290] sm:$0xff] %vm1820_vm2, %v1774_v26  ;;  %v1708_v37 = vmax.f32 %v1580_v29, 0.0  ;;  %v1772_v38 = vmax.f32 %v1644_v30, 0.0  ;;  %v2248_v39 = vpop.f32.mrf.mxu0  ;;  %v2312_v40 = vpop.f32.mrf.mxu1 }
 0x108   : > { %v1711_v41 = vmax.f32 %v1583_v33, 0.0  ;;  %v1775_v42 = vmax.f32 %v1647_v34, 0.0  ;;  %v1581_v43 = vadd.f32 %v2639_v9, %v1446_v35  ;;  %v1645_v44 = vadd.f32 %v2639_v9, %v1510_v36 }
 0x109   : > { %1837 = vst.msk [vmem:[%s2651_s11 + $0x80] sm:$0xff] %vm1820_vm2, %v1708_v37  ;;  %1901 = vst.msk [vmem:[%s2651_s11 + $0x280] sm:$0xff] %vm1820_vm2, %v1772_v38  ;;  %v1451_v45 = vmul.f32 %v2248_v39, %v2634_v7  ;;  %v1515_v46 = vmul.f32 %v2312_v40, %v2634_v7  ;;  %v991_v47 = vpop.f32.mrf.mxu0  ;;  %v1247_v48 = vpop.f32.mrf.mxu1 }
 0x10a   : > { %1840 = vst.msk [vmem:[%s2651_s11 + $0x98] sm:$0xff] %vm1820_vm2, %v1711_v41  ;;  %1904 = vst.msk [vmem:[%s2651_s11 + $0x298] sm:$0xff] %vm1820_vm2, %v1775_v42  ;;  %v1709_v49 = vmax.f32 %v1581_v43, 0.0  ;;  %v1773_v50 = vmax.f32 %v1645_v44, 0.0  ;;  %v1449_v51 = vmul.f32 %v2634_v7, %v991_v47  ;;  %v1513_v52 = vmul.f32 %v2634_v7, %v1247_v48 }
 0x10b   : > { %v1586_v53 = vadd.f32 %v2639_v9, %v1451_v45  ;;  %v1650_v54 = vadd.f32 %v2639_v9, %v1515_v46  ;;  %v2249_v55 = vpop.f32.mrf.mxu0  ;;  %v2313_v56 = vpop.f32.mrf.mxu1 }
 0x10c   : > { %1838 = vst.msk [vmem:[%s2651_s11 + $0x88] sm:$0xff] %vm1820_vm2, %v1709_v49  ;;  %1902 = vst.msk [vmem:[%s2651_s11 + $0x288] sm:$0xff] %vm1820_vm2, %v1773_v50  ;;  %v1584_v57 = vadd.f32 %v2639_v9, %v1449_v51  ;;  %v1648_v58 = vadd.f32 %v2639_v9, %v1513_v52  ;;  %v1452_v59 = vmul.f32 %v2249_v55, %v2634_v7 }
 0x10d   : > { %v1516_v60 = vmul.f32 %v2313_v56, %v2634_v7  ;;  %v1714_v61 = vmax.f32 %v1586_v53, 0.0  ;;  %v1778_v62 = vmax.f32 %v1650_v54, 0.0  ;;  %v994_v63 = vpop.f32.mrf.mxu0  ;;  %v1250_v0 = vpop.f32.mrf.mxu1 }
 0x10e   : > { %v1712_v1 = vmax.f32 %v1584_v57, 0.0  ;;  %v1776_v2 = vmax.f32 %v1648_v58, 0.0  ;;  %v1587_v3 = vadd.f32 %v2639_v9, %v1452_v59  ;;  %v1450_v5 = vmul.f32 %v2634_v7, %v994_v63 }
 0x10f   : > { %v1651_v4 = vadd.f32 %v2639_v9, %v1516_v60  ;;  %1843 = vst.msk [vmem:[%s2651_s11 + $0xb0] sm:$0xff] %vm1820_vm2, %v1714_v61  ;;  %1907 = vst.msk [vmem:[%s2651_s11 + $0x2b0] sm:$0xff] %vm1820_vm2, %v1778_v62  ;;  %v1514_v6 = vmul.f32 %v2634_v7, %v1250_v0  ;;  %v2252_v8 = vpop.f32.mrf.mxu0  ;;  %v2316_v10 = vpop.f32.mrf.mxu1 }
 0x110   : > { %1841 = vst.msk [vmem:[%s2651_s11 + $0xa0] sm:$0xff] %vm1820_vm2, %v1712_v1  ;;  %1905 = vst.msk [vmem:[%s2651_s11 + $0x2a0] sm:$0xff] %vm1820_vm2, %v1776_v2  ;;  %v1715_v11 = vmax.f32 %v1587_v3, 0.0  ;;  %v1455_v13 = vmul.f32 %v2252_v8, %v2634_v7  ;;  %v1519_v14 = vmul.f32 %v2316_v10, %v2634_v7  ;;  %v1585_v15 = vadd.f32 %v2639_v9, %v1450_v5 }
 0x111   : > { %v1779_v12 = vmax.f32 %v1651_v4, 0.0  ;;  %v1649_v16 = vadd.f32 %v2639_v9, %v1514_v6  ;;  %v1007_v17 = vpop.f32.mrf.mxu0  ;;  %v1263_v18 = vpop.f32.mrf.mxu1 }
 0x112   : > { %1844 = vst.msk [vmem:[%s2651_s11 + $0xb8] sm:$0xff] %vm1820_vm2, %v1715_v11  ;;  %v1590_v19 = vadd.f32 %v2639_v9, %v1455_v13  ;;  %v1654_v20 = vadd.f32 %v2639_v9, %v1519_v14  ;;  %v1453_v21 = vmul.f32 %v2634_v7, %v1007_v17  ;;  %v1517_v22 = vmul.f32 %v2634_v7, %v1263_v18 }
 0x113   : > { %1908 = vst.msk [vmem:[%s2651_s11 + $0x2b8] sm:$0xff] %vm1820_vm2, %v1779_v12  ;;  %v1713_v23 = vmax.f32 %v1585_v15, 0.0  ;;  %v1777_v24 = vmax.f32 %v1649_v16, 0.0  ;;  %v2253_v25 = vpop.f32.mrf.mxu0  ;;  %v2317_v26 = vpop.f32.mrf.mxu1 }
 0x114   : > { %v1718_v27 = vmax.f32 %v1590_v19, 0.0  ;;  %v1782_v28 = vmax.f32 %v1654_v20, 0.0  ;;  %v1588_v29 = vadd.f32 %v2639_v9, %v1453_v21  ;;  %v1652_v30 = vadd.f32 %v2639_v9, %v1517_v22 }
 0x115   : > { %1842 = vst.msk [vmem:[%s2651_s11 + $0xa8] sm:$0xff] %vm1820_vm2, %v1713_v23  ;;  %1906 = vst.msk [vmem:[%s2651_s11 + $0x2a8] sm:$0xff] %vm1820_vm2, %v1777_v24  ;;  %v1456_v31 = vmul.f32 %v2253_v25, %v2634_v7  ;;  %v1520_v32 = vmul.f32 %v2317_v26, %v2634_v7  ;;  %v1010_v33 = vpop.f32.mrf.mxu0  ;;  %v1266_v34 = vpop.f32.mrf.mxu1 }
 0x116   : > { %1847 = vst.msk [vmem:[%s2651_s11 + $0xd0] sm:$0xff] %vm1820_vm2, %v1718_v27  ;;  %1911 = vst.msk [vmem:[%s2651_s11 + $0x2d0] sm:$0xff] %vm1820_vm2, %v1782_v28  ;;  %v1716_v35 = vmax.f32 %v1588_v29, 0.0  ;;  %v1780_v36 = vmax.f32 %v1652_v30, 0.0  ;;  %v1454_v37 = vmul.f32 %v2634_v7, %v1010_v33  ;;  %v1518_v38 = vmul.f32 %v2634_v7, %v1266_v34 }
 0x117   : > { %v1591_v39 = vadd.f32 %v2639_v9, %v1456_v31  ;;  %v1655_v40 = vadd.f32 %v2639_v9, %v1520_v32  ;;  %v2256_v41 = vpop.f32.mrf.mxu0  ;;  %v2320_v42 = vpop.f32.mrf.mxu1 }
 0x118   : > { %1845 = vst.msk [vmem:[%s2651_s11 + $0xc0] sm:$0xff] %vm1820_vm2, %v1716_v35  ;;  %1909 = vst.msk [vmem:[%s2651_s11 + $0x2c0] sm:$0xff] %vm1820_vm2, %v1780_v36  ;;  %v1589_v43 = vadd.f32 %v2639_v9, %v1454_v37  ;;  %v1653_v44 = vadd.f32 %v2639_v9, %v1518_v38  ;;  %v1459_v45 = vmul.f32 %v2256_v41, %v2634_v7 }
 0x119   : > { %v1523_v46 = vmul.f32 %v2320_v42, %v2634_v7  ;;  %v1719_v47 = vmax.f32 %v1591_v39, 0.0  ;;  %v1783_v48 = vmax.f32 %v1655_v40, 0.0  ;;  %v1023_v49 = vpop.f32.mrf.mxu0  ;;  %v1279_v50 = vpop.f32.mrf.mxu1 }
 0x11a   : > { %v1717_v51 = vmax.f32 %v1589_v43, 0.0  ;;  %v1781_v52 = vmax.f32 %v1653_v44, 0.0  ;;  %v1594_v53 = vadd.f32 %v2639_v9, %v1459_v45  ;;  %v1457_v55 = vmul.f32 %v2634_v7, %v1023_v49 }
 0x11b   : > { %v1658_v54 = vadd.f32 %v2639_v9, %v1523_v46  ;;  %1848 = vst.msk [vmem:[%s2651_s11 + $0xd8] sm:$0xff] %vm1820_vm2, %v1719_v47  ;;  %1912 = vst.msk [vmem:[%s2651_s11 + $0x2d8] sm:$0xff] %vm1820_vm2, %v1783_v48  ;;  %v1521_v56 = vmul.f32 %v2634_v7, %v1279_v50  ;;  %v2257_v57 = vpop.f32.mrf.mxu0  ;;  %v2321_v58 = vpop.f32.mrf.mxu1 }
 0x11c   : > { %1846 = vst.msk [vmem:[%s2651_s11 + $0xc8] sm:$0xff] %vm1820_vm2, %v1717_v51  ;;  %1910 = vst.msk [vmem:[%s2651_s11 + $0x2c8] sm:$0xff] %vm1820_vm2, %v1781_v52  ;;  %v1722_v59 = vmax.f32 %v1594_v53, 0.0  ;;  %v1460_v61 = vmul.f32 %v2257_v57, %v2634_v7  ;;  %v1524_v62 = vmul.f32 %v2321_v58, %v2634_v7  ;;  %v1592_v63 = vadd.f32 %v2639_v9, %v1457_v55 }
 0x11d   : > { %v1786_v60 = vmax.f32 %v1658_v54, 0.0  ;;  %v1656_v0 = vadd.f32 %v2639_v9, %v1521_v56  ;;  %v1026_v1 = vpop.f32.mrf.mxu0  ;;  %v1282_v2 = vpop.f32.mrf.mxu1 }
 0x11e   : > { %1851 = vst.msk [vmem:[%s2651_s11 + $0xf0] sm:$0xff] %vm1820_vm2, %v1722_v59  ;;  %v1595_v3 = vadd.f32 %v2639_v9, %v1460_v61  ;;  %v1659_v4 = vadd.f32 %v2639_v9, %v1524_v62  ;;  %v1458_v5 = vmul.f32 %v2634_v7, %v1026_v1  ;;  %v1522_v6 = vmul.f32 %v2634_v7, %v1282_v2 }
 0x11f   : > { %1915 = vst.msk [vmem:[%s2651_s11 + $0x2f0] sm:$0xff] %vm1820_vm2, %v1786_v60  ;;  %v1720_v8 = vmax.f32 %v1592_v63, 0.0  ;;  %v1784_v10 = vmax.f32 %v1656_v0, 0.0  ;;  %v2260_v11 = vpop.f32.mrf.mxu0  ;;  %v2324_v12 = vpop.f32.mrf.mxu1 }
 0x120   : > { %v1723_v13 = vmax.f32 %v1595_v3, 0.0  ;;  %v1787_v14 = vmax.f32 %v1659_v4, 0.0  ;;  %v1593_v15 = vadd.f32 %v2639_v9, %v1458_v5  ;;  %v1657_v16 = vadd.f32 %v2639_v9, %v1522_v6 }
 0x121   : > { %1849 = vst.msk [vmem:[%s2651_s11 + $0xe0] sm:$0xff] %vm1820_vm2, %v1720_v8  ;;  %1913 = vst.msk [vmem:[%s2651_s11 + $0x2e0] sm:$0xff] %vm1820_vm2, %v1784_v10  ;;  %v1463_v17 = vmul.f32 %v2260_v11, %v2634_v7  ;;  %v1527_v18 = vmul.f32 %v2324_v12, %v2634_v7  ;;  %v1039_v19 = vpop.f32.mrf.mxu0  ;;  %v1295_v20 = vpop.f32.mrf.mxu1 }
 0x122   : > { %1852 = vst.msk [vmem:[%s2651_s11 + $0xf8] sm:$0xff] %vm1820_vm2, %v1723_v13  ;;  %1916 = vst.msk [vmem:[%s2651_s11 + $0x2f8] sm:$0xff] %vm1820_vm2, %v1787_v14  ;;  %v1721_v21 = vmax.f32 %v1593_v15, 0.0  ;;  %v1785_v22 = vmax.f32 %v1657_v16, 0.0  ;;  %v1461_v23 = vmul.f32 %v2634_v7, %v1039_v19  ;;  %v1525_v24 = vmul.f32 %v2634_v7, %v1295_v20 }
 0x123   : > { %v1598_v25 = vadd.f32 %v2639_v9, %v1463_v17  ;;  %v1662_v26 = vadd.f32 %v2639_v9, %v1527_v18  ;;  %v2261_v27 = vpop.f32.mrf.mxu0  ;;  %v2325_v28 = vpop.f32.mrf.mxu1 }
 0x124   : > { %1850 = vst.msk [vmem:[%s2651_s11 + $0xe8] sm:$0xff] %vm1820_vm2, %v1721_v21  ;;  %1914 = vst.msk [vmem:[%s2651_s11 + $0x2e8] sm:$0xff] %vm1820_vm2, %v1785_v22  ;;  %v1596_v29 = vadd.f32 %v2639_v9, %v1461_v23  ;;  %v1660_v30 = vadd.f32 %v2639_v9, %v1525_v24  ;;  %v1464_v31 = vmul.f32 %v2261_v27, %v2634_v7 }
 0x125   : > { %v1528_v32 = vmul.f32 %v2325_v28, %v2634_v7  ;;  %v1726_v33 = vmax.f32 %v1598_v25, 0.0  ;;  %v1790_v34 = vmax.f32 %v1662_v26, 0.0  ;;  %v1042_v35 = vpop.f32.mrf.mxu0  ;;  %v1298_v36 = vpop.f32.mrf.mxu1 }
 0x126   : > { %v1724_v37 = vmax.f32 %v1596_v29, 0.0  ;;  %v1788_v38 = vmax.f32 %v1660_v30, 0.0  ;;  %v1599_v39 = vadd.f32 %v2639_v9, %v1464_v31  ;;  %v1462_v41 = vmul.f32 %v2634_v7, %v1042_v35 }
 0x127   : > { %v1663_v40 = vadd.f32 %v2639_v9, %v1528_v32  ;;  %1855 = vst.msk [vmem:[%s2651_s11 + $0x110] sm:$0xff] %vm1820_vm2, %v1726_v33  ;;  %1919 = vst.msk [vmem:[%s2651_s11 + $0x310] sm:$0xff] %vm1820_vm2, %v1790_v34  ;;  %v1526_v42 = vmul.f32 %v2634_v7, %v1298_v36  ;;  %v2264_v43 = vpop.f32.mrf.mxu0  ;;  %v2328_v44 = vpop.f32.mrf.mxu1 }
 0x128   : > { %1853 = vst.msk [vmem:[%s2651_s11 + $0x100] sm:$0xff] %vm1820_vm2, %v1724_v37  ;;  %1917 = vst.msk [vmem:[%s2651_s11 + $0x300] sm:$0xff] %vm1820_vm2, %v1788_v38  ;;  %v1727_v45 = vmax.f32 %v1599_v39, 0.0  ;;  %v1467_v47 = vmul.f32 %v2264_v43, %v2634_v7  ;;  %v1531_v48 = vmul.f32 %v2328_v44, %v2634_v7  ;;  %v1597_v49 = vadd.f32 %v2639_v9, %v1462_v41 }
 0x129   : > { %v1791_v46 = vmax.f32 %v1663_v40, 0.0  ;;  %v1661_v50 = vadd.f32 %v2639_v9, %v1526_v42  ;;  %v1055_v51 = vpop.f32.mrf.mxu0  ;;  %v1311_v52 = vpop.f32.mrf.mxu1 }
 0x12a   : > { %1856 = vst.msk [vmem:[%s2651_s11 + $0x118] sm:$0xff] %vm1820_vm2, %v1727_v45  ;;  %v1602_v53 = vadd.f32 %v2639_v9, %v1467_v47  ;;  %v1666_v54 = vadd.f32 %v2639_v9, %v1531_v48  ;;  %v1465_v55 = vmul.f32 %v2634_v7, %v1055_v51  ;;  %v1529_v56 = vmul.f32 %v2634_v7, %v1311_v52 }
 0x12b   : > { %1920 = vst.msk [vmem:[%s2651_s11 + $0x318] sm:$0xff] %vm1820_vm2, %v1791_v46  ;;  %v1725_v57 = vmax.f32 %v1597_v49, 0.0  ;;  %v1789_v58 = vmax.f32 %v1661_v50, 0.0  ;;  %v2265_v59 = vpop.f32.mrf.mxu0  ;;  %v2329_v60 = vpop.f32.mrf.mxu1 }
 0x12c   : > { %v1730_v61 = vmax.f32 %v1602_v53, 0.0  ;;  %v1794_v62 = vmax.f32 %v1666_v54, 0.0  ;;  %v1600_v63 = vadd.f32 %v2639_v9, %v1465_v55  ;;  %v1664_v0 = vadd.f32 %v2639_v9, %v1529_v56 }
 0x12d   : > { %1854 = vst.msk [vmem:[%s2651_s11 + $0x108] sm:$0xff] %vm1820_vm2, %v1725_v57  ;;  %1918 = vst.msk [vmem:[%s2651_s11 + $0x308] sm:$0xff] %vm1820_vm2, %v1789_v58  ;;  %v1468_v1 = vmul.f32 %v2265_v59, %v2634_v7  ;;  %v1532_v2 = vmul.f32 %v2329_v60, %v2634_v7  ;;  %v1058_v3 = vpop.f32.mrf.mxu0  ;;  %v1314_v4 = vpop.f32.mrf.mxu1 }
 0x12e   : > { %1859 = vst.msk [vmem:[%s2651_s11 + $0x130] sm:$0xff] %vm1820_vm2, %v1730_v61  ;;  %1923 = vst.msk [vmem:[%s2651_s11 + $0x330] sm:$0xff] %vm1820_vm2, %v1794_v62  ;;  %v1728_v5 = vmax.f32 %v1600_v63, 0.0  ;;  %v1792_v6 = vmax.f32 %v1664_v0, 0.0  ;;  %v1466_v8 = vmul.f32 %v2634_v7, %v1058_v3  ;;  %v1530_v10 = vmul.f32 %v2634_v7, %v1314_v4 }
 0x12f   : > { %v1603_v11 = vadd.f32 %v2639_v9, %v1468_v1  ;;  %v1667_v12 = vadd.f32 %v2639_v9, %v1532_v2  ;;  %v2268_v13 = vpop.f32.mrf.mxu0  ;;  %v2332_v14 = vpop.f32.mrf.mxu1 }
 0x130   : > { %1857 = vst.msk [vmem:[%s2651_s11 + $0x120] sm:$0xff] %vm1820_vm2, %v1728_v5  ;;  %1921 = vst.msk [vmem:[%s2651_s11 + $0x320] sm:$0xff] %vm1820_vm2, %v1792_v6  ;;  %v1601_v15 = vadd.f32 %v2639_v9, %v1466_v8  ;;  %v1665_v16 = vadd.f32 %v2639_v9, %v1530_v10  ;;  %v1471_v17 = vmul.f32 %v2268_v13, %v2634_v7 }
 0x131   : > { %v1535_v18 = vmul.f32 %v2332_v14, %v2634_v7  ;;  %v1731_v19 = vmax.f32 %v1603_v11, 0.0  ;;  %v1795_v20 = vmax.f32 %v1667_v12, 0.0  ;;  %v1071_v21 = vpop.f32.mrf.mxu0  ;;  %v1327_v22 = vpop.f32.mrf.mxu1 }
 0x132   : > { %v1729_v23 = vmax.f32 %v1601_v15, 0.0  ;;  %v1793_v24 = vmax.f32 %v1665_v16, 0.0  ;;  %v1606_v25 = vadd.f32 %v2639_v9, %v1471_v17  ;;  %v1469_v27 = vmul.f32 %v2634_v7, %v1071_v21 }
 0x133   : > { %v1670_v26 = vadd.f32 %v2639_v9, %v1535_v18  ;;  %1860 = vst.msk [vmem:[%s2651_s11 + $0x138] sm:$0xff] %vm1820_vm2, %v1731_v19  ;;  %1924 = vst.msk [vmem:[%s2651_s11 + $0x338] sm:$0xff] %vm1820_vm2, %v1795_v20  ;;  %v1533_v28 = vmul.f32 %v2634_v7, %v1327_v22  ;;  %v2269_v29 = vpop.f32.mrf.mxu0  ;;  %v2333_v30 = vpop.f32.mrf.mxu1 }
 0x134   : > { %1858 = vst.msk [vmem:[%s2651_s11 + $0x128] sm:$0xff] %vm1820_vm2, %v1729_v23  ;;  %1922 = vst.msk [vmem:[%s2651_s11 + $0x328] sm:$0xff] %vm1820_vm2, %v1793_v24  ;;  %v1734_v31 = vmax.f32 %v1606_v25, 0.0  ;;  %v1472_v33 = vmul.f32 %v2269_v29, %v2634_v7  ;;  %v1536_v34 = vmul.f32 %v2333_v30, %v2634_v7  ;;  %v1604_v35 = vadd.f32 %v2639_v9, %v1469_v27 }
 0x135   : > { %v1798_v32 = vmax.f32 %v1670_v26, 0.0  ;;  %v1668_v36 = vadd.f32 %v2639_v9, %v1533_v28  ;;  %v1074_v37 = vpop.f32.mrf.mxu0  ;;  %v1330_v38 = vpop.f32.mrf.mxu1 }
 0x136   : > { %1863 = vst.msk [vmem:[%s2651_s11 + $0x150] sm:$0xff] %vm1820_vm2, %v1734_v31  ;;  %v1607_v39 = vadd.f32 %v2639_v9, %v1472_v33  ;;  %v1671_v40 = vadd.f32 %v2639_v9, %v1536_v34  ;;  %v1470_v41 = vmul.f32 %v2634_v7, %v1074_v37  ;;  %v1534_v42 = vmul.f32 %v2634_v7, %v1330_v38 }
 0x137   : > { %1927 = vst.msk [vmem:[%s2651_s11 + $0x350] sm:$0xff] %vm1820_vm2, %v1798_v32  ;;  %v1732_v43 = vmax.f32 %v1604_v35, 0.0  ;;  %v1796_v44 = vmax.f32 %v1668_v36, 0.0  ;;  %v2272_v45 = vpop.f32.mrf.mxu0  ;;  %v2336_v46 = vpop.f32.mrf.mxu1 }
 0x138   : > { %v1735_v47 = vmax.f32 %v1607_v39, 0.0  ;;  %v1799_v48 = vmax.f32 %v1671_v40, 0.0  ;;  %v1605_v49 = vadd.f32 %v2639_v9, %v1470_v41  ;;  %v1669_v50 = vadd.f32 %v2639_v9, %v1534_v42 }
 0x139   : > { %1861 = vst.msk [vmem:[%s2651_s11 + $0x140] sm:$0xff] %vm1820_vm2, %v1732_v43  ;;  %1925 = vst.msk [vmem:[%s2651_s11 + $0x340] sm:$0xff] %vm1820_vm2, %v1796_v44  ;;  %v1475_v51 = vmul.f32 %v2272_v45, %v2634_v7  ;;  %v1539_v52 = vmul.f32 %v2336_v46, %v2634_v7  ;;  %v1087_v53 = vpop.f32.mrf.mxu0  ;;  %v1343_v54 = vpop.f32.mrf.mxu1 }
 0x13a   : > { %1864 = vst.msk [vmem:[%s2651_s11 + $0x158] sm:$0xff] %vm1820_vm2, %v1735_v47  ;;  %1928 = vst.msk [vmem:[%s2651_s11 + $0x358] sm:$0xff] %vm1820_vm2, %v1799_v48  ;;  %v1733_v55 = vmax.f32 %v1605_v49, 0.0  ;;  %v1797_v56 = vmax.f32 %v1669_v50, 0.0  ;;  %v1473_v57 = vmul.f32 %v2634_v7, %v1087_v53  ;;  %v1537_v58 = vmul.f32 %v2634_v7, %v1343_v54  ;;  %v3056_v49 = vld [vmem:[%s3175_s3] ss:$0 sm:$0xff] }
 0x13b   : > { %v1610_v59 = vadd.f32 %v2639_v9, %v1475_v51  ;;  %v1674_v60 = vadd.f32 %v2639_v9, %v1539_v52  ;;  %v2273_v61 = vpop.f32.mrf.mxu0  ;;  %v2337_v62 = vpop.f32.mrf.mxu1 }
 0x13c   : > { %1862 = vst.msk [vmem:[%s2651_s11 + $0x148] sm:$0xff] %vm1820_vm2, %v1733_v55  ;;  %1926 = vst.msk [vmem:[%s2651_s11 + $0x348] sm:$0xff] %vm1820_vm2, %v1797_v56  ;;  %v1608_v63 = vadd.f32 %v2639_v9, %v1473_v57  ;;  %v1672_v0 = vadd.f32 %v2639_v9, %v1537_v58  ;;  %v1476_v1 = vmul.f32 %v2273_v61, %v2634_v7 }
 0x13d   : > { %v1540_v2 = vmul.f32 %v2337_v62, %v2634_v7  ;;  %v1738_v3 = vmax.f32 %v1610_v59, 0.0  ;;  %v1802_v4 = vmax.f32 %v1674_v60, 0.0  ;;  %v1090_v5 = vpop.f32.mrf.mxu0  ;;  %v1346_v6 = vpop.f32.mrf.mxu1 }
 0x13e   : > { %v1736_v8 = vmax.f32 %v1608_v63, 0.0  ;;  %v1800_v10 = vmax.f32 %v1672_v0, 0.0  ;;  %v1611_v11 = vadd.f32 %v2639_v9, %v1476_v1  ;;  %v1474_v13 = vmul.f32 %v2634_v7, %v1090_v5 }
 0x13f   : > { %v1675_v12 = vadd.f32 %v2639_v9, %v1540_v2  ;;  %1867 = vst.msk [vmem:[%s2651_s11 + $0x170] sm:$0xff] %vm1820_vm2, %v1738_v3  ;;  %1931 = vst.msk [vmem:[%s2651_s11 + $0x370] sm:$0xff] %vm1820_vm2, %v1802_v4  ;;  %v1538_v14 = vmul.f32 %v2634_v7, %v1346_v6  ;;  %v2276_v15 = vpop.f32.mrf.mxu0  ;;  %v2340_v16 = vpop.f32.mrf.mxu1 }
 0x140   : > { %1865 = vst.msk [vmem:[%s2651_s11 + $0x160] sm:$0xff] %vm1820_vm2, %v1736_v8  ;;  %1929 = vst.msk [vmem:[%s2651_s11 + $0x360] sm:$0xff] %vm1820_vm2, %v1800_v10  ;;  %v1739_v17 = vmax.f32 %v1611_v11, 0.0  ;;  %v1479_v19 = vmul.f32 %v2276_v15, %v2634_v7  ;;  %v1543_v20 = vmul.f32 %v2340_v16, %v2634_v7  ;;  %v1609_v21 = vadd.f32 %v2639_v9, %v1474_v13 }
 0x141   : > { %v1803_v18 = vmax.f32 %v1675_v12, 0.0  ;;  %v1673_v22 = vadd.f32 %v2639_v9, %v1538_v14  ;;  %v1103_v23 = vpop.f32.mrf.mxu0  ;;  %v1359_v24 = vpop.f32.mrf.mxu1 }
 0x142   : > { %1868 = vst.msk [vmem:[%s2651_s11 + $0x178] sm:$0xff] %vm1820_vm2, %v1739_v17  ;;  %v1614_v25 = vadd.f32 %v2639_v9, %v1479_v19  ;;  %v1678_v26 = vadd.f32 %v2639_v9, %v1543_v20  ;;  %v1477_v27 = vmul.f32 %v2634_v7, %v1103_v23  ;;  %v1541_v28 = vmul.f32 %v2634_v7, %v1359_v24 }
 0x143   : > { %1932 = vst.msk [vmem:[%s2651_s11 + $0x378] sm:$0xff] %vm1820_vm2, %v1803_v18  ;;  %v1737_v29 = vmax.f32 %v1609_v21, 0.0  ;;  %v1801_v30 = vmax.f32 %v1673_v22, 0.0  ;;  %v2277_v31 = vpop.f32.mrf.mxu0  ;;  %v2341_v32 = vpop.f32.mrf.mxu1 }
 0x144   : > { %v1742_v33 = vmax.f32 %v1614_v25, 0.0  ;;  %v1806_v34 = vmax.f32 %v1678_v26, 0.0  ;;  %v1612_v35 = vadd.f32 %v2639_v9, %v1477_v27  ;;  %v1676_v36 = vadd.f32 %v2639_v9, %v1541_v28 }
 0x145   : > { %1866 = vst.msk [vmem:[%s2651_s11 + $0x168] sm:$0xff] %vm1820_vm2, %v1737_v29  ;;  %1930 = vst.msk [vmem:[%s2651_s11 + $0x368] sm:$0xff] %vm1820_vm2, %v1801_v30  ;;  %v1480_v37 = vmul.f32 %v2277_v31, %v2634_v7  ;;  %v1544_v38 = vmul.f32 %v2341_v32, %v2634_v7  ;;  %v1106_v39 = vpop.f32.mrf.mxu0  ;;  %v1362_v40 = vpop.f32.mrf.mxu1 }
 0x146   : > { %1871 = vst.msk [vmem:[%s2651_s11 + $0x190] sm:$0xff] %vm1820_vm2, %v1742_v33  ;;  %1935 = vst.msk [vmem:[%s2651_s11 + $0x390] sm:$0xff] %vm1820_vm2, %v1806_v34  ;;  %v1740_v41 = vmax.f32 %v1612_v35, 0.0  ;;  %v1804_v42 = vmax.f32 %v1676_v36, 0.0  ;;  %v1478_v43 = vmul.f32 %v2634_v7, %v1106_v39  ;;  %v1542_v44 = vmul.f32 %v2634_v7, %v1362_v40 }
 0x147   : > { %v1615_v45 = vadd.f32 %v2639_v9, %v1480_v37  ;;  %v1679_v46 = vadd.f32 %v2639_v9, %v1544_v38  ;;  %v2280_v47 = vpop.f32.mrf.mxu0  ;;  %v2344_v48 = vpop.f32.mrf.mxu1  ;;  %v3063_v9 = vld [vmem:[%s3174_s2] ss:$0 sm:$0xff] }
 0x148   : > { %1869 = vst.msk [vmem:[%s2651_s11 + $0x180] sm:$0xff] %vm1820_vm2, %v1740_v41  ;;  %1933 = vst.msk [vmem:[%s2651_s11 + $0x380] sm:$0xff] %vm1820_vm2, %v1804_v42  ;;  %v1613_v50 = vadd.f32 %v3056_v49, %v1478_v43  ;;  %v1677_v7 = vadd.f32 %v3056_v49, %v1542_v44  ;;  %v1483_v51 = vmul.f32 %v3063_v9, %v2280_v47 }
 0x149   : > { %v1547_v52 = vmul.f32 %v3063_v9, %v2344_v48  ;;  %v1743_v53 = vmax.f32 %v1615_v45, 0.0  ;;  %v1807_v54 = vmax.f32 %v1679_v46, 0.0  ;;  %v1119_v55 = vpop.f32.mrf.mxu0  ;;  %v1375_v56 = vpop.f32.mrf.mxu1 }
 0x14a   : > { %v1741_v57 = vmax.f32 %v1613_v50, 0.0  ;;  %v1805_v58 = vmax.f32 %v1677_v7, 0.0  ;;  %v1618_v59 = vadd.f32 %v3056_v49, %v1483_v51  ;;  %v1481_v61 = vmul.f32 %v3063_v9, %v1119_v55 }
 0x14b   : > { %v1682_v60 = vadd.f32 %v3056_v49, %v1547_v52  ;;  %1872 = vst.msk [vmem:[%s2651_s11 + $0x198] sm:$0xff] %vm1820_vm2, %v1743_v53  ;;  %1936 = vst.msk [vmem:[%s2651_s11 + $0x398] sm:$0xff] %vm1820_vm2, %v1807_v54  ;;  %v1545_v62 = vmul.f32 %v3063_v9, %v1375_v56  ;;  %v2281_v63 = vpop.f32.mrf.mxu0  ;;  %v2345_v0 = vpop.f32.mrf.mxu1 }
 0x14c   : > { %1870 = vst.msk [vmem:[%s2651_s11 + $0x188] sm:$0xff] %vm1820_vm2, %v1741_v57  ;;  %1934 = vst.msk [vmem:[%s2651_s11 + $0x388] sm:$0xff] %vm1820_vm2, %v1805_v58  ;;  %v1746_v1 = vmax.f32 %v1618_v59, 0.0  ;;  %v1484_v3 = vmul.f32 %v3063_v9, %v2281_v63  ;;  %v1548_v4 = vmul.f32 %v3063_v9, %v2345_v0  ;;  %v1616_v5 = vadd.f32 %v3056_v49, %v1481_v61 }
 0x14d   : > { %v1810_v2 = vmax.f32 %v1682_v60, 0.0  ;;  %v1680_v6 = vadd.f32 %v3056_v49, %v1545_v62  ;;  %v1122_v8 = vpop.f32.mrf.mxu0  ;;  %v1378_v10 = vpop.f32.mrf.mxu1 }
 0x14e   : > { %1875 = vst.msk [vmem:[%s2651_s11 + $0x1b0] sm:$0xff] %vm1820_vm2, %v1746_v1  ;;  %v1619_v11 = vadd.f32 %v3056_v49, %v1484_v3  ;;  %v1683_v12 = vadd.f32 %v3056_v49, %v1548_v4  ;;  %v1482_v13 = vmul.f32 %v3063_v9, %v1122_v8  ;;  %v1546_v14 = vmul.f32 %v3063_v9, %v1378_v10 }
 0x14f   : > { %1939 = vst.msk [vmem:[%s2651_s11 + $0x3b0] sm:$0xff] %vm1820_vm2, %v1810_v2  ;;  %v1744_v15 = vmax.f32 %v1616_v5, 0.0  ;;  %v1808_v16 = vmax.f32 %v1680_v6, 0.0  ;;  %v2284_v17 = vpop.f32.mrf.mxu0  ;;  %v2348_v18 = vpop.f32.mrf.mxu1 }
 0x150   : > { %v1747_v19 = vmax.f32 %v1619_v11, 0.0  ;;  %v1811_v20 = vmax.f32 %v1683_v12, 0.0  ;;  %v1617_v21 = vadd.f32 %v3056_v49, %v1482_v13  ;;  %v1681_v22 = vadd.f32 %v3056_v49, %v1546_v14 }
 0x151   : > { %1873 = vst.msk [vmem:[%s2651_s11 + $0x1a0] sm:$0xff] %vm1820_vm2, %v1744_v15  ;;  %1937 = vst.msk [vmem:[%s2651_s11 + $0x3a0] sm:$0xff] %vm1820_vm2, %v1808_v16  ;;  %v1487_v23 = vmul.f32 %v3063_v9, %v2284_v17  ;;  %v1551_v24 = vmul.f32 %v3063_v9, %v2348_v18  ;;  %v1135_v25 = vpop.f32.mrf.mxu0  ;;  %v1391_v26 = vpop.f32.mrf.mxu1 }
 0x152   : > { %1876 = vst.msk [vmem:[%s2651_s11 + $0x1b8] sm:$0xff] %vm1820_vm2, %v1747_v19  ;;  %1940 = vst.msk [vmem:[%s2651_s11 + $0x3b8] sm:$0xff] %vm1820_vm2, %v1811_v20  ;;  %v1745_v27 = vmax.f32 %v1617_v21, 0.0  ;;  %v1809_v28 = vmax.f32 %v1681_v22, 0.0  ;;  %v1485_v29 = vmul.f32 %v3063_v9, %v1135_v25  ;;  %v1549_v30 = vmul.f32 %v3063_v9, %v1391_v26 }
 0x153   : > { %v1622_v31 = vadd.f32 %v3056_v49, %v1487_v23  ;;  %v1686_v32 = vadd.f32 %v3056_v49, %v1551_v24  ;;  %v2285_v33 = vpop.f32.mrf.mxu0  ;;  %v2349_v34 = vpop.f32.mrf.mxu1 }
 0x154   : > { %1874 = vst.msk [vmem:[%s2651_s11 + $0x1a8] sm:$0xff] %vm1820_vm2, %v1745_v27  ;;  %1938 = vst.msk [vmem:[%s2651_s11 + $0x3a8] sm:$0xff] %vm1820_vm2, %v1809_v28  ;;  %v1620_v35 = vadd.f32 %v3056_v49, %v1485_v29  ;;  %v1684_v36 = vadd.f32 %v3056_v49, %v1549_v30  ;;  %v1488_v37 = vmul.f32 %v3063_v9, %v2285_v33 }
 0x155   : > { %v1552_v38 = vmul.f32 %v3063_v9, %v2349_v34  ;;  %v1750_v39 = vmax.f32 %v1622_v31, 0.0  ;;  %v1814_v40 = vmax.f32 %v1686_v32, 0.0  ;;  %v1138_v41 = vpop.f32.mrf.mxu0  ;;  %v1394_v42 = vpop.f32.mrf.mxu1 }
 0x156   : > { %v1748_v43 = vmax.f32 %v1620_v35, 0.0  ;;  %v1812_v44 = vmax.f32 %v1684_v36, 0.0  ;;  %v1623_v45 = vadd.f32 %v3056_v49, %v1488_v37  ;;  %v1486_v47 = vmul.f32 %v3063_v9, %v1138_v41 }
 0x157   : > { %v1687_v46 = vadd.f32 %v3056_v49, %v1552_v38  ;;  %1879 = vst.msk [vmem:[%s2651_s11 + $0x1d0] sm:$0xff] %vm1820_vm2, %v1750_v39  ;;  %1943 = vst.msk [vmem:[%s2651_s11 + $0x3d0] sm:$0xff] %vm1820_vm2, %v1814_v40  ;;  %v1550_v48 = vmul.f32 %v3063_v9, %v1394_v42  ;;  %v2288_v50 = vpop.f32.mrf.mxu0  ;;  %v2352_v7 = vpop.f32.mrf.mxu1 }
 0x158   : > { %1877 = vst.msk [vmem:[%s2651_s11 + $0x1c0] sm:$0xff] %vm1820_vm2, %v1748_v43  ;;  %1941 = vst.msk [vmem:[%s2651_s11 + $0x3c0] sm:$0xff] %vm1820_vm2, %v1812_v44  ;;  %v1751_v51 = vmax.f32 %v1623_v45, 0.0  ;;  %v1491_v53 = vmul.f32 %v3063_v9, %v2288_v50  ;;  %v1555_v54 = vmul.f32 %v3063_v9, %v2352_v7  ;;  %v1621_v55 = vadd.f32 %v3056_v49, %v1486_v47 }
 0x159   : > { %v1815_v52 = vmax.f32 %v1687_v46, 0.0  ;;  %v1685_v56 = vadd.f32 %v3056_v49, %v1550_v48  ;;  %v1151_v57 = vpop.f32.mrf.mxu0  ;;  %v1407_v58 = vpop.f32.mrf.mxu1 }
 0x15a   : > { %1880 = vst.msk [vmem:[%s2651_s11 + $0x1d8] sm:$0xff] %vm1820_vm2, %v1751_v51  ;;  %v1626_v59 = vadd.f32 %v3056_v49, %v1491_v53  ;;  %v1690_v60 = vadd.f32 %v3056_v49, %v1555_v54  ;;  %v1489_v61 = vmul.f32 %v3063_v9, %v1151_v57  ;;  %v1553_v62 = vmul.f32 %v3063_v9, %v1407_v58 }
 0x15b   : > { %1944 = vst.msk [vmem:[%s2651_s11 + $0x3d8] sm:$0xff] %vm1820_vm2, %v1815_v52  ;;  %v1749_v63 = vmax.f32 %v1621_v55, 0.0  ;;  %v1813_v0 = vmax.f32 %v1685_v56, 0.0  ;;  %v2289_v1 = vpop.f32.mrf.mxu0  ;;  %v2353_v2 = vpop.f32.mrf.mxu1 }
 0x15c   : > { %v1754_v3 = vmax.f32 %v1626_v59, 0.0  ;;  %v1818_v4 = vmax.f32 %v1690_v60, 0.0  ;;  %v1624_v5 = vadd.f32 %v3056_v49, %v1489_v61  ;;  %v1688_v6 = vadd.f32 %v3056_v49, %v1553_v62 }
 0x15d   : > { %1878 = vst.msk [vmem:[%s2651_s11 + $0x1c8] sm:$0xff] %vm1820_vm2, %v1749_v63  ;;  %1942 = vst.msk [vmem:[%s2651_s11 + $0x3c8] sm:$0xff] %vm1820_vm2, %v1813_v0  ;;  %v1492_v8 = vmul.f32 %v3063_v9, %v2289_v1  ;;  %v1556_v10 = vmul.f32 %v3063_v9, %v2353_v2  ;;  %v1154_v11 = vpop.f32.mrf.mxu0  ;;  %v1410_v12 = vpop.f32.mrf.mxu1 }
 0x15e   : > { %1883 = vst.msk [vmem:[%s2651_s11 + $0x1f0] sm:$0xff] %vm1820_vm2, %v1754_v3  ;;  %1947 = vst.msk [vmem:[%s2651_s11 + $0x3f0] sm:$0xff] %vm1820_vm2, %v1818_v4  ;;  %v1752_v13 = vmax.f32 %v1624_v5, 0.0  ;;  %v1816_v14 = vmax.f32 %v1688_v6, 0.0  ;;  %v1490_v15 = vmul.f32 %v3063_v9, %v1154_v11  ;;  %v1554_v16 = vmul.f32 %v3063_v9, %v1410_v12 }
 0x15f   : > { %v1627_v17 = vadd.f32 %v3056_v49, %v1492_v8  ;;  %v1691_v18 = vadd.f32 %v3056_v49, %v1556_v10 }
 0x160   : > { %1881 = vst.msk [vmem:[%s2651_s11 + $0x1e0] sm:$0xff] %vm1820_vm2, %v1752_v13  ;;  %1945 = vst.msk [vmem:[%s2651_s11 + $0x3e0] sm:$0xff] %vm1820_vm2, %v1816_v14  ;;  %v1625_v19 = vadd.f32 %v3056_v49, %v1490_v15  ;;  %v1689_v20 = vadd.f32 %v3056_v49, %v1554_v16 }
 0x161   : > { %v1755_v21 = vmax.f32 %v1627_v17, 0.0  ;;  %v1819_v22 = vmax.f32 %v1691_v18, 0.0 }
 0x162   : > { %v1753_v23 = vmax.f32 %v1625_v19, 0.0  ;;  %v1817_v24 = vmax.f32 %v1689_v20, 0.0 }
 0x163   : > { %1884 = vst.msk [vmem:[%s2651_s11 + $0x1f8] sm:$0xff] %vm1820_vm2, %v1755_v21  ;;  %1948 = vst.msk [vmem:[%s2651_s11 + $0x3f8] sm:$0xff] %vm1820_vm2, %v1819_v22 }
 0x164   : > { %1882 = vst.msk [vmem:[%s2651_s11 + $0x1e8] sm:$0xff] %vm1820_vm2, %v1753_v23  ;;  %1946 = vst.msk [vmem:[%s2651_s11 + $0x3e8] sm:$0xff] %vm1820_vm2, %v1817_v24 }
 0x165 PF: > { %s14_s15 = sadd.s32 1, %s2447_s15  }
 0x166   : > { %p11_p4 = scmp.ge.s32.totalorder %s14_s15, 4  }
 0x168   :  { %13 = sbr.rel (!%p11_p4) target bundleno = 1 (0x1), region = 66 }

// kernel: resnet_forward.17
= control target key start
LH: loop header
LB: loop body
LE: loop exit
PB: predicated region body
PF: predicated region fallthrough
CT: control target
= control target key end

     0   :  { %s1194_s18 = smov 0   ;;  %s1506_s0 = inlined_call_operand.vmem [shape: bf16[512,144], index: 0, kind: input, shape index: {}]   ;;  %s1507_s1 = inlined_call_operand.vmem [shape: bf16[144,32], index: 1, kind: input, shape index: {}]   ;;  %s1508_s2 = inlined_call_operand.vmem [shape: f32[1,32], index: 2, kind: input, shape index: {}]   ;;  %s1509_s3 = inlined_call_operand.vmem [shape: f32[1,32], index: 3, kind: input, shape index: {}]   ;;  %s1510_s4 = inlined_call_operand.vmem [shape: f32[1,32], index: 4, kind: input, shape index: {}]   ;;  %s1511_s5 = inlined_call_operand.vmem [shape: f32[512,32], index: 5, kind: output, shape index: {}]  }
   0x1 LB: > { %s999_s19 = sadd.s32 4294967295, %s1161_s18   ;;  %p1003_p0 = scmp.ge.s32.totalorder %s1161_s18, 1  ;;  %s1161_s18 = sphi %s1194_s18, %s15_s18  }
   0x2   : > { %p189_p1 = scmp.lt.s32.totalorder %s1161_s18, 3 }
   0x4   : > { %p190_p2 = pnand %p1003_p0, %p189_p1 }
   0x5   : > { %s1004_s22 = sshll.u32 (!%p190_p2), %s999_s19, 5 }
   0x6   : > { %193 = sbr.rel (%p190_p2) target bundleno = 312 (0x138), region = 40  ;;  %p219_p3 = scmp.lt.s32.totalorder (!%p190_p2), %s1004_s22, 63 }
   0xb   : > { %v1098_v0 = vld [vmem:[%s1507_s1 + $0x38] sm:$0xff]   ;;  %v1163_v1 = vmov 0   ;;  %v1099_v2 = vld [vmem:[%s1507_s1 + $0x30] sm:$0xff]   ;;  %s1513_s22 = smov (!%p219_p3, %s1004_s22), 63  ;;  %v1100_v3 = vld [vmem:[%s1507_s1 + $0x28] sm:$0xff]   ;;  %vm480_vm0 = vcmask 130048   ;;  %v802_v42 = vlaneseq }
   0xc   : > { %529 = vmatprep.subr.bf16.mxu0 %v1163_v1  ;;  %1071 = vmatprep.subr.bf16.mxu1 %v1163_v1  ;;  %s1070_s27 = sshll.u32 %s1513_s22, 3  ;;  %v1101_v4 = vld [vmem:[%s1507_s1 + $0x20] sm:$0xff]   ;;  %v1102_v7 = vld [vmem:[%s1507_s1 + $0x18] sm:$0xff]   ;;  %v1103_v8 = vld [vmem:[%s1507_s1 + $0x10] sm:$0xff]   ;;  %vm910_vm1 = vcmask 261120  }
   0xd   : > { %530 = vmatpush1.bf16.msra.mxu0 %v1098_v0  ;;  %1080 = vmatpush1.bf16.msra.mxu1 %v1098_v0  ;;  %s1219_s30 = scalar_lea.vmem %s1506_s0, %s1070_s27  ;;  %v1104_v9 = vld [vmem:[%s1507_s1 + $0x8] sm:$0xff]   ;;  %v1105_v10 = vld [vmem:[%s1507_s1] sm:$0xff]   ;;  %v803_v43 = vshrl.u32 %v802_v42, 7  ;;  %s1319_s29 = scalar_lea.vmem %s1511_s5, %s1070_s27 }
   0xe   : > { %531 = vmatprep.subr.bf16.mxu0 %v1163_v1  ;;  %1072 = vmatprep.subr.bf16.mxu1 %v1163_v1  ;;  %v1109_v5 = vld [vmem:[%s1219_s30 + $0x4] ss:$8 sps:$4 sm:$0xff]   ;;  %v1107_v12 = vld [vmem:[%s1219_s30] ss:$8 sps:$4 sm:$0xff]   ;;  %v1113_v14 = vld [vmem:[%s1219_s30 + $0x14] ss:$8 sps:$4 sm:$0xff]  }
   0xf   : > { %v1112_v6 = vld [vmem:[%s1219_s30 + $0x84] ss:$8 sps:$4 sm:$0xff]   ;;  %1050 = vmatprep.mubr.msk.bf16.mxu0 %vm480_vm0, %v1109_v5  ;;  %v1110_v13 = vld [vmem:[%s1219_s30 + $0x80] ss:$8 sps:$4 sm:$0xff]   ;;  %v1115_v15 = vld [vmem:[%s1219_s30 + $0x94] ss:$8 sps:$4 sm:$0xff]  }
  0x10   : > { %1058 = vmatprep.mubr.msk.bf16.mxu1 %vm480_vm0, %v1112_v6  ;;  %v1106_v11 = vld [vmem:[%s1507_s1 + $0x40] sm:$0xff]   ;;  %v1117_v16 = vld [vmem:[%s1219_s30 + $0x10] ss:$8 sps:$4 sm:$0xff]   ;;  %v1125_v22 = vld [vmem:[%s1219_s30 + $0x34] ss:$8 sps:$4 sm:$0xff]   ;;  %v804_v46 = vsub.s32 0, %v803_v43 }
  0x11   : > { %532 = vmatpush1.bf16.msra.mxu0 %v1099_v2  ;;  %1081 = vmatpush1.bf16.msra.mxu1 %v1099_v2  ;;  %v1118_v17 = vld [vmem:[%s1219_s30 + $0x90] ss:$8 sps:$4 sm:$0xff]   ;;  %v1119_v18 = vld [vmem:[%s1219_s30 + $0x24] ss:$8 sps:$4 sm:$0xff]   ;;  %v1123_v20 = vld [vmem:[%s1219_s30 + $0x20] ss:$8 sps:$4 sm:$0xff]  }
  0x12   : > { %533 = vmatprep.subr.bf16.mxu0 %v1163_v1  ;;  %1073 = vmatprep.subr.bf16.mxu1 %v1163_v1  ;;  %v1121_v19 = vld [vmem:[%s1219_s30 + $0xa4] ss:$8 sps:$4 sm:$0xff]   ;;  %v1124_v21 = vld [vmem:[%s1219_s30 + $0xa0] ss:$8 sps:$4 sm:$0xff]   ;;  %v1127_v23 = vld [vmem:[%s1219_s30 + $0xb4] ss:$8 sps:$4 sm:$0xff]  }
  0x13   : > { %v1129_v24 = vld [vmem:[%s1219_s30 + $0x30] ss:$8 sps:$4 sm:$0xff]   ;;  %v1131_v26 = vld [vmem:[%s1219_s30 + $0x44] ss:$8 sps:$4 sm:$0xff]   ;;  %v1135_v28 = vld [vmem:[%s1219_s30 + $0x40] ss:$8 sps:$4 sm:$0xff]  }
  0x14   : > { %v1130_v25 = vld [vmem:[%s1219_s30 + $0xb0] ss:$8 sps:$4 sm:$0xff]   ;;  %v1133_v27 = vld [vmem:[%s1219_s30 + $0xc4] ss:$8 sps:$4 sm:$0xff]   ;;  %v1136_v29 = vld [vmem:[%s1219_s30 + $0xc0] ss:$8 sps:$4 sm:$0xff]  }
  0x15   : > { %534 = vmatpush1.bf16.msra.mxu0 %v1100_v3  ;;  %1082 = vmatpush1.bf16.msra.mxu1 %v1100_v3  ;;  %v1137_v30 = vld [vmem:[%s1219_s30 + $0x54] ss:$8 sps:$4 sm:$0xff]   ;;  %v1141_v32 = vld [vmem:[%s1219_s30 + $0x50] ss:$8 sps:$4 sm:$0xff]   ;;  %v1143_v34 = vld [vmem:[%s1219_s30 + $0x64] ss:$8 sps:$4 sm:$0xff]  }
  0x16   : > { %535 = vmatprep.subr.bf16.mxu0 %v1163_v1  ;;  %1074 = vmatprep.subr.bf16.mxu1 %v1163_v1  ;;  %v1139_v31 = vld [vmem:[%s1219_s30 + $0xd4] ss:$8 sps:$4 sm:$0xff]   ;;  %v1142_v33 = vld [vmem:[%s1219_s30 + $0xd0] ss:$8 sps:$4 sm:$0xff]   ;;  %v1145_v35 = vld [vmem:[%s1219_s30 + $0xe4] ss:$8 sps:$4 sm:$0xff]  }
  0x17   : > { %v1147_v36 = vld [vmem:[%s1219_s30 + $0x60] ss:$8 sps:$4 sm:$0xff]   ;;  %v1149_v38 = vld [vmem:[%s1219_s30 + $0x74] ss:$8 sps:$4 sm:$0xff]   ;;  %v1153_v40 = vld [vmem:[%s1219_s30 + $0x70] ss:$8 sps:$4 sm:$0xff]  }
  0x18   : > { %v1148_v37 = vld [vmem:[%s1219_s30 + $0xe0] ss:$8 sps:$4 sm:$0xff]   ;;  %v1151_v39 = vld [vmem:[%s1219_s30 + $0xf4] ss:$8 sps:$4 sm:$0xff]   ;;  %v1154_v41 = vld [vmem:[%s1219_s30 + $0xf0] ss:$8 sps:$4 sm:$0xff]  }
  0x19   : > { %536 = vmatpush1.bf16.msra.mxu0 %v1101_v4  ;;  %1083 = vmatpush1.bf16.msra.mxu1 %v1101_v4  ;;  %v768_v44 = vld [vmem:[%s1510_s4] sm:$0x1] }
  0x1a   : > { %537 = vmatprep.subr.bf16.mxu0 %v1163_v1  ;;  %1075 = vmatprep.subr.bf16.mxu1 %v1163_v1  ;;  %v1293_v45 = vld [vmem:[%s1508_s2] ss:$0 sm:$0xff]  ;;  %v839_v47 = vsub.f32 1.0, %v768_v44  ;;  %v1303_v56 = vrot.slane %v768_v44, %v804_v46 }
  0x1b   : > { %v1298_v49 = vld [vmem:[%s1509_s3] ss:$0 sm:$0xff] }
  0x1c   : > { %v1305_v57 = vrot.slane %v839_v47, %v804_v46 }
  0x1d   : > { %538 = vmatpush1.bf16.msra.mxu0 %v1102_v7  ;;  %1084 = vmatpush1.bf16.msra.mxu1 %v1102_v7 }
  0x1e   : > { %539 = vmatprep.subr.bf16.mxu0 %v1163_v1  ;;  %1076 = vmatprep.subr.bf16.mxu1 %v1163_v1 }
  0x21   : > { %540 = vmatpush1.bf16.msra.mxu0 %v1103_v8  ;;  %1085 = vmatpush1.bf16.msra.mxu1 %v1103_v8 }
  0x22   : > { %541 = vmatprep.subr.bf16.mxu0 %v1163_v1  ;;  %1077 = vmatprep.subr.bf16.mxu1 %v1163_v1 }
  0x25   : > { %542 = vmatpush1.bf16.msra.mxu0 %v1104_v9  ;;  %1086 = vmatpush1.bf16.msra.mxu1 %v1104_v9 }
  0x26   : > { %543 = vmatprep.subr.bf16.mxu0 %v1163_v1  ;;  %1078 = vmatprep.subr.bf16.mxu1 %v1163_v1 }
  0x29   : > { %544 = vmatpush1.bf16.msra.mxu0 %v1105_v10  ;;  %1087 = vmatpush1.bf16.msra.mxu1 %v1105_v10 }
  0x2a   : > { %559 = vmatprep.subr.bf16.mxu0 %v1163_v1  ;;  %1079 = vmatprep.subr.bf16.mxu1 %v1163_v1 }
  0x2d   : > { %560 = vmatpush2.bf16.msra.mxu0 %v1106_v11  ;;  %1088 = vmatpush2.bf16.msra.mxu1 %v1106_v11 }
  0x30   : > { %562 = vmatmul.mubr.bf16.vlgmr.msra.gmra.mxu0 %v1107_v12  ;;  %626 = vmatmul.mubr.bf16.vlgmr.msra.gmra.mxu1 %v1110_v13 }
  0x31   : > { %1051 = vmatprep.mubr.msk.bf16.mxu0 %vm480_vm0, %v1113_v14  ;;  %1059 = vmatprep.mubr.msk.bf16.mxu1 %vm480_vm0, %v1115_v15 }
  0x38   : > { %570 = vmatmul.mubr.bf16.gmra.mxu0 %v1117_v16  ;;  %634 = vmatmul.mubr.bf16.gmra.mxu1 %v1118_v17 }
  0x39   : > { %1052 = vmatprep.mubr.msk.bf16.mxu0 %vm480_vm0, %v1119_v18  ;;  %1060 = vmatprep.mubr.msk.bf16.mxu1 %vm480_vm0, %v1121_v19 }
  0x40   : > { %578 = vmatmul.mubr.bf16.gmra.mxu0 %v1123_v20  ;;  %642 = vmatmul.mubr.bf16.gmra.mxu1 %v1124_v21 }
  0x41   : > { %1053 = vmatprep.mubr.msk.bf16.mxu0 %vm480_vm0, %v1125_v22  ;;  %1061 = vmatprep.mubr.msk.bf16.mxu1 %vm480_vm0, %v1127_v23 }
  0x48   : > { %586 = vmatmul.mubr.bf16.gmra.mxu0 %v1129_v24  ;;  %650 = vmatmul.mubr.bf16.gmra.mxu1 %v1130_v25 }
  0x49   : > { %1054 = vmatprep.mubr.msk.bf16.mxu0 %vm480_vm0, %v1131_v26  ;;  %1062 = vmatprep.mubr.msk.bf16.mxu1 %vm480_vm0, %v1133_v27 }
  0x50   : > { %594 = vmatmul.mubr.bf16.gmra.mxu0 %v1135_v28  ;;  %658 = vmatmul.mubr.bf16.gmra.mxu1 %v1136_v29 }
  0x51   : > { %1055 = vmatprep.mubr.msk.bf16.mxu0 %vm480_vm0, %v1137_v30  ;;  %1063 = vmatprep.mubr.msk.bf16.mxu1 %vm480_vm0, %v1139_v31 }
  0x58   : > { %602 = vmatmul.mubr.bf16.gmra.mxu0 %v1141_v32  ;;  %666 = vmatmul.mubr.bf16.gmra.mxu1 %v1142_v33 }
  0x59   : > { %1056 = vmatprep.mubr.msk.bf16.mxu0 %vm480_vm0, %v1143_v34  ;;  %1064 = vmatprep.mubr.msk.bf16.mxu1 %vm480_vm0, %v1145_v35 }
  0x60   : > { %610 = vmatmul.mubr.bf16.gmra.mxu0 %v1147_v36  ;;  %674 = vmatmul.mubr.bf16.gmra.mxu1 %v1148_v37 }
  0x61   : > { %1057 = vmatprep.mubr.msk.bf16.mxu0 %vm480_vm0, %v1149_v38  ;;  %1065 = vmatprep.mubr.msk.bf16.mxu1 %vm480_vm0, %v1151_v39 }
  0x68   : > { %618 = vmatmul.mubr.bf16.gmra.mxu0 %v1153_v40  ;;  %682 = vmatmul.mubr.bf16.gmra.mxu1 %v1154_v41 }
  0xf0   : > { %v563_v48 = vpop.f32.mrf.mxu0  ;;  %v627_v50 = vpop.f32.mrf.mxu1 }
  0xf1   : > { %v697_v51 = vmul.f32 %v1293_v45, %v563_v48  ;;  %v713_v52 = vmul.f32 %v1293_v45, %v627_v50 }
  0xf2   : > { %v565_v53 = vpop.f32.mrf.mxu0  ;;  %v629_v54 = vpop.f32.mrf.mxu1 }
  0xf3   : > { %v736_v55 = vadd.f32 %v1298_v49, %v697_v51  ;;  %v752_v58 = vadd.f32 %v1298_v49, %v713_v52 }
  0xf4   : > { %v566_v59 = vpop.f32.mrf.mxu0  ;;  %v630_v60 = vpop.f32.mrf.mxu1 }
  0xf5   : > { %v769_v61 = vmax.f32 %v736_v55, 0.0  ;;  %v785_v62 = vmax.f32 %v752_v58, 0.0  ;;  %v698_v63 = vmul.f32 %v1293_v45, %v566_v59  ;;  %v714_v0 = vmul.f32 %v1293_v45, %v630_v60 }
  0xf6   : > { %v568_v1 = vpop.f32.mrf.mxu0  ;;  %v632_v2 = vpop.f32.mrf.mxu1  ;;  %v846_v4 = vmul.f32 %v1305_v57, %v736_v55  ;;  %v862_v6 = vmul.f32 %v1305_v57, %v752_v58 }
  0xf7   : > { %v807_v3 = vmul.f32 %v1303_v56, %v769_v61  ;;  %v823_v5 = vmul.f32 %v1303_v56, %v785_v62  ;;  %v737_v7 = vadd.f32 %v1298_v49, %v698_v63  ;;  %v753_v8 = vadd.f32 %v1298_v49, %v714_v0 }
  0xf8   : > { %v571_v9 = vpop.f32.mrf.mxu0  ;;  %v635_v10 = vpop.f32.mrf.mxu1 }
  0xf9   : > { %v878_v11 = vadd.f32 %v846_v4, %v807_v3  ;;  %v894_v12 = vadd.f32 %v862_v6, %v823_v5  ;;  %v699_v13 = vmul.f32 %v1293_v45, %v571_v9  ;;  %v715_v14 = vmul.f32 %v1293_v45, %v635_v10 }
  0xfa   : > { %v770_v15 = vmax.f32 %v737_v7, 0.0  ;;  %v786_v16 = vmax.f32 %v753_v8, 0.0  ;;  %v573_v17 = vpop.f32.mrf.mxu0  ;;  %v637_v18 = vpop.f32.mrf.mxu1  ;;  %v847_v22 = vmul.f32 %v1305_v57, %v737_v7  ;;  %v863_v24 = vmul.f32 %v1305_v57, %v753_v8 }
  0xfb   : > { %911 = vst.msk [vmem:[%s1319_s29] sm:$0xff] %vm910_vm1, %v878_v11  ;;  %927 = vst.msk [vmem:[%s1319_s29 + $0x80] sm:$0xff] %vm910_vm1, %v894_v12  ;;  %v738_v19 = vadd.f32 %v1298_v49, %v699_v13  ;;  %v754_v20 = vadd.f32 %v1298_v49, %v715_v14 }
  0xfc   : > { %v808_v21 = vmul.f32 %v1303_v56, %v770_v15  ;;  %v824_v23 = vmul.f32 %v1303_v56, %v786_v16  ;;  %v574_v25 = vpop.f32.mrf.mxu0  ;;  %v638_v26 = vpop.f32.mrf.mxu1 }
  0xfd   : > { %v771_v27 = vmax.f32 %v738_v19, 0.0  ;;  %v787_v28 = vmax.f32 %v754_v20, 0.0  ;;  %v700_v31 = vmul.f32 %v1293_v45, %v574_v25  ;;  %v716_v32 = vmul.f32 %v1293_v45, %v638_v26 }
  0xfe   : > { %v879_v29 = vadd.f32 %v847_v22, %v808_v21  ;;  %v895_v30 = vadd.f32 %v863_v24, %v824_v23  ;;  %v576_v33 = vpop.f32.mrf.mxu0  ;;  %v640_v34 = vpop.f32.mrf.mxu1  ;;  %v848_v36 = vmul.f32 %v1305_v57, %v738_v19  ;;  %v864_v38 = vmul.f32 %v1305_v57, %v754_v20 }
  0xff   : > { %v809_v35 = vmul.f32 %v1303_v56, %v771_v27  ;;  %v825_v37 = vmul.f32 %v1303_v56, %v787_v28  ;;  %v739_v39 = vadd.f32 %v1298_v49, %v700_v31  ;;  %v755_v40 = vadd.f32 %v1298_v49, %v716_v32 }
 0x100   : > { %912 = vst.msk [vmem:[%s1319_s29 + $0x8] sm:$0xff] %vm910_vm1, %v879_v29  ;;  %928 = vst.msk [vmem:[%s1319_s29 + $0x88] sm:$0xff] %vm910_vm1, %v895_v30  ;;  %v579_v41 = vpop.f32.mrf.mxu0  ;;  %v643_v42 = vpop.f32.mrf.mxu1 }
 0x101   : > { %v880_v43 = vadd.f32 %v848_v36, %v809_v35  ;;  %v896_v44 = vadd.f32 %v864_v38, %v825_v37  ;;  %v701_v46 = vmul.f32 %v1293_v45, %v579_v41  ;;  %v717_v47 = vmul.f32 %v1293_v45, %v643_v42 }
 0x102   : > { %v772_v48 = vmax.f32 %v739_v39, 0.0  ;;  %v788_v50 = vmax.f32 %v755_v40, 0.0  ;;  %v581_v51 = vpop.f32.mrf.mxu0  ;;  %v645_v52 = vpop.f32.mrf.mxu1  ;;  %v849_v58 = vmul.f32 %v1305_v57, %v739_v39  ;;  %v865_v60 = vmul.f32 %v1305_v57, %v755_v40 }
 0x103   : > { %913 = vst.msk [vmem:[%s1319_s29 + $0x10] sm:$0xff] %vm910_vm1, %v880_v43  ;;  %929 = vst.msk [vmem:[%s1319_s29 + $0x90] sm:$0xff] %vm910_vm1, %v896_v44  ;;  %v740_v53 = vadd.f32 %v1298_v49, %v701_v46  ;;  %v756_v54 = vadd.f32 %v1298_v49, %v717_v47 }
 0x104   : > { %v810_v55 = vmul.f32 %v1303_v56, %v772_v48  ;;  %v826_v59 = vmul.f32 %v1303_v56, %v788_v50  ;;  %v582_v61 = vpop.f32.mrf.mxu0  ;;  %v646_v62 = vpop.f32.mrf.mxu1 }
 0x105   : > { %v773_v63 = vmax.f32 %v740_v53, 0.0  ;;  %v789_v0 = vmax.f32 %v756_v54, 0.0  ;;  %v702_v3 = vmul.f32 %v1293_v45, %v582_v61  ;;  %v718_v4 = vmul.f32 %v1293_v45, %v646_v62 }
 0x106   : > { %v881_v1 = vadd.f32 %v849_v58, %v810_v55  ;;  %v897_v2 = vadd.f32 %v865_v60, %v826_v59  ;;  %v584_v5 = vpop.f32.mrf.mxu0  ;;  %v648_v6 = vpop.f32.mrf.mxu1  ;;  %v850_v8 = vmul.f32 %v1305_v57, %v740_v53  ;;  %v866_v10 = vmul.f32 %v1305_v57, %v756_v54 }
 0x107   : > { %v811_v7 = vmul.f32 %v1303_v56, %v773_v63  ;;  %v827_v9 = vmul.f32 %v1303_v56, %v789_v0  ;;  %v741_v11 = vadd.f32 %v1298_v49, %v702_v3  ;;  %v757_v12 = vadd.f32 %v1298_v49, %v718_v4 }
 0x108   : > { %914 = vst.msk [vmem:[%s1319_s29 + $0x18] sm:$0xff] %vm910_vm1, %v881_v1  ;;  %930 = vst.msk [vmem:[%s1319_s29 + $0x98] sm:$0xff] %vm910_vm1, %v897_v2  ;;  %v587_v13 = vpop.f32.mrf.mxu0  ;;  %v651_v14 = vpop.f32.mrf.mxu1 }
 0x109   : > { %v882_v15 = vadd.f32 %v850_v8, %v811_v7  ;;  %v898_v16 = vadd.f32 %v866_v10, %v827_v9  ;;  %v703_v17 = vmul.f32 %v1293_v45, %v587_v13  ;;  %v719_v18 = vmul.f32 %v1293_v45, %v651_v14 }
 0x10a   : > { %v774_v19 = vmax.f32 %v741_v11, 0.0  ;;  %v790_v20 = vmax.f32 %v757_v12, 0.0  ;;  %v589_v21 = vpop.f32.mrf.mxu0  ;;  %v653_v22 = vpop.f32.mrf.mxu1  ;;  %v851_v26 = vmul.f32 %v1305_v57, %v741_v11  ;;  %v867_v28 = vmul.f32 %v1305_v57, %v757_v12 }
 0x10b   : > { %915 = vst.msk [vmem:[%s1319_s29 + $0x20] sm:$0xff] %vm910_vm1, %v882_v15  ;;  %931 = vst.msk [vmem:[%s1319_s29 + $0xa0] sm:$0xff] %vm910_vm1, %v898_v16  ;;  %v742_v23 = vadd.f32 %v1298_v49, %v703_v17  ;;  %v758_v24 = vadd.f32 %v1298_v49, %v719_v18 }
 0x10c   : > { %v812_v25 = vmul.f32 %v1303_v56, %v774_v19  ;;  %v828_v27 = vmul.f32 %v1303_v56, %v790_v20  ;;  %v590_v29 = vpop.f32.mrf.mxu0  ;;  %v654_v30 = vpop.f32.mrf.mxu1 }
 0x10d   : > { %v775_v31 = vmax.f32 %v742_v23, 0.0  ;;  %v791_v32 = vmax.f32 %v758_v24, 0.0  ;;  %v704_v35 = vmul.f32 %v1293_v45, %v590_v29  ;;  %v720_v36 = vmul.f32 %v1293_v45, %v654_v30 }
 0x10e   : > { %v883_v33 = vadd.f32 %v851_v26, %v812_v25  ;;  %v899_v34 = vadd.f32 %v867_v28, %v828_v27  ;;  %v592_v37 = vpop.f32.mrf.mxu0  ;;  %v656_v38 = vpop.f32.mrf.mxu1  ;;  %v852_v40 = vmul.f32 %v1305_v57, %v742_v23  ;;  %v868_v42 = vmul.f32 %v1305_v57, %v758_v24 }
 0x10f   : > { %v813_v39 = vmul.f32 %v1303_v56, %v775_v31  ;;  %v829_v41 = vmul.f32 %v1303_v56, %v791_v32  ;;  %v743_v43 = vadd.f32 %v1298_v49, %v704_v35  ;;  %v759_v44 = vadd.f32 %v1298_v49, %v720_v36 }
 0x110   : > { %916 = vst.msk [vmem:[%s1319_s29 + $0x28] sm:$0xff] %vm910_vm1, %v883_v33  ;;  %932 = vst.msk [vmem:[%s1319_s29 + $0xa8] sm:$0xff] %vm910_vm1, %v899_v34  ;;  %v595_v46 = vpop.f32.mrf.mxu0  ;;  %v659_v47 = vpop.f32.mrf.mxu1 }
 0x111   : > { %v884_v48 = vadd.f32 %v852_v40, %v813_v39  ;;  %v900_v50 = vadd.f32 %v868_v42, %v829_v41  ;;  %v705_v51 = vmul.f32 %v1293_v45, %v595_v46  ;;  %v721_v52 = vmul.f32 %v1293_v45, %v659_v47 }
 0x112   : > { %v776_v53 = vmax.f32 %v743_v43, 0.0  ;;  %v792_v54 = vmax.f32 %v759_v44, 0.0  ;;  %v597_v55 = vpop.f32.mrf.mxu0  ;;  %v661_v58 = vpop.f32.mrf.mxu1  ;;  %v853_v62 = vmul.f32 %v1305_v57, %v743_v43  ;;  %v869_v0 = vmul.f32 %v1305_v57, %v759_v44 }
 0x113   : > { %917 = vst.msk [vmem:[%s1319_s29 + $0x30] sm:$0xff] %vm910_vm1, %v884_v48  ;;  %933 = vst.msk [vmem:[%s1319_s29 + $0xb0] sm:$0xff] %vm910_vm1, %v900_v50  ;;  %v744_v59 = vadd.f32 %v1298_v49, %v705_v51  ;;  %v760_v60 = vadd.f32 %v1298_v49, %v721_v52 }
 0x114   : > { %v814_v61 = vmul.f32 %v1303_v56, %v776_v53  ;;  %v830_v63 = vmul.f32 %v1303_v56, %v792_v54  ;;  %v598_v1 = vpop.f32.mrf.mxu0  ;;  %v662_v2 = vpop.f32.mrf.mxu1 }
 0x115   : > { %v777_v3 = vmax.f32 %v744_v59, 0.0  ;;  %v793_v4 = vmax.f32 %v760_v60, 0.0  ;;  %v706_v7 = vmul.f32 %v1293_v45, %v598_v1  ;;  %v722_v8 = vmul.f32 %v1293_v45, %v662_v2 }
 0x116   : > { %v885_v5 = vadd.f32 %v853_v62, %v814_v61  ;;  %v901_v6 = vadd.f32 %v869_v0, %v830_v63  ;;  %v600_v9 = vpop.f32.mrf.mxu0  ;;  %v664_v10 = vpop.f32.mrf.mxu1  ;;  %v854_v12 = vmul.f32 %v1305_v57, %v744_v59  ;;  %v870_v14 = vmul.f32 %v1305_v57, %v760_v60 }
 0x117   : > { %v815_v11 = vmul.f32 %v1303_v56, %v777_v3  ;;  %v831_v13 = vmul.f32 %v1303_v56, %v793_v4  ;;  %v745_v15 = vadd.f32 %v1298_v49, %v706_v7  ;;  %v761_v16 = vadd.f32 %v1298_v49, %v722_v8 }
 0x118   : > { %918 = vst.msk [vmem:[%s1319_s29 + $0x38] sm:$0xff] %vm910_vm1, %v885_v5  ;;  %934 = vst.msk [vmem:[%s1319_s29 + $0xb8] sm:$0xff] %vm910_vm1, %v901_v6  ;;  %v603_v17 = vpop.f32.mrf.mxu0  ;;  %v667_v18 = vpop.f32.mrf.mxu1 }
 0x119   : > { %v886_v19 = vadd.f32 %v854_v12, %v815_v11  ;;  %v902_v20 = vadd.f32 %v870_v14, %v831_v13  ;;  %v707_v21 = vmul.f32 %v1293_v45, %v603_v17  ;;  %v723_v22 = vmul.f32 %v1293_v45, %v667_v18 }
 0x11a   : > { %v778_v23 = vmax.f32 %v745_v15, 0.0  ;;  %v794_v24 = vmax.f32 %v761_v16, 0.0  ;;  %v605_v25 = vpop.f32.mrf.mxu0  ;;  %v669_v26 = vpop.f32.mrf.mxu1  ;;  %v855_v30 = vmul.f32 %v1305_v57, %v745_v15  ;;  %v871_v32 = vmul.f32 %v1305_v57, %v761_v16 }
 0x11b   : > { %919 = vst.msk [vmem:[%s1319_s29 + $0x40] sm:$0xff] %vm910_vm1, %v886_v19  ;;  %935 = vst.msk [vmem:[%s1319_s29 + $0xc0] sm:$0xff] %vm910_vm1, %v902_v20  ;;  %v746_v27 = vadd.f32 %v1298_v49, %v707_v21  ;;  %v762_v28 = vadd.f32 %v1298_v49, %v723_v22 }
 0x11c   : > { %v816_v29 = vmul.f32 %v1303_v56, %v778_v23  ;;  %v832_v31 = vmul.f32 %v1303_v56, %v794_v24  ;;  %v606_v33 = vpop.f32.mrf.mxu0  ;;  %v670_v34 = vpop.f32.mrf.mxu1 }
 0x11d   : > { %v779_v35 = vmax.f32 %v746_v27, 0.0  ;;  %v795_v36 = vmax.f32 %v762_v28, 0.0  ;;  %v708_v39 = vmul.f32 %v1293_v45, %v606_v33  ;;  %v724_v40 = vmul.f32 %v1293_v45, %v670_v34 }
 0x11e   : > { %v887_v37 = vadd.f32 %v855_v30, %v816_v29  ;;  %v903_v38 = vadd.f32 %v871_v32, %v832_v31  ;;  %v608_v41 = vpop.f32.mrf.mxu0  ;;  %v672_v42 = vpop.f32.mrf.mxu1  ;;  %v856_v44 = vmul.f32 %v1305_v57, %v746_v27  ;;  %v872_v47 = vmul.f32 %v1305_v57, %v762_v28 }
 0x11f   : > { %v817_v43 = vmul.f32 %v1303_v56, %v779_v35  ;;  %v833_v46 = vmul.f32 %v1303_v56, %v795_v36  ;;  %v747_v48 = vadd.f32 %v1298_v49, %v708_v39  ;;  %v763_v50 = vadd.f32 %v1298_v49, %v724_v40 }
 0x120   : > { %920 = vst.msk [vmem:[%s1319_s29 + $0x48] sm:$0xff] %vm910_vm1, %v887_v37  ;;  %936 = vst.msk [vmem:[%s1319_s29 + $0xc8] sm:$0xff] %vm910_vm1, %v903_v38  ;;  %v611_v51 = vpop.f32.mrf.mxu0  ;;  %v675_v52 = vpop.f32.mrf.mxu1 }
 0x121   : > { %v888_v53 = vadd.f32 %v856_v44, %v817_v43  ;;  %v904_v54 = vadd.f32 %v872_v47, %v833_v46  ;;  %v709_v55 = vmul.f32 %v1293_v45, %v611_v51  ;;  %v725_v58 = vmul.f32 %v1293_v45, %v675_v52 }
 0x122   : > { %v780_v59 = vmax.f32 %v747_v48, 0.0  ;;  %v796_v60 = vmax.f32 %v763_v50, 0.0  ;;  %v613_v61 = vpop.f32.mrf.mxu0  ;;  %v677_v62 = vpop.f32.mrf.mxu1  ;;  %v857_v2 = vmul.f32 %v1305_v57, %v747_v48  ;;  %v873_v4 = vmul.f32 %v1305_v57, %v763_v50 }
 0x123   : > { %921 = vst.msk [vmem:[%s1319_s29 + $0x50] sm:$0xff] %vm910_vm1, %v888_v53  ;;  %937 = vst.msk [vmem:[%s1319_s29 + $0xd0] sm:$0xff] %vm910_vm1, %v904_v54  ;;  %v748_v63 = vadd.f32 %v1298_v49, %v709_v55  ;;  %v764_v0 = vadd.f32 %v1298_v49, %v725_v58 }
 0x124   : > { %v818_v1 = vmul.f32 %v1303_v56, %v780_v59  ;;  %v834_v3 = vmul.f32 %v1303_v56, %v796_v60  ;;  %v614_v5 = vpop.f32.mrf.mxu0  ;;  %v678_v6 = vpop.f32.mrf.mxu1 }
 0x125   : > { %v781_v7 = vmax.f32 %v748_v63, 0.0  ;;  %v797_v8 = vmax.f32 %v764_v0, 0.0  ;;  %v710_v11 = vmul.f32 %v1293_v45, %v614_v5  ;;  %v726_v12 = vmul.f32 %v1293_v45, %v678_v6 }
 0x126   : > { %v889_v9 = vadd.f32 %v857_v2, %v818_v1  ;;  %v905_v10 = vadd.f32 %v873_v4, %v834_v3  ;;  %v616_v13 = vpop.f32.mrf.mxu0  ;;  %v680_v14 = vpop.f32.mrf.mxu1  ;;  %v858_v16 = vmul.f32 %v1305_v57, %v748_v63  ;;  %v874_v18 = vmul.f32 %v1305_v57, %v764_v0 }
 0x127   : > { %v819_v15 = vmul.f32 %v1303_v56, %v781_v7  ;;  %v835_v17 = vmul.f32 %v1303_v56, %v797_v8  ;;  %v749_v19 = vadd.f32 %v1298_v49, %v710_v11  ;;  %v765_v20 = vadd.f32 %v1298_v49, %v726_v12 }
 0x128   : > { %922 = vst.msk [vmem:[%s1319_s29 + $0x58] sm:$0xff] %vm910_vm1, %v889_v9  ;;  %938 = vst.msk [vmem:[%s1319_s29 + $0xd8] sm:$0xff] %vm910_vm1, %v905_v10  ;;  %v619_v21 = vpop.f32.mrf.mxu0  ;;  %v683_v22 = vpop.f32.mrf.mxu1 }
 0x129   : > { %v890_v23 = vadd.f32 %v858_v16, %v819_v15  ;;  %v906_v24 = vadd.f32 %v874_v18, %v835_v17  ;;  %v711_v25 = vmul.f32 %v1293_v45, %v619_v21  ;;  %v727_v26 = vmul.f32 %v1293_v45, %v683_v22 }
 0x12a   : > { %v782_v27 = vmax.f32 %v749_v19, 0.0  ;;  %v798_v28 = vmax.f32 %v765_v20, 0.0  ;;  %v621_v29 = vpop.f32.mrf.mxu0  ;;  %v685_v30 = vpop.f32.mrf.mxu1  ;;  %v859_v34 = vmul.f32 %v1305_v57, %v749_v19  ;;  %v875_v36 = vmul.f32 %v1305_v57, %v765_v20 }
 0x12b   : > { %923 = vst.msk [vmem:[%s1319_s29 + $0x60] sm:$0xff] %vm910_vm1, %v890_v23  ;;  %939 = vst.msk [vmem:[%s1319_s29 + $0xe0] sm:$0xff] %vm910_vm1, %v906_v24  ;;  %v750_v31 = vadd.f32 %v1298_v49, %v711_v25  ;;  %v766_v32 = vadd.f32 %v1298_v49, %v727_v26 }
 0x12c   : > { %v820_v33 = vmul.f32 %v1303_v56, %v782_v27  ;;  %v836_v35 = vmul.f32 %v1303_v56, %v798_v28  ;;  %v622_v37 = vpop.f32.mrf.mxu0  ;;  %v686_v38 = vpop.f32.mrf.mxu1 }
 0x12d   : > { %v783_v39 = vmax.f32 %v750_v31, 0.0  ;;  %v799_v40 = vmax.f32 %v766_v32, 0.0  ;;  %v712_v43 = vmul.f32 %v1293_v45, %v622_v37  ;;  %v728_v44 = vmul.f32 %v1293_v45, %v686_v38 }
 0x12e   : > { %v891_v41 = vadd.f32 %v859_v34, %v820_v33  ;;  %v907_v42 = vadd.f32 %v875_v36, %v836_v35  ;;  %v624_v46 = vpop.f32.mrf.mxu0  ;;  %v688_v47 = vpop.f32.mrf.mxu1  ;;  %v860_v50 = vmul.f32 %v1305_v57, %v750_v31  ;;  %v876_v52 = vmul.f32 %v1305_v57, %v766_v32 }
 0x12f   : > { %v821_v48 = vmul.f32 %v1303_v56, %v783_v39  ;;  %v837_v51 = vmul.f32 %v1303_v56, %v799_v40  ;;  %v751_v53 = vadd.f32 %v1298_v49, %v712_v43  ;;  %v767_v45 = vadd.f32 %v1298_v49, %v728_v44 }
 0x130   : > { %924 = vst.msk [vmem:[%s1319_s29 + $0x68] sm:$0xff] %vm910_vm1, %v891_v41  ;;  %940 = vst.msk [vmem:[%s1319_s29 + $0xe8] sm:$0xff] %vm910_vm1, %v907_v42 }
 0x131   : > { %v892_v54 = vadd.f32 %v860_v50, %v821_v48  ;;  %v908_v55 = vadd.f32 %v876_v52, %v837_v51  ;;  %v784_v58 = vmax.f32 %v751_v53, 0.0  ;;  %v800_v59 = vmax.f32 %v767_v45, 0.0 }
 0x132   : > { %v861_v61 = vmul.f32 %v1305_v57, %v751_v53  ;;  %v877_v63 = vmul.f32 %v1305_v57, %v767_v45 }
 0x133   : > { %925 = vst.msk [vmem:[%s1319_s29 + $0x70] sm:$0xff] %vm910_vm1, %v892_v54  ;;  %941 = vst.msk [vmem:[%s1319_s29 + $0xf0] sm:$0xff] %vm910_vm1, %v908_v55  ;;  %v822_v60 = vmul.f32 %v1303_v56, %v784_v58  ;;  %v838_v62 = vmul.f32 %v1303_v56, %v800_v59 }
 0x135   : > { %v893_v0 = vadd.f32 %v861_v61, %v822_v60  ;;  %v909_v1 = vadd.f32 %v877_v63, %v838_v62 }
 0x137   : > { %926 = vst.msk [vmem:[%s1319_s29 + $0x78] sm:$0xff] %vm910_vm1, %v893_v0  ;;  %942 = vst.msk [vmem:[%s1319_s29 + $0xf8] sm:$0xff] %vm910_vm1, %v909_v1 }
 0x138 PF: > { %s15_s18 = sadd.s32 1, %s1161_s18  }
 0x139   : > { %p12_p4 = scmp.ge.s32.totalorder %s15_s18, 4  }
 0x13b   :  { %14 = sbr.rel (!%p12_p4) target bundleno = 1 (0x1), region = 70 }

// kernel: resnet_forward.18
= control target key start
LH: loop header
LB: loop body
LE: loop exit
PB: predicated region body
PF: predicated region fallthrough
CT: control target
= control target key end

     0   :  { %s1294_s18 = smov 0   ;;  %s1557_s0 = inlined_call_operand.vmem [shape: bf16[512,144], index: 0, kind: input, shape index: {}]   ;;  %s1558_s1 = inlined_call_operand.vmem [shape: bf16[144,16], index: 1, kind: input, shape index: {}]   ;;  %s1559_s2 = inlined_call_operand.vmem [shape: f32[1,16], index: 2, kind: input, shape index: {}]   ;;  %s1560_s3 = inlined_call_operand.vmem [shape: f32[1,16], index: 3, kind: input, shape index: {}]   ;;  %s1561_s4 = inlined_call_operand.vmem [shape: bf16[512,16], index: 4, kind: input, shape index: {}]   ;;  %s1562_s5 = inlined_call_operand.vmem [shape: f32[512,16], index: 5, kind: output, shape index: {}]  }
   0x1 LB: > { %s1018_s19 = sadd.s32 4294967295, %s1261_s18   ;;  %p1022_p0 = scmp.ge.s32.totalorder %s1261_s18, 1  ;;  %s1261_s18 = sphi %s1294_s18, %s15_s18  }
   0x2   : > { %p200_p1 = scmp.lt.s32.totalorder %s1261_s18, 3 }
   0x4   : > { %p201_p2 = pnand %p1022_p0, %p200_p1 }
   0x5   : > { %s1023_s22 = sshll.u32 (!%p201_p2), %s1018_s19, 5 }
   0x6   : > { %204 = sbr.rel (%p201_p2) target bundleno = 310 (0x136), region = 40  ;;  %p235_p3 = scmp.lt.s32.totalorder (!%p201_p2), %s1023_s22, 63 }
   0xb   : > { %v1198_v0 = vld [vmem:[%s1558_s1 + $0x38] sm:$0xff]   ;;  %v1263_v1 = vmov 0   ;;  %v1199_v2 = vld [vmem:[%s1558_s1 + $0x30] sm:$0xff]   ;;  %s1564_s22 = smov (!%p235_p3, %s1023_s22), 63  ;;  %v1200_v3 = vld [vmem:[%s1558_s1 + $0x28] sm:$0xff]   ;;  %vm502_vm0 = vcmask 130048  }
   0xc   : > { %551 = vmatprep.subr.bf16.mxu0 %v1263_v1  ;;  %1171 = vmatprep.subr.bf16.mxu1 %v1263_v1  ;;  %s1091_s27 = sshll.u32 %s1564_s22, 3  ;;  %v1201_v4 = vld [vmem:[%s1558_s1 + $0x20] sm:$0xff]   ;;  %v1202_v7 = vld [vmem:[%s1558_s1 + $0x18] sm:$0xff]   ;;  %v1203_v8 = vld [vmem:[%s1558_s1 + $0x10] sm:$0xff]   ;;  %s1027_s19 = sshll.u32 %s1564_s22, 2 }
   0xd   : > { %552 = vmatpush1.bf16.msra.mxu0 %v1198_v0  ;;  %1180 = vmatpush1.bf16.msra.mxu1 %v1198_v0  ;;  %s1319_s30 = scalar_lea.vmem %s1557_s0, %s1091_s27  ;;  %v1204_v9 = vld [vmem:[%s1558_s1 + $0x8] sm:$0xff]   ;;  %v1205_v10 = vld [vmem:[%s1558_s1] sm:$0xff]   ;;  %s1391_s23 = scalar_lea.vmem %s1561_s4, %s1027_s19 }
   0xe   : > { %553 = vmatprep.subr.bf16.mxu0 %v1263_v1  ;;  %1172 = vmatprep.subr.bf16.mxu1 %v1263_v1  ;;  %v1209_v5 = vld [vmem:[%s1319_s30 + $0x4] ss:$8 sps:$4 sm:$0xff]   ;;  %v1207_v12 = vld [vmem:[%s1319_s30] ss:$8 sps:$4 sm:$0xff]   ;;  %v1213_v14 = vld [vmem:[%s1319_s30 + $0x14] ss:$8 sps:$4 sm:$0xff]   ;;  %s1418_s6 = scalar_lea.vmem %s1562_s5, %s1091_s27 }
   0xf   : > { %v1212_v6 = vld [vmem:[%s1319_s30 + $0x84] ss:$8 sps:$4 sm:$0xff]   ;;  %1071 = vmatprep.mubr.msk.bf16.mxu0 %vm502_vm0, %v1209_v5  ;;  %v1210_v13 = vld [vmem:[%s1319_s30 + $0x80] ss:$8 sps:$4 sm:$0xff]   ;;  %v1215_v15 = vld [vmem:[%s1319_s30 + $0x94] ss:$8 sps:$4 sm:$0xff]  }
  0x10   : > { %1079 = vmatprep.mubr.msk.bf16.mxu1 %vm502_vm0, %v1212_v6  ;;  %v1206_v11 = vld [vmem:[%s1558_s1 + $0x40] sm:$0xff]   ;;  %v1217_v16 = vld [vmem:[%s1319_s30 + $0x10] ss:$8 sps:$4 sm:$0xff]   ;;  %v1225_v22 = vld [vmem:[%s1319_s30 + $0x34] ss:$8 sps:$4 sm:$0xff]  }
  0x11   : > { %554 = vmatpush1.bf16.msra.mxu0 %v1199_v2  ;;  %1181 = vmatpush1.bf16.msra.mxu1 %v1199_v2  ;;  %v1218_v17 = vld [vmem:[%s1319_s30 + $0x90] ss:$8 sps:$4 sm:$0xff]   ;;  %v1219_v18 = vld [vmem:[%s1319_s30 + $0x24] ss:$8 sps:$4 sm:$0xff]   ;;  %v1223_v20 = vld [vmem:[%s1319_s30 + $0x20] ss:$8 sps:$4 sm:$0xff]  }
  0x12   : > { %555 = vmatprep.subr.bf16.mxu0 %v1263_v1  ;;  %1173 = vmatprep.subr.bf16.mxu1 %v1263_v1  ;;  %v1221_v19 = vld [vmem:[%s1319_s30 + $0xa4] ss:$8 sps:$4 sm:$0xff]   ;;  %v1224_v21 = vld [vmem:[%s1319_s30 + $0xa0] ss:$8 sps:$4 sm:$0xff]   ;;  %v1227_v23 = vld [vmem:[%s1319_s30 + $0xb4] ss:$8 sps:$4 sm:$0xff]  }
  0x13   : > { %v1229_v24 = vld [vmem:[%s1319_s30 + $0x30] ss:$8 sps:$4 sm:$0xff]   ;;  %v1231_v26 = vld [vmem:[%s1319_s30 + $0x44] ss:$8 sps:$4 sm:$0xff]   ;;  %v1235_v28 = vld [vmem:[%s1319_s30 + $0x40] ss:$8 sps:$4 sm:$0xff]  }
  0x14   : > { %v1230_v25 = vld [vmem:[%s1319_s30 + $0xb0] ss:$8 sps:$4 sm:$0xff]   ;;  %v1233_v27 = vld [vmem:[%s1319_s30 + $0xc4] ss:$8 sps:$4 sm:$0xff]   ;;  %v1236_v29 = vld [vmem:[%s1319_s30 + $0xc0] ss:$8 sps:$4 sm:$0xff]  }
  0x15   : > { %556 = vmatpush1.bf16.msra.mxu0 %v1200_v3  ;;  %1182 = vmatpush1.bf16.msra.mxu1 %v1200_v3  ;;  %v1237_v30 = vld [vmem:[%s1319_s30 + $0x54] ss:$8 sps:$4 sm:$0xff]   ;;  %v1241_v32 = vld [vmem:[%s1319_s30 + $0x50] ss:$8 sps:$4 sm:$0xff]   ;;  %v1243_v34 = vld [vmem:[%s1319_s30 + $0x64] ss:$8 sps:$4 sm:$0xff]  }
  0x16   : > { %557 = vmatprep.subr.bf16.mxu0 %v1263_v1  ;;  %1174 = vmatprep.subr.bf16.mxu1 %v1263_v1  ;;  %v1239_v31 = vld [vmem:[%s1319_s30 + $0xd4] ss:$8 sps:$4 sm:$0xff]   ;;  %v1242_v33 = vld [vmem:[%s1319_s30 + $0xd0] ss:$8 sps:$4 sm:$0xff]   ;;  %v1245_v35 = vld [vmem:[%s1319_s30 + $0xe4] ss:$8 sps:$4 sm:$0xff]  }
  0x17   : > { %v1247_v36 = vld [vmem:[%s1319_s30 + $0x60] ss:$8 sps:$4 sm:$0xff]   ;;  %v1249_v38 = vld [vmem:[%s1319_s30 + $0x74] ss:$8 sps:$4 sm:$0xff]   ;;  %v1253_v40 = vld [vmem:[%s1319_s30 + $0x70] ss:$8 sps:$4 sm:$0xff]  }
  0x18   : > { %v1248_v37 = vld [vmem:[%s1319_s30 + $0xe0] ss:$8 sps:$4 sm:$0xff]   ;;  %v1251_v39 = vld [vmem:[%s1319_s30 + $0xf4] ss:$8 sps:$4 sm:$0xff]   ;;  %v1254_v41 = vld [vmem:[%s1319_s30 + $0xf0] ss:$8 sps:$4 sm:$0xff]  }
  0x19   : > { %558 = vmatpush1.bf16.msra.mxu0 %v1201_v4  ;;  %1183 = vmatpush1.bf16.msra.mxu1 %v1201_v4  ;;  %v1396_v42 = vld [vmem:[%s1559_s2] ss:$0 sm:$0xff]  ;;  %v1156_v0 = vld [vmem:[%s1391_s23 + $0x8] sm:$0xff]  }
  0x1a   : > { %559 = vmatprep.subr.bf16.mxu0 %v1263_v1  ;;  %1175 = vmatprep.subr.bf16.mxu1 %v1263_v1  ;;  %v1093_v43 = vld [vmem:[%s1391_s23] sm:$0xff]  }
  0x1b   : > { %v1163_v44 = vld [vmem:[%s1391_s23 + $0x40] sm:$0xff]   ;;  %v1094_v49 = vunpack.c.l.bf16 %v1093_v43  ;;  %v1095_v57 = vunpack.c.h.bf16 %v1093_v43 }
  0x1c   : > { %v1403_v46 = vld [vmem:[%s1560_s3] ss:$0 sm:$0xff]  ;;  %v1126_v51 = vunpack.c.l.bf16 %v1163_v44  ;;  %v1127_v59 = vunpack.c.h.bf16 %v1163_v44 }
  0x1d   : > { %560 = vmatpush1.bf16.msra.mxu0 %v1202_v7  ;;  %1184 = vmatpush1.bf16.msra.mxu1 %v1202_v7 }
  0x1e   : > { %561 = vmatprep.subr.bf16.mxu0 %v1263_v1  ;;  %1176 = vmatprep.subr.bf16.mxu1 %v1263_v1 }
  0x21   : > { %562 = vmatpush1.bf16.msra.mxu0 %v1203_v8  ;;  %1185 = vmatpush1.bf16.msra.mxu1 %v1203_v8 }
  0x22   : > { %563 = vmatprep.subr.bf16.mxu0 %v1263_v1  ;;  %1177 = vmatprep.subr.bf16.mxu1 %v1263_v1 }
  0x25   : > { %564 = vmatpush1.bf16.msra.mxu0 %v1204_v9  ;;  %1186 = vmatpush1.bf16.msra.mxu1 %v1204_v9  ;;  %v1098_v9 = vunpack.c.l.bf16 %v1156_v0 }
  0x26   : > { %565 = vmatprep.subr.bf16.mxu0 %v1263_v1  ;;  %1178 = vmatprep.subr.bf16.mxu1 %v1263_v1 }
  0x29   : > { %566 = vmatpush1.bf16.msra.mxu0 %v1205_v10  ;;  %1187 = vmatpush1.bf16.msra.mxu1 %v1205_v10 }
  0x2a   : > { %581 = vmatprep.subr.bf16.mxu0 %v1263_v1  ;;  %1179 = vmatprep.subr.bf16.mxu1 %v1263_v1  ;;  %v1164_v1 = vld [vmem:[%s1391_s23 + $0x48] sm:$0xff]  }
  0x2d   : > { %582 = vmatpush2.bf16.msra.mxu0 %v1206_v11  ;;  %1188 = vmatpush2.bf16.msra.mxu1 %v1206_v11  ;;  %v1130_v11 = vunpack.c.l.bf16 %v1164_v1 }
  0x30   : > { %584 = vmatmul.mubr.bf16.vlgmr.msra.gmra.mxu0 %v1207_v12  ;;  %648 = vmatmul.mubr.bf16.vlgmr.msra.gmra.mxu1 %v1210_v13 }
  0x31   : > { %1072 = vmatprep.mubr.msk.bf16.mxu0 %vm502_vm0, %v1213_v14  ;;  %1080 = vmatprep.mubr.msk.bf16.mxu1 %vm502_vm0, %v1215_v15 }
  0x38   : > { %592 = vmatmul.mubr.bf16.gmra.mxu0 %v1217_v16  ;;  %656 = vmatmul.mubr.bf16.gmra.mxu1 %v1218_v17 }
  0x39   : > { %1073 = vmatprep.mubr.msk.bf16.mxu0 %vm502_vm0, %v1219_v18  ;;  %1081 = vmatprep.mubr.msk.bf16.mxu1 %vm502_vm0, %v1221_v19 }
  0x40   : > { %600 = vmatmul.mubr.bf16.gmra.mxu0 %v1223_v20  ;;  %664 = vmatmul.mubr.bf16.gmra.mxu1 %v1224_v21 }
  0x41   : > { %1074 = vmatprep.mubr.msk.bf16.mxu0 %vm502_vm0, %v1225_v22  ;;  %1082 = vmatprep.mubr.msk.bf16.mxu1 %vm502_vm0, %v1227_v23  ;;  %v1099_v23 = vunpack.c.h.bf16 %v1156_v0 }
  0x48   : > { %608 = vmatmul.mubr.bf16.gmra.mxu0 %v1229_v24  ;;  %672 = vmatmul.mubr.bf16.gmra.mxu1 %v1230_v25  ;;  %v1131_v25 = vunpack.c.h.bf16 %v1164_v1 }
  0x49   : > { %1075 = vmatprep.mubr.msk.bf16.mxu0 %vm502_vm0, %v1231_v26  ;;  %1083 = vmatprep.mubr.msk.bf16.mxu1 %vm502_vm0, %v1233_v27 }
  0x50   : > { %616 = vmatmul.mubr.bf16.gmra.mxu0 %v1235_v28  ;;  %680 = vmatmul.mubr.bf16.gmra.mxu1 %v1236_v29 }
  0x51   : > { %1076 = vmatprep.mubr.msk.bf16.mxu0 %vm502_vm0, %v1237_v30  ;;  %1084 = vmatprep.mubr.msk.bf16.mxu1 %vm502_vm0, %v1239_v31  ;;  %v1157_v30 = vld [vmem:[%s1391_s23 + $0x10] sm:$0xff]  }
  0x52   : > { %v1165_v31 = vld [vmem:[%s1391_s23 + $0x50] sm:$0xff]  }
  0x58   : > { %624 = vmatmul.mubr.bf16.gmra.mxu0 %v1241_v32  ;;  %688 = vmatmul.mubr.bf16.gmra.mxu1 %v1242_v33 }
  0x59   : > { %1077 = vmatprep.mubr.msk.bf16.mxu0 %vm502_vm0, %v1243_v34  ;;  %1085 = vmatprep.mubr.msk.bf16.mxu1 %vm502_vm0, %v1245_v35 }
  0x60   : > { %632 = vmatmul.mubr.bf16.gmra.mxu0 %v1247_v36  ;;  %696 = vmatmul.mubr.bf16.gmra.mxu1 %v1248_v37 }
  0x61   : > { %1078 = vmatprep.mubr.msk.bf16.mxu0 %vm502_vm0, %v1249_v38  ;;  %1086 = vmatprep.mubr.msk.bf16.mxu1 %vm502_vm0, %v1251_v39  ;;  %v1102_v39 = vunpack.c.l.bf16 %v1157_v30 }
  0x68   : > { %640 = vmatmul.mubr.bf16.gmra.mxu0 %v1253_v40  ;;  %704 = vmatmul.mubr.bf16.gmra.mxu1 %v1254_v41  ;;  %v1134_v41 = vunpack.c.l.bf16 %v1165_v31 }
  0xf0   : > { %v585_v45 = vpop.f32.mrf.mxu0  ;;  %v649_v47 = vpop.f32.mrf.mxu1 }
  0xf1   : > { %v719_v48 = vmul.f32 %v1396_v42, %v585_v45  ;;  %v735_v50 = vmul.f32 %v1396_v42, %v649_v47 }
  0xf2   : > { %v587_v52 = vpop.f32.mrf.mxu0  ;;  %v651_v53 = vpop.f32.mrf.mxu1 }
  0xf3   : > { %v758_v54 = vadd.f32 %v1403_v46, %v719_v48  ;;  %v774_v55 = vadd.f32 %v1403_v46, %v735_v50 }
  0xf4   : > { %v588_v56 = vpop.f32.mrf.mxu0  ;;  %v652_v58 = vpop.f32.mrf.mxu1 }
  0xf5   : > { %v854_v60 = vadd.f32 %v1094_v49, %v758_v54  ;;  %v870_v61 = vadd.f32 %v1126_v51, %v774_v55  ;;  %v720_v62 = vmul.f32 %v1396_v42, %v588_v56  ;;  %v736_v63 = vmul.f32 %v1396_v42, %v652_v58 }
  0xf6   : > { %v590_v2 = vpop.f32.mrf.mxu0  ;;  %v654_v3 = vpop.f32.mrf.mxu1  ;;  %v1103_v55 = vunpack.c.h.bf16 %v1157_v30 }
  0xf7   : > { %v886_v4 = vmax.f32 %v854_v60, 0.0  ;;  %v902_v5 = vmax.f32 %v870_v61, 0.0  ;;  %v759_v6 = vadd.f32 %v1403_v46, %v720_v62  ;;  %v775_v7 = vadd.f32 %v1403_v46, %v736_v63  ;;  %v1158_v62 = vld [vmem:[%s1391_s23 + $0x18] sm:$0xff]  }
  0xf8   : > { %v593_v8 = vpop.f32.mrf.mxu0  ;;  %v657_v10 = vpop.f32.mrf.mxu1  ;;  %v1166_v63 = vld [vmem:[%s1391_s23 + $0x58] sm:$0xff]  }
  0xf9   : > { %918 = vst.msk [vmem:[%s1418_s6] sm:$0xff] %vm502_vm0, %v886_v4  ;;  %934 = vst.msk [vmem:[%s1418_s6 + $0x80] sm:$0xff] %vm502_vm0, %v902_v5  ;;  %v855_v12 = vadd.f32 %v1095_v57, %v759_v6  ;;  %v871_v13 = vadd.f32 %v1127_v59, %v775_v7  ;;  %v721_v14 = vmul.f32 %v1396_v42, %v593_v8  ;;  %v1135_v57 = vunpack.c.h.bf16 %v1165_v31 }
  0xfa   : > { %v737_v15 = vmul.f32 %v1396_v42, %v657_v10  ;;  %v595_v16 = vpop.f32.mrf.mxu0  ;;  %v659_v17 = vpop.f32.mrf.mxu1  ;;  %v1106_v7 = vunpack.c.l.bf16 %v1158_v62 }
  0xfb   : > { %v887_v18 = vmax.f32 %v855_v12, 0.0  ;;  %v903_v19 = vmax.f32 %v871_v13, 0.0  ;;  %v760_v20 = vadd.f32 %v1403_v46, %v721_v14 }
  0xfc   : > { %v776_v21 = vadd.f32 %v1403_v46, %v737_v15  ;;  %v596_v22 = vpop.f32.mrf.mxu0  ;;  %v660_v24 = vpop.f32.mrf.mxu1 }
  0xfd   : > { %919 = vst.msk [vmem:[%s1418_s6 + $0x8] sm:$0xff] %vm502_vm0, %v887_v18  ;;  %935 = vst.msk [vmem:[%s1418_s6 + $0x88] sm:$0xff] %vm502_vm0, %v903_v19  ;;  %v856_v26 = vadd.f32 %v1098_v9, %v760_v20  ;;  %v722_v28 = vmul.f32 %v1396_v42, %v596_v22  ;;  %v738_v29 = vmul.f32 %v1396_v42, %v660_v24  ;;  %v1138_v9 = vunpack.c.l.bf16 %v1166_v63 }
  0xfe   : > { %v872_v27 = vadd.f32 %v1130_v11, %v776_v21  ;;  %v598_v32 = vpop.f32.mrf.mxu0  ;;  %v662_v33 = vpop.f32.mrf.mxu1  ;;  %v1107_v21 = vunpack.c.h.bf16 %v1158_v62 }
  0xff   : > { %v888_v34 = vmax.f32 %v856_v26, 0.0  ;;  %v761_v36 = vadd.f32 %v1403_v46, %v722_v28  ;;  %v777_v37 = vadd.f32 %v1403_v46, %v738_v29  ;;  %v1159_v28 = vld [vmem:[%s1391_s23 + $0x20] sm:$0xff]  }
 0x100   : > { %v904_v35 = vmax.f32 %v872_v27, 0.0  ;;  %v601_v38 = vpop.f32.mrf.mxu0  ;;  %v665_v40 = vpop.f32.mrf.mxu1  ;;  %v1167_v29 = vld [vmem:[%s1391_s23 + $0x60] sm:$0xff]  }
 0x101   : > { %920 = vst.msk [vmem:[%s1418_s6 + $0x10] sm:$0xff] %vm502_vm0, %v888_v34  ;;  %v857_v43 = vadd.f32 %v1099_v23, %v761_v36  ;;  %v873_v44 = vadd.f32 %v1131_v25, %v777_v37  ;;  %v723_v45 = vmul.f32 %v1396_v42, %v601_v38  ;;  %v739_v47 = vmul.f32 %v1396_v42, %v665_v40 }
 0x102   : > { %936 = vst.msk [vmem:[%s1418_s6 + $0x90] sm:$0xff] %vm502_vm0, %v904_v35  ;;  %v603_v48 = vpop.f32.mrf.mxu0  ;;  %v667_v49 = vpop.f32.mrf.mxu1  ;;  %v1139_v23 = vunpack.c.h.bf16 %v1166_v63  ;;  %v1110_v37 = vunpack.c.l.bf16 %v1159_v28 }
 0x103   : > { %v889_v50 = vmax.f32 %v857_v43, 0.0  ;;  %v905_v51 = vmax.f32 %v873_v44, 0.0  ;;  %v762_v52 = vadd.f32 %v1403_v46, %v723_v45  ;;  %v778_v53 = vadd.f32 %v1403_v46, %v739_v47 }
 0x104   : > { %v604_v54 = vpop.f32.mrf.mxu0  ;;  %v668_v56 = vpop.f32.mrf.mxu1 }
 0x105   : > { %921 = vst.msk [vmem:[%s1418_s6 + $0x18] sm:$0xff] %vm502_vm0, %v889_v50  ;;  %937 = vst.msk [vmem:[%s1418_s6 + $0x98] sm:$0xff] %vm502_vm0, %v905_v51  ;;  %v858_v58 = vadd.f32 %v1102_v39, %v762_v52  ;;  %v874_v59 = vadd.f32 %v1134_v41, %v778_v53  ;;  %v724_v60 = vmul.f32 %v1396_v42, %v604_v54  ;;  %v1142_v39 = vunpack.c.l.bf16 %v1167_v29 }
 0x106   : > { %v740_v61 = vmul.f32 %v1396_v42, %v668_v56  ;;  %v606_v0 = vpop.f32.mrf.mxu0  ;;  %v670_v1 = vpop.f32.mrf.mxu1  ;;  %v1111_v53 = vunpack.c.h.bf16 %v1159_v28 }
 0x107   : > { %v890_v2 = vmax.f32 %v858_v58, 0.0  ;;  %v906_v3 = vmax.f32 %v874_v59, 0.0  ;;  %v763_v4 = vadd.f32 %v1403_v46, %v724_v60  ;;  %v1160_v60 = vld [vmem:[%s1391_s23 + $0x28] sm:$0xff]  }
 0x108   : > { %v779_v5 = vadd.f32 %v1403_v46, %v740_v61  ;;  %v609_v6 = vpop.f32.mrf.mxu0  ;;  %v673_v8 = vpop.f32.mrf.mxu1  ;;  %v1168_v61 = vld [vmem:[%s1391_s23 + $0x68] sm:$0xff]  }
 0x109   : > { %922 = vst.msk [vmem:[%s1418_s6 + $0x20] sm:$0xff] %vm502_vm0, %v890_v2  ;;  %938 = vst.msk [vmem:[%s1418_s6 + $0xa0] sm:$0xff] %vm502_vm0, %v906_v3  ;;  %v859_v10 = vadd.f32 %v1103_v55, %v763_v4  ;;  %v725_v12 = vmul.f32 %v1396_v42, %v609_v6  ;;  %v741_v13 = vmul.f32 %v1396_v42, %v673_v8  ;;  %v1143_v55 = vunpack.c.h.bf16 %v1167_v29 }
 0x10a   : > { %v875_v11 = vadd.f32 %v1135_v57, %v779_v5  ;;  %v611_v14 = vpop.f32.mrf.mxu0  ;;  %v675_v15 = vpop.f32.mrf.mxu1  ;;  %v1114_v5 = vunpack.c.l.bf16 %v1160_v60 }
 0x10b   : > { %v891_v16 = vmax.f32 %v859_v10, 0.0  ;;  %v764_v18 = vadd.f32 %v1403_v46, %v725_v12  ;;  %v780_v19 = vadd.f32 %v1403_v46, %v741_v13 }
 0x10c   : > { %v907_v17 = vmax.f32 %v875_v11, 0.0  ;;  %v612_v20 = vpop.f32.mrf.mxu0  ;;  %v676_v22 = vpop.f32.mrf.mxu1 }
 0x10d   : > { %923 = vst.msk [vmem:[%s1418_s6 + $0x28] sm:$0xff] %vm502_vm0, %v891_v16  ;;  %v860_v24 = vadd.f32 %v1106_v7, %v764_v18  ;;  %v876_v25 = vadd.f32 %v1138_v9, %v780_v19  ;;  %v726_v26 = vmul.f32 %v1396_v42, %v612_v20  ;;  %v742_v27 = vmul.f32 %v1396_v42, %v676_v22 }
 0x10e   : > { %939 = vst.msk [vmem:[%s1418_s6 + $0xa8] sm:$0xff] %vm502_vm0, %v907_v17  ;;  %v614_v30 = vpop.f32.mrf.mxu0  ;;  %v678_v31 = vpop.f32.mrf.mxu1  ;;  %v1146_v7 = vunpack.c.l.bf16 %v1168_v61  ;;  %v1115_v19 = vunpack.c.h.bf16 %v1160_v60 }
 0x10f   : > { %v892_v32 = vmax.f32 %v860_v24, 0.0  ;;  %v908_v33 = vmax.f32 %v876_v25, 0.0  ;;  %v765_v34 = vadd.f32 %v1403_v46, %v726_v26  ;;  %v781_v35 = vadd.f32 %v1403_v46, %v742_v27  ;;  %v1161_v26 = vld [vmem:[%s1391_s23 + $0x30] sm:$0xff]  }
 0x110   : > { %v617_v36 = vpop.f32.mrf.mxu0  ;;  %v681_v38 = vpop.f32.mrf.mxu1  ;;  %v1169_v27 = vld [vmem:[%s1391_s23 + $0x70] sm:$0xff]  }
 0x111   : > { %924 = vst.msk [vmem:[%s1418_s6 + $0x30] sm:$0xff] %vm502_vm0, %v892_v32  ;;  %940 = vst.msk [vmem:[%s1418_s6 + $0xb0] sm:$0xff] %vm502_vm0, %v908_v33  ;;  %v861_v40 = vadd.f32 %v1107_v21, %v765_v34  ;;  %v877_v41 = vadd.f32 %v1139_v23, %v781_v35  ;;  %v727_v43 = vmul.f32 %v1396_v42, %v617_v36  ;;  %v1147_v21 = vunpack.c.h.bf16 %v1168_v61 }
 0x112   : > { %v743_v44 = vmul.f32 %v1396_v42, %v681_v38  ;;  %v619_v45 = vpop.f32.mrf.mxu0  ;;  %v683_v47 = vpop.f32.mrf.mxu1  ;;  %v1118_v35 = vunpack.c.l.bf16 %v1161_v26 }
 0x113   : > { %v893_v48 = vmax.f32 %v861_v40, 0.0  ;;  %v909_v49 = vmax.f32 %v877_v41, 0.0  ;;  %v766_v50 = vadd.f32 %v1403_v46, %v727_v43 }
 0x114   : > { %v782_v51 = vadd.f32 %v1403_v46, %v743_v44  ;;  %v620_v52 = vpop.f32.mrf.mxu0  ;;  %v684_v54 = vpop.f32.mrf.mxu1 }
 0x115   : > { %925 = vst.msk [vmem:[%s1418_s6 + $0x38] sm:$0xff] %vm502_vm0, %v893_v48  ;;  %941 = vst.msk [vmem:[%s1418_s6 + $0xb8] sm:$0xff] %vm502_vm0, %v909_v49  ;;  %v862_v56 = vadd.f32 %v1110_v37, %v766_v50  ;;  %v728_v58 = vmul.f32 %v1396_v42, %v620_v52  ;;  %v744_v59 = vmul.f32 %v1396_v42, %v684_v54  ;;  %v1150_v37 = vunpack.c.l.bf16 %v1169_v27 }
 0x116   : > { %v878_v57 = vadd.f32 %v1142_v39, %v782_v51  ;;  %v622_v62 = vpop.f32.mrf.mxu0  ;;  %v686_v63 = vpop.f32.mrf.mxu1  ;;  %v1119_v51 = vunpack.c.h.bf16 %v1161_v26 }
 0x117   : > { %v894_v0 = vmax.f32 %v862_v56, 0.0  ;;  %v767_v2 = vadd.f32 %v1403_v46, %v728_v58  ;;  %v783_v3 = vadd.f32 %v1403_v46, %v744_v59  ;;  %v1162_v58 = vld [vmem:[%s1391_s23 + $0x38] sm:$0xff]  }
 0x118   : > { %v910_v1 = vmax.f32 %v878_v57, 0.0  ;;  %v625_v4 = vpop.f32.mrf.mxu0  ;;  %v689_v6 = vpop.f32.mrf.mxu1  ;;  %v1170_v59 = vld [vmem:[%s1391_s23 + $0x78] sm:$0xff]  }
 0x119   : > { %926 = vst.msk [vmem:[%s1418_s6 + $0x40] sm:$0xff] %vm502_vm0, %v894_v0  ;;  %v863_v8 = vadd.f32 %v1111_v53, %v767_v2  ;;  %v879_v9 = vadd.f32 %v1143_v55, %v783_v3  ;;  %v729_v10 = vmul.f32 %v1396_v42, %v625_v4  ;;  %v745_v11 = vmul.f32 %v1396_v42, %v689_v6 }
 0x11a   : > { %942 = vst.msk [vmem:[%s1418_s6 + $0xc0] sm:$0xff] %vm502_vm0, %v910_v1  ;;  %v627_v12 = vpop.f32.mrf.mxu0  ;;  %v691_v13 = vpop.f32.mrf.mxu1  ;;  %v1151_v53 = vunpack.c.h.bf16 %v1169_v27  ;;  %v1122_v3 = vunpack.c.l.bf16 %v1162_v58 }
 0x11b   : > { %v895_v14 = vmax.f32 %v863_v8, 0.0  ;;  %v911_v15 = vmax.f32 %v879_v9, 0.0  ;;  %v768_v16 = vadd.f32 %v1403_v46, %v729_v10  ;;  %v784_v17 = vadd.f32 %v1403_v46, %v745_v11 }
 0x11c   : > { %v628_v18 = vpop.f32.mrf.mxu0  ;;  %v692_v20 = vpop.f32.mrf.mxu1 }
 0x11d   : > { %927 = vst.msk [vmem:[%s1418_s6 + $0x48] sm:$0xff] %vm502_vm0, %v895_v14  ;;  %943 = vst.msk [vmem:[%s1418_s6 + $0xc8] sm:$0xff] %vm502_vm0, %v911_v15  ;;  %v864_v22 = vadd.f32 %v1114_v5, %v768_v16  ;;  %v880_v23 = vadd.f32 %v1146_v7, %v784_v17  ;;  %v730_v24 = vmul.f32 %v1396_v42, %v628_v18  ;;  %v1154_v5 = vunpack.c.l.bf16 %v1170_v59 }
 0x11e   : > { %v746_v25 = vmul.f32 %v1396_v42, %v692_v20  ;;  %v630_v28 = vpop.f32.mrf.mxu0  ;;  %v694_v29 = vpop.f32.mrf.mxu1  ;;  %v1123_v17 = vunpack.c.h.bf16 %v1162_v58 }
 0x11f   : > { %v896_v30 = vmax.f32 %v864_v22, 0.0  ;;  %v912_v31 = vmax.f32 %v880_v23, 0.0  ;;  %v769_v32 = vadd.f32 %v1403_v46, %v730_v24 }
 0x120   : > { %v785_v33 = vadd.f32 %v1403_v46, %v746_v25  ;;  %v633_v34 = vpop.f32.mrf.mxu0  ;;  %v697_v36 = vpop.f32.mrf.mxu1 }
 0x121   : > { %928 = vst.msk [vmem:[%s1418_s6 + $0x50] sm:$0xff] %vm502_vm0, %v896_v30  ;;  %944 = vst.msk [vmem:[%s1418_s6 + $0xd0] sm:$0xff] %vm502_vm0, %v912_v31  ;;  %v865_v38 = vadd.f32 %v1115_v19, %v769_v32  ;;  %v731_v40 = vmul.f32 %v1396_v42, %v633_v34  ;;  %v747_v41 = vmul.f32 %v1396_v42, %v697_v36  ;;  %v1155_v19 = vunpack.c.h.bf16 %v1170_v59 }
 0x122   : > { %v881_v39 = vadd.f32 %v1147_v21, %v785_v33  ;;  %v635_v43 = vpop.f32.mrf.mxu0  ;;  %v699_v44 = vpop.f32.mrf.mxu1 }
 0x123   : > { %v897_v45 = vmax.f32 %v865_v38, 0.0  ;;  %v770_v48 = vadd.f32 %v1403_v46, %v731_v40  ;;  %v786_v49 = vadd.f32 %v1403_v46, %v747_v41 }
 0x124   : > { %v913_v47 = vmax.f32 %v881_v39, 0.0  ;;  %v636_v50 = vpop.f32.mrf.mxu0  ;;  %v700_v52 = vpop.f32.mrf.mxu1 }
 0x125   : > { %929 = vst.msk [vmem:[%s1418_s6 + $0x58] sm:$0xff] %vm502_vm0, %v897_v45  ;;  %v866_v54 = vadd.f32 %v1118_v35, %v770_v48  ;;  %v882_v55 = vadd.f32 %v1150_v37, %v786_v49  ;;  %v732_v56 = vmul.f32 %v1396_v42, %v636_v50  ;;  %v748_v57 = vmul.f32 %v1396_v42, %v700_v52 }
 0x126   : > { %945 = vst.msk [vmem:[%s1418_s6 + $0xd8] sm:$0xff] %vm502_vm0, %v913_v47  ;;  %v638_v60 = vpop.f32.mrf.mxu0  ;;  %v702_v61 = vpop.f32.mrf.mxu1 }
 0x127   : > { %v898_v62 = vmax.f32 %v866_v54, 0.0  ;;  %v914_v63 = vmax.f32 %v882_v55, 0.0  ;;  %v771_v0 = vadd.f32 %v1403_v46, %v732_v56  ;;  %v787_v1 = vadd.f32 %v1403_v46, %v748_v57 }
 0x128   : > { %v641_v2 = vpop.f32.mrf.mxu0  ;;  %v705_v4 = vpop.f32.mrf.mxu1 }
 0x129   : > { %930 = vst.msk [vmem:[%s1418_s6 + $0x60] sm:$0xff] %vm502_vm0, %v898_v62  ;;  %946 = vst.msk [vmem:[%s1418_s6 + $0xe0] sm:$0xff] %vm502_vm0, %v914_v63  ;;  %v867_v6 = vadd.f32 %v1119_v51, %v771_v0  ;;  %v883_v7 = vadd.f32 %v1151_v53, %v787_v1  ;;  %v733_v8 = vmul.f32 %v1396_v42, %v641_v2 }
 0x12a   : > { %v749_v9 = vmul.f32 %v1396_v42, %v705_v4  ;;  %v643_v10 = vpop.f32.mrf.mxu0  ;;  %v707_v11 = vpop.f32.mrf.mxu1 }
 0x12b   : > { %v899_v12 = vmax.f32 %v867_v6, 0.0  ;;  %v915_v13 = vmax.f32 %v883_v7, 0.0  ;;  %v772_v14 = vadd.f32 %v1403_v46, %v733_v8 }
 0x12c   : > { %v788_v15 = vadd.f32 %v1403_v46, %v749_v9  ;;  %v644_v16 = vpop.f32.mrf.mxu0  ;;  %v708_v18 = vpop.f32.mrf.mxu1 }
 0x12d   : > { %931 = vst.msk [vmem:[%s1418_s6 + $0x68] sm:$0xff] %vm502_vm0, %v899_v12  ;;  %947 = vst.msk [vmem:[%s1418_s6 + $0xe8] sm:$0xff] %vm502_vm0, %v915_v13  ;;  %v868_v20 = vadd.f32 %v1122_v3, %v772_v14  ;;  %v734_v22 = vmul.f32 %v1396_v42, %v644_v16  ;;  %v750_v23 = vmul.f32 %v1396_v42, %v708_v18 }
 0x12e   : > { %v884_v21 = vadd.f32 %v1154_v5, %v788_v15  ;;  %v646_v24 = vpop.f32.mrf.mxu0  ;;  %v710_v25 = vpop.f32.mrf.mxu1 }
 0x12f   : > { %v900_v26 = vmax.f32 %v868_v20, 0.0  ;;  %v773_v28 = vadd.f32 %v1403_v46, %v734_v22  ;;  %v789_v29 = vadd.f32 %v1403_v46, %v750_v23 }
 0x130   : > { %v916_v27 = vmax.f32 %v884_v21, 0.0 }
 0x131   : > { %932 = vst.msk [vmem:[%s1418_s6 + $0x70] sm:$0xff] %vm502_vm0, %v900_v26  ;;  %v869_v30 = vadd.f32 %v1123_v17, %v773_v28  ;;  %v885_v31 = vadd.f32 %v1155_v19, %v789_v29 }
 0x132   : > { %948 = vst.msk [vmem:[%s1418_s6 + $0xf0] sm:$0xff] %vm502_vm0, %v916_v27 }
 0x133   : > { %v901_v32 = vmax.f32 %v869_v30, 0.0  ;;  %v917_v33 = vmax.f32 %v885_v31, 0.0 }
 0x135   : > { %933 = vst.msk [vmem:[%s1418_s6 + $0x78] sm:$0xff] %vm502_vm0, %v901_v32  ;;  %949 = vst.msk [vmem:[%s1418_s6 + $0xf8] sm:$0xff] %vm502_vm0, %v917_v33 }
 0x136 PF: > { %s15_s18 = sadd.s32 1, %s1261_s18  }
 0x137   : > { %p12_p4 = scmp.ge.s32.totalorder %s15_s18, 4  }
 0x139   :  { %14 = sbr.rel (!%p12_p4) target bundleno = 1 (0x1), region = 73 }

// kernel: resnet_forward.23
= control target key start
LH: loop header
LB: loop body
LE: loop exit
PB: predicated region body
PF: predicated region fallthrough
CT: control target
= control target key end

     0   :  { %v535_v0 = vmov 0   ;;  %vm181_vm0 = vcmask 130048   ;;  %v367_v26 = vlaneseq  ;;  %vm427_vm1 = vcmask 523264   ;;  %s794_s1 = inlined_call_operand.vmem [shape: bf16[144,64], index: 1, kind: input, shape index: {}]   ;;  %s795_s0 = inlined_call_operand.vmem [shape: bf16[128,144], index: 0, kind: input, shape index: {}]   ;;  %s796_s4 = inlined_call_operand.vmem [shape: f32[1,64], index: 4, kind: input, shape index: {}]   ;;  %s797_s2 = inlined_call_operand.vmem [shape: f32[1,64], index: 2, kind: input, shape index: {}]   ;;  %s798_s3 = inlined_call_operand.vmem [shape: f32[1,64], index: 3, kind: input, shape index: {}]   ;;  %s799_s5 = inlined_call_operand.vmem [shape: f32[128,64], index: 5, kind: output, shape index: {}]  }
   0x1   :  { %206 = vmatprep.subr.bf16.mxu0 %v535_v0  ;;  %483 = vmatprep.subr.bf16.mxu1 %v535_v0  ;;  %v502_v1 = vld [vmem:[%s794_s1 + $0x38] sm:$0xff]   ;;  %v503_v2 = vld [vmem:[%s794_s1 + $0x30] sm:$0xff]   ;;  %v504_v3 = vld [vmem:[%s794_s1 + $0x28] sm:$0xff]  }
   0x2   :  { %207 = vmatpush1.bf16.msra.mxu0 %v502_v1  ;;  %492 = vmatpush1.bf16.msra.mxu1 %v502_v1  ;;  %v505_v4 = vld [vmem:[%s794_s1 + $0x20] sm:$0xff]   ;;  %v506_v7 = vld [vmem:[%s794_s1 + $0x18] sm:$0xff]   ;;  %v507_v8 = vld [vmem:[%s794_s1 + $0x10] sm:$0xff]   ;;  %v368_v27 = vshrl.u32 %v367_v26, 7 }
   0x3   :  { %208 = vmatprep.subr.bf16.mxu0 %v535_v0  ;;  %484 = vmatprep.subr.bf16.mxu1 %v535_v0  ;;  %v513_v5 = vld [vmem:[%s795_s0 + $0x4] ss:$8 sps:$4 sm:$0xff]   ;;  %v511_v12 = vld [vmem:[%s795_s0] ss:$8 sps:$4 sm:$0xff]   ;;  %v517_v14 = vld [vmem:[%s795_s0 + $0x14] ss:$8 sps:$4 sm:$0xff]  }
   0x4   :  { %v516_v6 = vld [vmem:[%s795_s0 + $0x44] ss:$8 sps:$4 sm:$0xff]   ;;  %473 = vmatprep.mubr.msk.bf16.mxu0 %vm181_vm0, %v513_v5  ;;  %v514_v13 = vld [vmem:[%s795_s0 + $0x40] ss:$8 sps:$4 sm:$0xff]   ;;  %v519_v15 = vld [vmem:[%s795_s0 + $0x54] ss:$8 sps:$4 sm:$0xff]  }
   0x5   :  { %477 = vmatprep.mubr.msk.bf16.mxu1 %vm181_vm0, %v516_v6  ;;  %v508_v9 = vld [vmem:[%s794_s1 + $0x8] sm:$0xff]   ;;  %v509_v10 = vld [vmem:[%s794_s1] sm:$0xff]   ;;  %v521_v16 = vld [vmem:[%s795_s0 + $0x10] ss:$8 sps:$4 sm:$0xff]   ;;  %v369_v30 = vsub.s32 0, %v368_v27 }
   0x6   :  { %209 = vmatpush1.bf16.msra.mxu0 %v503_v2  ;;  %493 = vmatpush1.bf16.msra.mxu1 %v503_v2  ;;  %v510_v11 = vld [vmem:[%s794_s1 + $0x40] sm:$0xff]   ;;  %v522_v17 = vld [vmem:[%s795_s0 + $0x50] ss:$8 sps:$4 sm:$0xff]   ;;  %v529_v22 = vld [vmem:[%s795_s0 + $0x34] ss:$8 sps:$4 sm:$0xff]  }
   0x7   :  { %210 = vmatprep.subr.bf16.mxu0 %v535_v0  ;;  %485 = vmatprep.subr.bf16.mxu1 %v535_v0  ;;  %v523_v18 = vld [vmem:[%s795_s0 + $0x24] ss:$8 sps:$4 sm:$0xff]   ;;  %v527_v20 = vld [vmem:[%s795_s0 + $0x20] ss:$8 sps:$4 sm:$0xff]   ;;  %v531_v23 = vld [vmem:[%s795_s0 + $0x74] ss:$8 sps:$4 sm:$0xff]  }
   0x8   :  { %v525_v19 = vld [vmem:[%s795_s0 + $0x64] ss:$8 sps:$4 sm:$0xff]   ;;  %v528_v21 = vld [vmem:[%s795_s0 + $0x60] ss:$8 sps:$4 sm:$0xff]   ;;  %v533_v24 = vld [vmem:[%s795_s0 + $0x30] ss:$8 sps:$4 sm:$0xff]  }
   0x9   :  { %v534_v25 = vld [vmem:[%s795_s0 + $0x70] ss:$8 sps:$4 sm:$0xff]   ;;  %v349_v28 = vld [vmem:[%s796_s4] sm:$0x1] }
   0xa   :  { %211 = vmatpush1.bf16.msra.mxu0 %v504_v3  ;;  %494 = vmatpush1.bf16.msra.mxu1 %v504_v3  ;;  %v655_v29 = vld [vmem:[%s797_s2] ss:$0 sm:$0xff]  ;;  %v388_v31 = vsub.f32 1.0, %v349_v28  ;;  %v665_v40 = vrot.slane %v349_v28, %v369_v30 }
   0xb   :  { %212 = vmatprep.subr.bf16.mxu0 %v535_v0  ;;  %486 = vmatprep.subr.bf16.mxu1 %v535_v0  ;;  %v660_v33 = vld [vmem:[%s798_s3] ss:$0 sm:$0xff] }
   0xc   :  { %v667_v41 = vrot.slane %v388_v31, %v369_v30 }
   0xe   :  { %213 = vmatpush1.bf16.msra.mxu0 %v505_v4  ;;  %495 = vmatpush1.bf16.msra.mxu1 %v505_v4 }
   0xf   :  { %214 = vmatprep.subr.bf16.mxu0 %v535_v0  ;;  %487 = vmatprep.subr.bf16.mxu1 %v535_v0 }
  0x12   :  { %215 = vmatpush1.bf16.msra.mxu0 %v506_v7  ;;  %496 = vmatpush1.bf16.msra.mxu1 %v506_v7 }
  0x13   :  { %216 = vmatprep.subr.bf16.mxu0 %v535_v0  ;;  %488 = vmatprep.subr.bf16.mxu1 %v535_v0 }
  0x16   :  { %217 = vmatpush1.bf16.msra.mxu0 %v507_v8  ;;  %497 = vmatpush1.bf16.msra.mxu1 %v507_v8 }
  0x17   :  { %218 = vmatprep.subr.bf16.mxu0 %v535_v0  ;;  %489 = vmatprep.subr.bf16.mxu1 %v535_v0 }
  0x1a   :  { %219 = vmatpush1.bf16.msra.mxu0 %v508_v9  ;;  %498 = vmatpush1.bf16.msra.mxu1 %v508_v9 }
  0x1b   :  { %220 = vmatprep.subr.bf16.mxu0 %v535_v0  ;;  %490 = vmatprep.subr.bf16.mxu1 %v535_v0 }
  0x1e   :  { %221 = vmatpush1.bf16.msra.mxu0 %v509_v10  ;;  %499 = vmatpush1.bf16.msra.mxu1 %v509_v10 }
  0x1f   :  { %236 = vmatprep.subr.bf16.mxu0 %v535_v0  ;;  %491 = vmatprep.subr.bf16.mxu1 %v535_v0 }
  0x22   :  { %237 = vmatpush2.bf16.msra.mxu0 %v510_v11  ;;  %500 = vmatpush2.bf16.msra.mxu1 %v510_v11 }
  0x25   :  { %239 = vmatmul.mubr.bf16.vlgmr.msra.gmra.mxu0 %v511_v12  ;;  %271 = vmatmul.mubr.bf16.vlgmr.msra.gmra.mxu1 %v514_v13 }
  0x26   :  { %474 = vmatprep.mubr.msk.bf16.mxu0 %vm181_vm0, %v517_v14  ;;  %478 = vmatprep.mubr.msk.bf16.mxu1 %vm181_vm0, %v519_v15 }
  0x2d   :  { %247 = vmatmul.mubr.bf16.gmra.mxu0 %v521_v16  ;;  %279 = vmatmul.mubr.bf16.gmra.mxu1 %v522_v17 }
  0x2e   :  { %475 = vmatprep.mubr.msk.bf16.mxu0 %vm181_vm0, %v523_v18  ;;  %479 = vmatprep.mubr.msk.bf16.mxu1 %vm181_vm0, %v525_v19 }
  0x35   :  { %255 = vmatmul.mubr.bf16.gmra.mxu0 %v527_v20  ;;  %287 = vmatmul.mubr.bf16.gmra.mxu1 %v528_v21 }
  0x36   :  { %476 = vmatprep.mubr.msk.bf16.mxu0 %vm181_vm0, %v529_v22  ;;  %480 = vmatprep.mubr.msk.bf16.mxu1 %vm181_vm0, %v531_v23 }
  0x3d   :  { %263 = vmatmul.mubr.bf16.gmra.mxu0 %v533_v24  ;;  %295 = vmatmul.mubr.bf16.gmra.mxu1 %v534_v25 }
  0xe5   :  { %v240_v32 = vpop.f32.mrf.mxu0  ;;  %v272_v34 = vpop.f32.mrf.mxu1 }
  0xe6   :  { %v310_v35 = vmul.f32 %v655_v29, %v240_v32  ;;  %v318_v36 = vmul.f32 %v655_v29, %v272_v34 }
  0xe7   :  { %v242_v37 = vpop.f32.mrf.mxu0  ;;  %v274_v38 = vpop.f32.mrf.mxu1 }
  0xe8   :  { %v333_v39 = vadd.f32 %v660_v33, %v310_v35  ;;  %v341_v42 = vadd.f32 %v660_v33, %v318_v36 }
  0xe9   :  { %v243_v43 = vpop.f32.mrf.mxu0  ;;  %v275_v44 = vpop.f32.mrf.mxu1 }
  0xea   :  { %v350_v45 = vmax.f32 %v333_v39, 0.0  ;;  %v358_v46 = vmax.f32 %v341_v42, 0.0  ;;  %v311_v47 = vmul.f32 %v655_v29, %v243_v43  ;;  %v319_v48 = vmul.f32 %v655_v29, %v275_v44 }
  0xeb   :  { %v245_v49 = vpop.f32.mrf.mxu0  ;;  %v277_v50 = vpop.f32.mrf.mxu1  ;;  %v395_v52 = vmul.f32 %v667_v41, %v333_v39  ;;  %v403_v54 = vmul.f32 %v667_v41, %v341_v42 }
  0xec   :  { %v372_v51 = vmul.f32 %v665_v40, %v350_v45  ;;  %v380_v53 = vmul.f32 %v665_v40, %v358_v46  ;;  %v334_v55 = vadd.f32 %v660_v33, %v311_v47  ;;  %v342_v56 = vadd.f32 %v660_v33, %v319_v48 }
  0xed   :  { %v248_v57 = vpop.f32.mrf.mxu0  ;;  %v280_v58 = vpop.f32.mrf.mxu1 }
  0xee   :  { %v411_v59 = vadd.f32 %v395_v52, %v372_v51  ;;  %v419_v60 = vadd.f32 %v403_v54, %v380_v53  ;;  %v312_v61 = vmul.f32 %v655_v29, %v248_v57  ;;  %v320_v62 = vmul.f32 %v655_v29, %v280_v58 }
  0xef   :  { %v351_v63 = vmax.f32 %v334_v55, 0.0  ;;  %v359_v0 = vmax.f32 %v342_v56, 0.0  ;;  %v250_v1 = vpop.f32.mrf.mxu0  ;;  %v282_v2 = vpop.f32.mrf.mxu1  ;;  %v396_v6 = vmul.f32 %v667_v41, %v334_v55  ;;  %v404_v8 = vmul.f32 %v667_v41, %v342_v56 }
  0xf0   :  { %428 = vst.msk [vmem:[%s799_s5] sm:$0xff] %vm427_vm1, %v411_v59  ;;  %436 = vst.msk [vmem:[%s799_s5 + $0x40] sm:$0xff] %vm427_vm1, %v419_v60  ;;  %v335_v3 = vadd.f32 %v660_v33, %v312_v61  ;;  %v343_v4 = vadd.f32 %v660_v33, %v320_v62 }
  0xf1   :  { %v373_v5 = vmul.f32 %v665_v40, %v351_v63  ;;  %v381_v7 = vmul.f32 %v665_v40, %v359_v0  ;;  %v251_v9 = vpop.f32.mrf.mxu0  ;;  %v283_v10 = vpop.f32.mrf.mxu1 }
  0xf2   :  { %v352_v11 = vmax.f32 %v335_v3, 0.0  ;;  %v360_v12 = vmax.f32 %v343_v4, 0.0  ;;  %v313_v15 = vmul.f32 %v655_v29, %v251_v9  ;;  %v321_v16 = vmul.f32 %v655_v29, %v283_v10 }
  0xf3   :  { %v412_v13 = vadd.f32 %v396_v6, %v373_v5  ;;  %v420_v14 = vadd.f32 %v404_v8, %v381_v7  ;;  %v253_v17 = vpop.f32.mrf.mxu0  ;;  %v285_v18 = vpop.f32.mrf.mxu1  ;;  %v397_v20 = vmul.f32 %v667_v41, %v335_v3  ;;  %v405_v22 = vmul.f32 %v667_v41, %v343_v4 }
  0xf4   :  { %v374_v19 = vmul.f32 %v665_v40, %v352_v11  ;;  %v382_v21 = vmul.f32 %v665_v40, %v360_v12  ;;  %v336_v23 = vadd.f32 %v660_v33, %v313_v15  ;;  %v344_v24 = vadd.f32 %v660_v33, %v321_v16 }
  0xf5   :  { %429 = vst.msk [vmem:[%s799_s5 + $0x8] sm:$0xff] %vm427_vm1, %v412_v13  ;;  %437 = vst.msk [vmem:[%s799_s5 + $0x48] sm:$0xff] %vm427_vm1, %v420_v14  ;;  %v256_v25 = vpop.f32.mrf.mxu0  ;;  %v288_v26 = vpop.f32.mrf.mxu1 }
  0xf6   :  { %v413_v27 = vadd.f32 %v397_v20, %v374_v19  ;;  %v421_v28 = vadd.f32 %v405_v22, %v382_v21  ;;  %v314_v30 = vmul.f32 %v655_v29, %v256_v25  ;;  %v322_v31 = vmul.f32 %v655_v29, %v288_v26 }
  0xf7   :  { %v353_v32 = vmax.f32 %v336_v23, 0.0  ;;  %v361_v34 = vmax.f32 %v344_v24, 0.0  ;;  %v258_v35 = vpop.f32.mrf.mxu0  ;;  %v290_v36 = vpop.f32.mrf.mxu1  ;;  %v398_v42 = vmul.f32 %v667_v41, %v336_v23  ;;  %v406_v44 = vmul.f32 %v667_v41, %v344_v24 }
  0xf8   :  { %430 = vst.msk [vmem:[%s799_s5 + $0x10] sm:$0xff] %vm427_vm1, %v413_v27  ;;  %438 = vst.msk [vmem:[%s799_s5 + $0x50] sm:$0xff] %vm427_vm1, %v421_v28  ;;  %v337_v37 = vadd.f32 %v660_v33, %v314_v30  ;;  %v345_v38 = vadd.f32 %v660_v33, %v322_v31 }
  0xf9   :  { %v375_v39 = vmul.f32 %v665_v40, %v353_v32  ;;  %v383_v43 = vmul.f32 %v665_v40, %v361_v34  ;;  %v259_v45 = vpop.f32.mrf.mxu0  ;;  %v291_v46 = vpop.f32.mrf.mxu1 }
  0xfa   :  { %v354_v47 = vmax.f32 %v337_v37, 0.0  ;;  %v362_v48 = vmax.f32 %v345_v38, 0.0  ;;  %v315_v51 = vmul.f32 %v655_v29, %v259_v45  ;;  %v323_v52 = vmul.f32 %v655_v29, %v291_v46 }
  0xfb   :  { %v414_v49 = vadd.f32 %v398_v42, %v375_v39  ;;  %v422_v50 = vadd.f32 %v406_v44, %v383_v43  ;;  %v261_v53 = vpop.f32.mrf.mxu0  ;;  %v293_v54 = vpop.f32.mrf.mxu1  ;;  %v399_v56 = vmul.f32 %v667_v41, %v337_v37  ;;  %v407_v58 = vmul.f32 %v667_v41, %v345_v38 }
  0xfc   :  { %v376_v55 = vmul.f32 %v665_v40, %v354_v47  ;;  %v384_v57 = vmul.f32 %v665_v40, %v362_v48  ;;  %v338_v59 = vadd.f32 %v660_v33, %v315_v51  ;;  %v346_v60 = vadd.f32 %v660_v33, %v323_v52 }
  0xfd   :  { %431 = vst.msk [vmem:[%s799_s5 + $0x18] sm:$0xff] %vm427_vm1, %v414_v49  ;;  %439 = vst.msk [vmem:[%s799_s5 + $0x58] sm:$0xff] %vm427_vm1, %v422_v50  ;;  %v264_v61 = vpop.f32.mrf.mxu0  ;;  %v296_v62 = vpop.f32.mrf.mxu1 }
  0xfe   :  { %v415_v63 = vadd.f32 %v399_v56, %v376_v55  ;;  %v423_v0 = vadd.f32 %v407_v58, %v384_v57  ;;  %v316_v1 = vmul.f32 %v655_v29, %v264_v61  ;;  %v324_v2 = vmul.f32 %v655_v29, %v296_v62 }
  0xff   :  { %v355_v3 = vmax.f32 %v338_v59, 0.0  ;;  %v363_v4 = vmax.f32 %v346_v60, 0.0  ;;  %v266_v5 = vpop.f32.mrf.mxu0  ;;  %v298_v6 = vpop.f32.mrf.mxu1  ;;  %v400_v10 = vmul.f32 %v667_v41, %v338_v59  ;;  %v408_v12 = vmul.f32 %v667_v41, %v346_v60 }
 0x100   :  { %432 = vst.msk [vmem:[%s799_s5 + $0x20] sm:$0xff] %vm427_vm1, %v415_v63  ;;  %440 = vst.msk [vmem:[%s799_s5 + $0x60] sm:$0xff] %vm427_vm1, %v423_v0  ;;  %v339_v7 = vadd.f32 %v660_v33, %v316_v1  ;;  %v347_v8 = vadd.f32 %v660_v33, %v324_v2 }
 0x101   :  { %v377_v9 = vmul.f32 %v665_v40, %v355_v3  ;;  %v385_v11 = vmul.f32 %v665_v40, %v363_v4  ;;  %v267_v13 = vpop.f32.mrf.mxu0  ;;  %v299_v14 = vpop.f32.mrf.mxu1 }
 0x102   :  { %v356_v15 = vmax.f32 %v339_v7, 0.0  ;;  %v364_v16 = vmax.f32 %v347_v8, 0.0  ;;  %v317_v19 = vmul.f32 %v655_v29, %v267_v13  ;;  %v325_v20 = vmul.f32 %v655_v29, %v299_v14 }
 0x103   :  { %v416_v17 = vadd.f32 %v400_v10, %v377_v9  ;;  %v424_v18 = vadd.f32 %v408_v12, %v385_v11  ;;  %v269_v21 = vpop.f32.mrf.mxu0  ;;  %v301_v22 = vpop.f32.mrf.mxu1  ;;  %v401_v24 = vmul.f32 %v667_v41, %v339_v7  ;;  %v409_v26 = vmul.f32 %v667_v41, %v347_v8 }
 0x104   :  { %v378_v23 = vmul.f32 %v665_v40, %v356_v15  ;;  %v386_v25 = vmul.f32 %v665_v40, %v364_v16  ;;  %v340_v29 = vadd.f32 %v660_v33, %v317_v19  ;;  %v348_v27 = vadd.f32 %v660_v33, %v325_v20 }
 0x105   :  { %433 = vst.msk [vmem:[%s799_s5 + $0x28] sm:$0xff] %vm427_vm1, %v416_v17  ;;  %441 = vst.msk [vmem:[%s799_s5 + $0x68] sm:$0xff] %vm427_vm1, %v424_v18 }
 0x106   :  { %v417_v28 = vadd.f32 %v401_v24, %v378_v23  ;;  %v425_v30 = vadd.f32 %v409_v26, %v386_v25  ;;  %v357_v31 = vmax.f32 %v340_v29, 0.0  ;;  %v365_v32 = vmax.f32 %v348_v27, 0.0 }
 0x107   :  { %v402_v35 = vmul.f32 %v667_v41, %v340_v29  ;;  %v410_v36 = vmul.f32 %v667_v41, %v348_v27 }
 0x108   :  { %434 = vst.msk [vmem:[%s799_s5 + $0x30] sm:$0xff] %vm427_vm1, %v417_v28  ;;  %442 = vst.msk [vmem:[%s799_s5 + $0x70] sm:$0xff] %vm427_vm1, %v425_v30  ;;  %v379_v34 = vmul.f32 %v665_v40, %v357_v31  ;;  %v387_v33 = vmul.f32 %v665_v40, %v365_v32 }
 0x10a   :  { %v418_v37 = vadd.f32 %v402_v35, %v379_v34  ;;  %v426_v38 = vadd.f32 %v410_v36, %v387_v33 }
 0x10c   :  { %435 = vst.msk [vmem:[%s799_s5 + $0x38] sm:$0xff] %vm427_vm1, %v418_v37  ;;  %443 = vst.msk [vmem:[%s799_s5 + $0x78] sm:$0xff] %vm427_vm1, %v426_v38 }

// kernel: resnet_forward.24
= control target key start
LH: loop header
LB: loop body
LE: loop exit
PB: predicated region body
PF: predicated region fallthrough
CT: control target
= control target key end

     0   :  { %vm317_vm0 = vcmask 261120   ;;  %s1238_s1 = inlined_call_operand.vmem [shape: bf16[288,32], index: 1, kind: input, shape index: {}]   ;;  %s1239_s0 = inlined_call_operand.vmem [shape: bf16[128,288], index: 0, kind: input, shape index: {}]   ;;  %s1240_s2 = inlined_call_operand.vmem [shape: f32[1,32], index: 2, kind: input, shape index: {}]   ;;  %s1241_s4 = inlined_call_operand.vmem [shape: bf16[128,32], index: 4, kind: input, shape index: {}]   ;;  %s1242_s3 = inlined_call_operand.vmem [shape: f32[1,32], index: 3, kind: input, shape index: {}]   ;;  %s1243_s5 = inlined_call_operand.vmem [shape: f32[128,32], index: 5, kind: output, shape index: {}]  }
   0x1   :  { %v867_v0 = vld [vmem:[%s1238_s1 + $0x78] sm:$0xff]   ;;  %v869_v2 = vld [vmem:[%s1238_s1 + $0x70] sm:$0xff]   ;;  %v871_v4 = vld [vmem:[%s1238_s1 + $0x68] sm:$0xff]  }
   0x2   :  { %v868_v1 = vld [vmem:[%s1238_s1 + $0x38] sm:$0xff]   ;;  %757 = vmatprep.subr.bf16.mxu0 %v867_v0  ;;  %851 = vmatprep.subr.bf16.mxu1 %v867_v0  ;;  %v870_v3 = vld [vmem:[%s1238_s1 + $0x30] sm:$0xff]   ;;  %v872_v5 = vld [vmem:[%s1238_s1 + $0x28] sm:$0xff]  }
   0x3   :  { %758 = vmatpush3.bf16.msra.mxu0 %v868_v1  ;;  %859 = vmatpush3.bf16.msra.mxu1 %v868_v1  ;;  %v873_v6 = vld [vmem:[%s1238_s1 + $0x60] sm:$0xff]   ;;  %v875_v8 = vld [vmem:[%s1238_s1 + $0x58] sm:$0xff]   ;;  %v877_v10 = vld [vmem:[%s1238_s1 + $0x50] sm:$0xff]  }
   0x4   :  { %759 = vmatprep.subr.bf16.mxu0 %v869_v2  ;;  %852 = vmatprep.subr.bf16.mxu1 %v869_v2  ;;  %v874_v7 = vld [vmem:[%s1238_s1 + $0x20] sm:$0xff]   ;;  %v876_v9 = vld [vmem:[%s1238_s1 + $0x18] sm:$0xff]   ;;  %v878_v13 = vld [vmem:[%s1238_s1 + $0x10] sm:$0xff]  }
   0x5   :  { %v885_v11 = vld [vmem:[%s1239_s0 + $0x4] ss:$12 sps:$4 sm:$0xff]   ;;  %v888_v12 = vld [vmem:[%s1239_s0 + $0x94] ss:$12 sps:$4 sm:$0xff]   ;;  %v879_v14 = vld [vmem:[%s1238_s1 + $0x48] sm:$0xff]  }
   0x6   :  { %374 = vmatprep.mubr.bf16.mxu0 %v885_v11  ;;  %422 = vmatprep.mubr.bf16.mxu1 %v888_v12  ;;  %v880_v15 = vld [vmem:[%s1238_s1 + $0x8] sm:$0xff]   ;;  %v881_v16 = vld [vmem:[%s1238_s1 + $0x40] sm:$0xff]   ;;  %v886_v20 = vld [vmem:[%s1239_s0 + $0x90] ss:$12 sps:$4 sm:$0xff]  }
   0x7   :  { %760 = vmatpush3.bf16.msra.mxu0 %v870_v3  ;;  %860 = vmatpush3.bf16.msra.mxu1 %v870_v3  ;;  %v882_v17 = vld [vmem:[%s1238_s1] sm:$0xff]   ;;  %v889_v19 = vld [vmem:[%s1238_s1 + $0x88] sm:$0xff]   ;;  %v900_v28 = vld [vmem:[%s1239_s0 + $0x30] ss:$12 sps:$4 sm:$0xff]  }
   0x8   :  { %761 = vmatprep.subr.bf16.mxu0 %v871_v4  ;;  %853 = vmatprep.subr.bf16.mxu1 %v871_v4  ;;  %v883_v18 = vld [vmem:[%s1239_s0] ss:$12 sps:$4 sm:$0xff]   ;;  %v890_v21 = vld [vmem:[%s1239_s0 + $0x1c] ss:$12 sps:$4 sm:$0xff]   ;;  %v894_v24 = vld [vmem:[%s1239_s0 + $0x18] ss:$12 sps:$4 sm:$0xff]  }
   0x9   :  { %v892_v22 = vld [vmem:[%s1239_s0 + $0xac] ss:$12 sps:$4 sm:$0xff]   ;;  %v896_v23 = vld [vmem:[%s1238_s1 + $0x80] sm:$0xff]   ;;  %v895_v25 = vld [vmem:[%s1239_s0 + $0xa8] ss:$12 sps:$4 sm:$0xff]  }
   0xa   :  { %v897_v26 = vld [vmem:[%s1239_s0 + $0x34] ss:$12 sps:$4 sm:$0xff]   ;;  %v902_v30 = vld [vmem:[%s1239_s0 + $0x4c] ss:$12 sps:$4 sm:$0xff]   ;;  %v906_v33 = vld [vmem:[%s1239_s0 + $0x50] ss:$12 sps:$4 sm:$0xff]  }
   0xb   :  { %762 = vmatpush3.bf16.msra.mxu0 %v872_v5  ;;  %861 = vmatpush3.bf16.msra.mxu1 %v872_v5  ;;  %v899_v27 = vld [vmem:[%s1239_s0 + $0x8] ss:$12 sps:$4 sm:$0xff]   ;;  %v901_v29 = vld [vmem:[%s1239_s0 + $0x20] ss:$12 sps:$4 sm:$0xff]   ;;  %v904_v31 = vld [vmem:[%s1239_s0 + $0x38] ss:$12 sps:$4 sm:$0xff]  }
   0xc   :  { %763 = vmatprep.subr.bf16.mxu0 %v873_v6  ;;  %854 = vmatprep.subr.bf16.mxu1 %v873_v6  ;;  %v905_v32 = vld [vmem:[%s1239_s0 + $0x48] ss:$12 sps:$4 sm:$0xff]   ;;  %v907_v34 = vld [vmem:[%s1239_s0 + $0x64] ss:$12 sps:$4 sm:$0xff]   ;;  %v910_v36 = vld [vmem:[%s1239_s0 + $0x60] ss:$12 sps:$4 sm:$0xff]  }
   0xd   :  { %v909_v35 = vld [vmem:[%s1239_s0 + $0x68] ss:$12 sps:$4 sm:$0xff]   ;;  %v911_v37 = vld [vmem:[%s1239_s0 + $0x80] ss:$12 sps:$4 sm:$0xff]   ;;  %v914_v39 = vld [vmem:[%s1239_s0 + $0x98] ss:$12 sps:$4 sm:$0xff]  }
   0xe   :  { %v912_v38 = vld [vmem:[%s1239_s0 + $0x7c] ss:$12 sps:$4 sm:$0xff]   ;;  %v915_v40 = vld [vmem:[%s1239_s0 + $0x78] ss:$12 sps:$4 sm:$0xff]   ;;  %v1100_v61 = vld [vmem:[%s1240_s2] ss:$0 sm:$0xff] }
   0xf   :  { %764 = vmatpush3.bf16.msra.mxu0 %v874_v7  ;;  %862 = vmatpush3.bf16.msra.mxu1 %v874_v7  ;;  %v916_v41 = vld [vmem:[%s1239_s0 + $0xb0] ss:$12 sps:$4 sm:$0xff]   ;;  %v750_v62 = vld [vmem:[%s1241_s4 + $0x8] sm:$0xff]   ;;  %v1108_v1 = vld [vmem:[%s1242_s3] ss:$0 sm:$0xff] }
  0x10   :  { %765 = vmatprep.subr.bf16.mxu0 %v875_v8  ;;  %855 = vmatprep.subr.bf16.mxu1 %v875_v8  ;;  %v719_v4 = vld [vmem:[%s1241_s4] sm:$0xff]   ;;  %v724_v7 = vunpack.c.l.bf16 %v750_v62 }
  0x13   :  { %766 = vmatpush3.bf16.msra.mxu0 %v876_v9  ;;  %863 = vmatpush3.bf16.msra.mxu1 %v876_v9 }
  0x14   :  { %767 = vmatprep.subr.bf16.mxu0 %v877_v10  ;;  %856 = vmatprep.subr.bf16.mxu1 %v877_v10 }
  0x17   :  { %768 = vmatpush3.bf16.msra.mxu0 %v878_v13  ;;  %864 = vmatpush3.bf16.msra.mxu1 %v878_v13  ;;  %v720_v13 = vunpack.c.l.bf16 %v719_v4 }
  0x18   :  { %769 = vmatprep.subr.bf16.mxu0 %v879_v14  ;;  %857 = vmatprep.subr.bf16.mxu1 %v879_v14 }
  0x1b   :  { %770 = vmatpush3.bf16.msra.mxu0 %v880_v15  ;;  %865 = vmatpush3.bf16.msra.mxu1 %v880_v15 }
  0x1c   :  { %771 = vmatprep.subr.bf16.mxu0 %v881_v16  ;;  %858 = vmatprep.subr.bf16.mxu1 %v881_v16 }
  0x1f   :  { %772 = vmatpush3.bf16.msra.mxu0 %v882_v17  ;;  %866 = vmatpush3.bf16.msra.mxu1 %v882_v17 }
  0x20   :  { %831 = vmatprep.subr.bf16.mxu1 %v889_v19 }
  0x22   :  { %375 = vmatmul.mubr.bf16.vlgmr.msra.gmra.mxu0 %v883_v18  ;;  %423 = vmatmul.mubr.bf16.vlgmr.msra.gmra.mxu1 %v886_v20 }
  0x23   :  { %832 = vmatpush3.bf16.msra.mxu1 %v889_v19  ;;  %382 = vmatprep.mubr.bf16.mxu0 %v890_v21  ;;  %v725_v21 = vunpack.c.h.bf16 %v750_v62 }
  0x24   :  { %430 = vmatprep.mubr.bf16.mxu1 %v892_v22  ;;  %833 = vmatprep.subr.bf16.mxu1 %v896_v23 }
  0x27   :  { %834 = vmatpush3.bf16.msra.mxu1 %v896_v23 }
  0x2a   :  { %383 = vmatmul.mubr.bf16.gmra.mxu0 %v894_v24  ;;  %431 = vmatmul.mubr.bf16.gmra.mxu1 %v895_v25 }
  0x2b   :  { %390 = vmatprep.mubr.bf16.mxu0 %v897_v26  ;;  %835 = vmatprep.mubr.msk.bf16.mxu1 %vm317_vm0, %v899_v27 }
  0x32   :  { %391 = vmatmul.mubr.bf16.gmra.mxu0 %v900_v28  ;;  %836 = vmatmul.mubr.msk.bf16.vlgmr.msra.gmra.mxu1 %vm317_vm0, %v901_v29  ;;  %v751_v29 = vld [vmem:[%s1241_s4 + $0x10] sm:$0xff]  }
  0x33   :  { %398 = vmatprep.mubr.bf16.mxu0 %v902_v30  ;;  %839 = vmatprep.mubr.msk.bf16.mxu1 %vm317_vm0, %v904_v31  ;;  %v721_v31 = vunpack.c.h.bf16 %v719_v4 }
  0x3a   :  { %399 = vmatmul.mubr.bf16.gmra.mxu0 %v905_v32  ;;  %840 = vmatmul.mubr.msk.bf16.gmra.mxu1 %vm317_vm0, %v906_v33 }
  0x3b   :  { %406 = vmatprep.mubr.bf16.mxu0 %v907_v34  ;;  %843 = vmatprep.mubr.msk.bf16.mxu1 %vm317_vm0, %v909_v35 }
  0x42   :  { %407 = vmatmul.mubr.bf16.gmra.mxu0 %v910_v36  ;;  %844 = vmatmul.mubr.msk.bf16.gmra.mxu1 %vm317_vm0, %v911_v37  ;;  %v752_v37 = vld [vmem:[%s1241_s4 + $0x18] sm:$0xff]  }
  0x43   :  { %414 = vmatprep.mubr.bf16.mxu0 %v912_v38  ;;  %847 = vmatprep.mubr.msk.bf16.mxu1 %vm317_vm0, %v914_v39 }
  0x4a   :  { %415 = vmatmul.mubr.bf16.gmra.mxu0 %v915_v40  ;;  %848 = vmatmul.mubr.msk.bf16.gmra.mxu1 %vm317_vm0, %v916_v41  ;;  %v728_v40 = vunpack.c.l.bf16 %v751_v29 }
  0xe2   :  { %v773_v42 = vpop.f32.mrf.mxu0  ;;  %v1081_v43 = vpop.f32.mrf.mxu1 }
  0xe4   :  { %v774_v44 = vpop.f32.mrf.mxu0  ;;  %v1083_v45 = vpop.f32.mrf.mxu1 }
  0xe5   :  { %v775_v63 = vadd.f32 %v774_v44, %v773_v42 }
  0xe6   :  { %v776_v46 = vpop.f32.mrf.mxu0  ;;  %v1085_v47 = vpop.f32.mrf.mxu1 }
  0xe8   :  { %v777_v48 = vpop.f32.mrf.mxu0  ;;  %v1087_v49 = vpop.f32.mrf.mxu1 }
  0xe9   :  { %v778_v15 = vadd.f32 %v777_v48, %v776_v46 }
  0xea   :  { %v779_v50 = vpop.f32.mrf.mxu0  ;;  %v1089_v51 = vpop.f32.mrf.mxu1 }
  0xec   :  { %v780_v52 = vpop.f32.mrf.mxu0  ;;  %v1091_v53 = vpop.f32.mrf.mxu1 }
  0xed   :  { %v781_v58 = vadd.f32 %v780_v52, %v779_v50 }
  0xee   :  { %v782_v54 = vpop.f32.mrf.mxu0  ;;  %v1093_v55 = vpop.f32.mrf.mxu1 }
  0xf0   :  { %v783_v56 = vpop.f32.mrf.mxu0  ;;  %v1095_v57 = vpop.f32.mrf.mxu1 }
  0xf1   :  { %v784_v5 = vadd.f32 %v783_v56, %v782_v54  ;;  %v732_v54 = vunpack.c.l.bf16 %v752_v37 }
  0xf2   :  { %v785_v59 = vpop.f32.mrf.mxu0  ;;  %v837_v60 = vpop.f32.mrf.mxu1 }
  0xf3   :  { %v482_v0 = vadd.f32 %v837_v60, %v781_v58 }
  0xf4   :  { %v786_v2 = vpop.f32.mrf.mxu0  ;;  %v473_v3 = vpop.f32.mrf.mxu1 }
  0xf5   :  { %v545_v6 = vmul.f32 %v1100_v61, %v482_v0  ;;  %v474_v8 = vadd.f32 %v775_v63, %v473_v3  ;;  %v787_v26 = vadd.f32 %v786_v2, %v785_v59  ;;  %v729_v2 = vunpack.c.h.bf16 %v751_v29 }
  0xf6   :  { %v788_v9 = vpop.f32.mrf.mxu0  ;;  %v838_v10 = vpop.f32.mrf.mxu1 }
  0xf7   :  { %v568_v11 = vadd.f32 %v1108_v1, %v545_v6  ;;  %v543_v12 = vmul.f32 %v1100_v61, %v474_v8  ;;  %v485_v14 = vadd.f32 %v838_v10, %v784_v5 }
  0xf8   :  { %v789_v16 = vpop.f32.mrf.mxu0  ;;  %v476_v17 = vpop.f32.mrf.mxu1 }
  0xf9   :  { %v616_v18 = vadd.f32 %v724_v7, %v568_v11  ;;  %v566_v19 = vadd.f32 %v1108_v1, %v543_v12  ;;  %v546_v20 = vmul.f32 %v1100_v61, %v485_v14  ;;  %v477_v22 = vadd.f32 %v778_v15, %v476_v17 }
  0xfa   :  { %v791_v23 = vpop.f32.mrf.mxu0  ;;  %v841_v24 = vpop.f32.mrf.mxu1  ;;  %v790_v46 = vadd.f32 %v789_v16, %v788_v9  ;;  %v733_v9 = vunpack.c.h.bf16 %v752_v37  ;;  %v755_v37 = vld [vmem:[%s1241_s4 + $0x30] sm:$0xff]  }
  0xfb   :  { %v632_v25 = vmax.f32 %v616_v18, 0.0  ;;  %v614_v27 = vadd.f32 %v720_v13, %v566_v19  ;;  %v569_v28 = vadd.f32 %v1108_v1, %v546_v20  ;;  %v544_v30 = vmul.f32 %v1100_v61, %v477_v22  ;;  %v753_v22 = vld [vmem:[%s1241_s4 + $0x20] sm:$0xff]  }
  0xfc   :  { %v792_v32 = vpop.f32.mrf.mxu0  ;;  %v489_v33 = vpop.f32.mrf.mxu1 }
  0xfd   :  { %648 = vst.msk [vmem:[%s1243_s5 + $0x10] sm:$0xff] %vm317_vm0, %v632_v25  ;;  %v630_v34 = vmax.f32 %v614_v27, 0.0  ;;  %v617_v35 = vadd.f32 %v725_v21, %v569_v28  ;;  %v793_v36 = vadd.f32 %v792_v32, %v791_v23  ;;  %v490_v38 = vadd.f32 %v787_v26, %v489_v33 }
  0xfe   :  { %v567_v39 = vadd.f32 %v1108_v1, %v544_v30  ;;  %v794_v41 = vpop.f32.mrf.mxu0  ;;  %v842_v42 = vpop.f32.mrf.mxu1  ;;  %v817_v26 = vadd.f32 %v1091_v53, %v1089_v51  ;;  %v756_v30 = vld [vmem:[%s1241_s4 + $0x38] sm:$0xff]   ;;  %v736_v32 = vunpack.c.l.bf16 %v753_v22  ;;  %v811_v51 = vadd.f32 %v1083_v45, %v1081_v43 }
  0xff   :  { %646 = vst.msk [vmem:[%s1243_s5] sm:$0xff] %vm317_vm0, %v630_v34  ;;  %v633_v44 = vmax.f32 %v617_v35, 0.0  ;;  %v498_v48 = vadd.f32 %v841_v24, %v793_v36  ;;  %v547_v50 = vmul.f32 %v1100_v61, %v490_v38 }
 0x100   :  { %v615_v52 = vadd.f32 %v721_v31, %v567_v39  ;;  %v795_v56 = vpop.f32.mrf.mxu0  ;;  %v492_v58 = vpop.f32.mrf.mxu1  ;;  %v737_v39 = vunpack.c.h.bf16 %v753_v22 }
 0x101   :  { %649 = vst.msk [vmem:[%s1243_s5 + $0x18] sm:$0xff] %vm317_vm0, %v633_v44  ;;  %v549_v59 = vmul.f32 %v1100_v61, %v498_v48  ;;  %v570_v60 = vadd.f32 %v1108_v1, %v547_v50  ;;  %v796_v62 = vadd.f32 %v795_v56, %v794_v41  ;;  %v493_v63 = vadd.f32 %v790_v46, %v492_v58  ;;  %v754_v46 = vld [vmem:[%s1241_s4 + $0x28] sm:$0xff]  }
 0x102   :  { %v631_v0 = vmax.f32 %v615_v52, 0.0  ;;  %v797_v3 = vpop.f32.mrf.mxu0  ;;  %v845_v4 = vpop.f32.mrf.mxu1  ;;  %v820_v50 = vadd.f32 %v1095_v57, %v1093_v55 }
 0x103   :  { %v572_v5 = vadd.f32 %v1108_v1, %v549_v59  ;;  %v618_v6 = vadd.f32 %v728_v40, %v570_v60  ;;  %v501_v7 = vadd.f32 %v842_v42, %v796_v62  ;;  %v548_v8 = vmul.f32 %v1100_v61, %v493_v63 }
 0x104   :  { %647 = vst.msk [vmem:[%s1243_s5 + $0x8] sm:$0xff] %vm317_vm0, %v631_v0  ;;  %v798_v10 = vpop.f32.mrf.mxu0  ;;  %v505_v11 = vpop.f32.mrf.mxu1  ;;  %v748_v40 = vunpack.c.l.bf16 %v756_v30  ;;  %v814_v0 = vadd.f32 %v1087_v49, %v1085_v47 }
 0x105   :  { %v620_v12 = vadd.f32 %v732_v54, %v572_v5  ;;  %v634_v13 = vmax.f32 %v618_v6, 0.0  ;;  %v550_v14 = vmul.f32 %v1100_v61, %v501_v7  ;;  %v571_v15 = vadd.f32 %v1108_v1, %v548_v8 }
 0x106   :  { %v799_v16 = vadd.f32 %v798_v10, %v797_v3  ;;  %v800_v17 = vpop.f32.mrf.mxu0  ;;  %v1150_v18 = vpop.f32.mrf.mxu1  ;;  %v744_v54 = vunpack.c.l.bf16 %v755_v37  ;;  %v740_v3 = vunpack.c.l.bf16 %v754_v46  ;;  %v749_v10 = vunpack.c.h.bf16 %v756_v30 }
 0x107   :  { %v636_v19 = vmax.f32 %v620_v12, 0.0  ;;  %650 = vst.msk [vmem:[%s1243_s5 + $0x20] sm:$0xff] %vm317_vm0, %v634_v13  ;;  %v573_v20 = vadd.f32 %v1108_v1, %v550_v14  ;;  %v619_v21 = vadd.f32 %v729_v2, %v571_v15 }
 0x108   :  { %v506_v23 = vadd.f32 %v799_v16, %v505_v11  ;;  %v801_v24 = vpop.f32.mrf.mxu0  ;;  %v508_v25 = vpop.f32.mrf.mxu1 }
 0x109   :  { %652 = vst.msk [vmem:[%s1243_s5 + $0x30] sm:$0xff] %vm317_vm0, %v636_v19  ;;  %v621_v27 = vadd.f32 %v733_v9, %v573_v20  ;;  %v635_v28 = vmax.f32 %v619_v21, 0.0  ;;  %v802_v29 = vadd.f32 %v801_v24, %v800_v17  ;;  %v745_v19 = vunpack.c.h.bf16 %v755_v37 }
 0x10a   :  { %v551_v31 = vmul.f32 %v1100_v61, %v506_v23  ;;  %v803_v33 = vpop.f32.mrf.mxu0  ;;  %v849_v34 = vpop.f32.mrf.mxu1  ;;  %v741_v24 = vunpack.c.h.bf16 %v754_v46 }
 0x10b   :  { %v637_v53 = vmax.f32 %v621_v27, 0.0  ;;  %651 = vst.msk [vmem:[%s1243_s5 + $0x28] sm:$0xff] %vm317_vm0, %v635_v28  ;;  %v509_v35 = vadd.f32 %v802_v29, %v508_v25  ;;  %v530_v36 = vadd.f32 %v849_v34, %v817_v26 }
 0x10c   :  { %v574_v38 = vadd.f32 %v1108_v1, %v551_v31  ;;  %v804_v41 = vpop.f32.mrf.mxu0  ;;  %v521_v42 = vpop.f32.mrf.mxu1 }
 0x10d   :  { %653 = vst.msk [vmem:[%s1243_s5 + $0x38] sm:$0xff] %vm317_vm0, %v637_v53  ;;  %v552_v43 = vmul.f32 %v1100_v61, %v509_v35  ;;  %v557_v45 = vmul.f32 %v1100_v61, %v530_v36  ;;  %v805_v44 = vadd.f32 %v804_v41, %v803_v33  ;;  %v522_v48 = vadd.f32 %v811_v51, %v521_v42 }
 0x10e   :  { %v622_v52 = vadd.f32 %v736_v32, %v574_v38  ;;  %v806_v56 = vpop.f32.mrf.mxu0  ;;  %v850_v58 = vpop.f32.mrf.mxu1 }
 0x10f   :  { %v575_v59 = vadd.f32 %v1108_v1, %v552_v43  ;;  %v580_v60 = vadd.f32 %v1108_v1, %v557_v45  ;;  %v514_v62 = vadd.f32 %v845_v4, %v805_v44  ;;  %v555_v63 = vmul.f32 %v1100_v61, %v522_v48 }
 0x110   :  { %v638_v2 = vmax.f32 %v622_v52, 0.0  ;;  %v533_v5 = vadd.f32 %v850_v58, %v820_v50  ;;  %v807_v6 = vpop.f32.mrf.mxu0  ;;  %v524_v7 = vpop.f32.mrf.mxu1 }
 0x111   :  { %v623_v55 = vadd.f32 %v737_v39, %v575_v59  ;;  %v628_v57 = vadd.f32 %v748_v40, %v580_v60  ;;  %v553_v8 = vmul.f32 %v1100_v61, %v514_v62  ;;  %v578_v9 = vadd.f32 %v1108_v1, %v555_v63 }
 0x112   :  { %654 = vst.msk [vmem:[%s1243_s5 + $0x40] sm:$0xff] %vm317_vm0, %v638_v2  ;;  %v558_v4 = vmul.f32 %v1100_v61, %v533_v5  ;;  %v808_v47 = vadd.f32 %v807_v6, %v806_v56  ;;  %v525_v49 = vadd.f32 %v814_v0, %v524_v7 }
 0x113   :  { %v639_v11 = vmax.f32 %v623_v55, 0.0  ;;  %v644_v12 = vmax.f32 %v628_v57, 0.0  ;;  %v576_v13 = vadd.f32 %v1108_v1, %v553_v8  ;;  %v626_v14 = vadd.f32 %v744_v54, %v578_v9 }
 0x114   :  { %v581_v15 = vadd.f32 %v1108_v1, %v558_v4  ;;  %v517_v16 = vadd.f32 %v1150_v18, %v808_v47  ;;  %v556_v17 = vmul.f32 %v1100_v61, %v525_v49 }
 0x115   :  { %655 = vst.msk [vmem:[%s1243_s5 + $0x48] sm:$0xff] %vm317_vm0, %v639_v11  ;;  %660 = vst.msk [vmem:[%s1243_s5 + $0x70] sm:$0xff] %vm317_vm0, %v644_v12  ;;  %v624_v20 = vadd.f32 %v740_v3, %v576_v13  ;;  %v642_v21 = vmax.f32 %v626_v14, 0.0 }
 0x116   :  { %v629_v22 = vadd.f32 %v749_v10, %v581_v15  ;;  %v554_v23 = vmul.f32 %v1100_v61, %v517_v16  ;;  %v579_v18 = vadd.f32 %v1108_v1, %v556_v17 }
 0x117   :  { %v640_v25 = vmax.f32 %v624_v20, 0.0  ;;  %658 = vst.msk [vmem:[%s1243_s5 + $0x60] sm:$0xff] %vm317_vm0, %v642_v21 }
 0x118   :  { %v645_v26 = vmax.f32 %v629_v22, 0.0  ;;  %v577_v27 = vadd.f32 %v1108_v1, %v554_v23  ;;  %v627_v28 = vadd.f32 %v745_v19, %v579_v18 }
 0x119   :  { %656 = vst.msk [vmem:[%s1243_s5 + $0x50] sm:$0xff] %vm317_vm0, %v640_v25 }
 0x11a   :  { %661 = vst.msk [vmem:[%s1243_s5 + $0x78] sm:$0xff] %vm317_vm0, %v645_v26  ;;  %v625_v61 = vadd.f32 %v741_v24, %v577_v27  ;;  %v643_v29 = vmax.f32 %v627_v28, 0.0 }
 0x11c   :  { %v641_v30 = vmax.f32 %v625_v61, 0.0  ;;  %659 = vst.msk [vmem:[%s1243_s5 + $0x68] sm:$0xff] %vm317_vm0, %v643_v29 }
 0x11e   :  { %657 = vst.msk [vmem:[%s1243_s5 + $0x58] sm:$0xff] %vm317_vm0, %v641_v30 }

// kernel: resnet_forward.25
= control target key start
LH: loop header
LB: loop body
LE: loop exit
PB: predicated region body
PF: predicated region fallthrough
CT: control target
= control target key end

     0   :  { %vm317_vm0 = vcmask 261120   ;;  %v600_v52 = vlaneseq  ;;  %vm660_vm1 = vcmask 523264   ;;  %s1229_s1 = inlined_call_operand.vmem [shape: bf16[288,64], index: 1, kind: input, shape index: {}]   ;;  %s1230_s0 = inlined_call_operand.vmem [shape: bf16[128,288], index: 0, kind: input, shape index: {}]   ;;  %s1231_s4 = inlined_call_operand.vmem [shape: f32[1,64], index: 4, kind: input, shape index: {}]   ;;  %s1232_s2 = inlined_call_operand.vmem [shape: f32[1,64], index: 2, kind: input, shape index: {}]   ;;  %s1233_s3 = inlined_call_operand.vmem [shape: f32[1,64], index: 3, kind: input, shape index: {}]   ;;  %s1234_s5 = inlined_call_operand.vmem [shape: f32[128,64], index: 5, kind: output, shape index: {}]  }
   0x1   :  { %v843_v0 = vld [vmem:[%s1229_s1 + $0x78] sm:$0xff]   ;;  %v845_v2 = vld [vmem:[%s1229_s1 + $0x70] sm:$0xff]   ;;  %v847_v4 = vld [vmem:[%s1229_s1 + $0x68] sm:$0xff]  }
   0x2   :  { %v844_v1 = vld [vmem:[%s1229_s1 + $0x38] sm:$0xff]   ;;  %733 = vmatprep.subr.bf16.mxu0 %v843_v0  ;;  %827 = vmatprep.subr.bf16.mxu1 %v843_v0  ;;  %v846_v3 = vld [vmem:[%s1229_s1 + $0x30] sm:$0xff]   ;;  %v848_v5 = vld [vmem:[%s1229_s1 + $0x28] sm:$0xff]   ;;  %v601_v57 = vshrl.u32 %v600_v52, 7 }
   0x3   :  { %734 = vmatpush3.bf16.msra.mxu0 %v844_v1  ;;  %835 = vmatpush3.bf16.msra.mxu1 %v844_v1  ;;  %v849_v6 = vld [vmem:[%s1229_s1 + $0x60] sm:$0xff]   ;;  %v851_v8 = vld [vmem:[%s1229_s1 + $0x58] sm:$0xff]   ;;  %v853_v10 = vld [vmem:[%s1229_s1 + $0x50] sm:$0xff]  }
   0x4   :  { %735 = vmatprep.subr.bf16.mxu0 %v845_v2  ;;  %828 = vmatprep.subr.bf16.mxu1 %v845_v2  ;;  %v850_v7 = vld [vmem:[%s1229_s1 + $0x20] sm:$0xff]   ;;  %v852_v9 = vld [vmem:[%s1229_s1 + $0x18] sm:$0xff]   ;;  %v854_v13 = vld [vmem:[%s1229_s1 + $0x10] sm:$0xff]   ;;  %v602_v1 = vsub.s32 0, %v601_v57 }
   0x5   :  { %v861_v11 = vld [vmem:[%s1230_s0 + $0x4] ss:$12 sps:$4 sm:$0xff]   ;;  %v864_v12 = vld [vmem:[%s1230_s0 + $0x94] ss:$12 sps:$4 sm:$0xff]   ;;  %v855_v14 = vld [vmem:[%s1229_s1 + $0x48] sm:$0xff]  }
   0x6   :  { %374 = vmatprep.mubr.bf16.mxu0 %v861_v11  ;;  %422 = vmatprep.mubr.bf16.mxu1 %v864_v12  ;;  %v856_v15 = vld [vmem:[%s1229_s1 + $0x8] sm:$0xff]   ;;  %v857_v16 = vld [vmem:[%s1229_s1 + $0x40] sm:$0xff]   ;;  %v862_v20 = vld [vmem:[%s1230_s0 + $0x90] ss:$12 sps:$4 sm:$0xff]  }
   0x7   :  { %736 = vmatpush3.bf16.msra.mxu0 %v846_v3  ;;  %836 = vmatpush3.bf16.msra.mxu1 %v846_v3  ;;  %v858_v17 = vld [vmem:[%s1229_s1] sm:$0xff]   ;;  %v865_v19 = vld [vmem:[%s1229_s1 + $0x88] sm:$0xff]   ;;  %v876_v28 = vld [vmem:[%s1230_s0 + $0x30] ss:$12 sps:$4 sm:$0xff]  }
   0x8   :  { %737 = vmatprep.subr.bf16.mxu0 %v847_v4  ;;  %829 = vmatprep.subr.bf16.mxu1 %v847_v4  ;;  %v859_v18 = vld [vmem:[%s1230_s0] ss:$12 sps:$4 sm:$0xff]   ;;  %v866_v21 = vld [vmem:[%s1230_s0 + $0x1c] ss:$12 sps:$4 sm:$0xff]   ;;  %v870_v24 = vld [vmem:[%s1230_s0 + $0x18] ss:$12 sps:$4 sm:$0xff]  }
   0x9   :  { %v868_v22 = vld [vmem:[%s1230_s0 + $0xac] ss:$12 sps:$4 sm:$0xff]   ;;  %v872_v23 = vld [vmem:[%s1229_s1 + $0x80] sm:$0xff]   ;;  %v871_v25 = vld [vmem:[%s1230_s0 + $0xa8] ss:$12 sps:$4 sm:$0xff]  }
   0xa   :  { %v873_v26 = vld [vmem:[%s1230_s0 + $0x34] ss:$12 sps:$4 sm:$0xff]   ;;  %v878_v30 = vld [vmem:[%s1230_s0 + $0x4c] ss:$12 sps:$4 sm:$0xff]   ;;  %v882_v33 = vld [vmem:[%s1230_s0 + $0x50] ss:$12 sps:$4 sm:$0xff]  }
   0xb   :  { %738 = vmatpush3.bf16.msra.mxu0 %v848_v5  ;;  %837 = vmatpush3.bf16.msra.mxu1 %v848_v5  ;;  %v875_v27 = vld [vmem:[%s1230_s0 + $0x8] ss:$12 sps:$4 sm:$0xff]   ;;  %v877_v29 = vld [vmem:[%s1230_s0 + $0x20] ss:$12 sps:$4 sm:$0xff]   ;;  %v880_v31 = vld [vmem:[%s1230_s0 + $0x38] ss:$12 sps:$4 sm:$0xff]  }
   0xc   :  { %739 = vmatprep.subr.bf16.mxu0 %v849_v6  ;;  %830 = vmatprep.subr.bf16.mxu1 %v849_v6  ;;  %v881_v32 = vld [vmem:[%s1230_s0 + $0x48] ss:$12 sps:$4 sm:$0xff]   ;;  %v883_v34 = vld [vmem:[%s1230_s0 + $0x64] ss:$12 sps:$4 sm:$0xff]   ;;  %v886_v36 = vld [vmem:[%s1230_s0 + $0x60] ss:$12 sps:$4 sm:$0xff]  }
   0xd   :  { %v885_v35 = vld [vmem:[%s1230_s0 + $0x68] ss:$12 sps:$4 sm:$0xff]   ;;  %v887_v37 = vld [vmem:[%s1230_s0 + $0x80] ss:$12 sps:$4 sm:$0xff]   ;;  %v890_v39 = vld [vmem:[%s1230_s0 + $0x98] ss:$12 sps:$4 sm:$0xff]  }
   0xe   :  { %v888_v38 = vld [vmem:[%s1230_s0 + $0x7c] ss:$12 sps:$4 sm:$0xff]   ;;  %v891_v40 = vld [vmem:[%s1230_s0 + $0x78] ss:$12 sps:$4 sm:$0xff]   ;;  %v582_v58 = vld [vmem:[%s1231_s4] sm:$0x1] }
   0xf   :  { %740 = vmatpush3.bf16.msra.mxu0 %v850_v7  ;;  %838 = vmatpush3.bf16.msra.mxu1 %v850_v7  ;;  %v892_v41 = vld [vmem:[%s1230_s0 + $0xb0] ss:$12 sps:$4 sm:$0xff]   ;;  %v1079_v0 = vld [vmem:[%s1232_s2] ss:$0 sm:$0xff]  ;;  %v621_v2 = vsub.f32 1.0, %v582_v58 }
  0x10   :  { %741 = vmatprep.subr.bf16.mxu0 %v851_v8  ;;  %831 = vmatprep.subr.bf16.mxu1 %v851_v8  ;;  %v1084_v5 = vld [vmem:[%s1233_s3] ss:$0 sm:$0xff] }
  0x11   :  { %v1087_v11 = vrot.slane %v621_v2, %v602_v1 }
  0x13   :  { %742 = vmatpush3.bf16.msra.mxu0 %v852_v9  ;;  %839 = vmatpush3.bf16.msra.mxu1 %v852_v9 }
  0x14   :  { %743 = vmatprep.subr.bf16.mxu0 %v853_v10  ;;  %832 = vmatprep.subr.bf16.mxu1 %v853_v10 }
  0x17   :  { %744 = vmatpush3.bf16.msra.mxu0 %v854_v13  ;;  %840 = vmatpush3.bf16.msra.mxu1 %v854_v13 }
  0x18   :  { %745 = vmatprep.subr.bf16.mxu0 %v855_v14  ;;  %833 = vmatprep.subr.bf16.mxu1 %v855_v14 }
  0x1b   :  { %746 = vmatpush3.bf16.msra.mxu0 %v856_v15  ;;  %841 = vmatpush3.bf16.msra.mxu1 %v856_v15  ;;  %v1090_v15 = vrot.slane %v582_v58, %v602_v1 }
  0x1c   :  { %747 = vmatprep.subr.bf16.mxu0 %v857_v16  ;;  %834 = vmatprep.subr.bf16.mxu1 %v857_v16 }
  0x1f   :  { %748 = vmatpush3.bf16.msra.mxu0 %v858_v17  ;;  %842 = vmatpush3.bf16.msra.mxu1 %v858_v17 }
  0x20   :  { %807 = vmatprep.subr.bf16.mxu1 %v865_v19 }
  0x22   :  { %375 = vmatmul.mubr.bf16.vlgmr.msra.gmra.mxu0 %v859_v18  ;;  %423 = vmatmul.mubr.bf16.vlgmr.msra.gmra.mxu1 %v862_v20 }
  0x23   :  { %808 = vmatpush3.bf16.msra.mxu1 %v865_v19  ;;  %382 = vmatprep.mubr.bf16.mxu0 %v866_v21 }
  0x24   :  { %430 = vmatprep.mubr.bf16.mxu1 %v868_v22  ;;  %809 = vmatprep.subr.bf16.mxu1 %v872_v23 }
  0x27   :  { %810 = vmatpush3.bf16.msra.mxu1 %v872_v23 }
  0x2a   :  { %383 = vmatmul.mubr.bf16.gmra.mxu0 %v870_v24  ;;  %431 = vmatmul.mubr.bf16.gmra.mxu1 %v871_v25 }
  0x2b   :  { %390 = vmatprep.mubr.bf16.mxu0 %v873_v26  ;;  %811 = vmatprep.mubr.msk.bf16.mxu1 %vm317_vm0, %v875_v27 }
  0x32   :  { %391 = vmatmul.mubr.bf16.gmra.mxu0 %v876_v28  ;;  %812 = vmatmul.mubr.msk.bf16.vlgmr.msra.gmra.mxu1 %vm317_vm0, %v877_v29 }
  0x33   :  { %398 = vmatprep.mubr.bf16.mxu0 %v878_v30  ;;  %815 = vmatprep.mubr.msk.bf16.mxu1 %vm317_vm0, %v880_v31 }
  0x3a   :  { %399 = vmatmul.mubr.bf16.gmra.mxu0 %v881_v32  ;;  %816 = vmatmul.mubr.msk.bf16.gmra.mxu1 %vm317_vm0, %v882_v33 }
  0x3b   :  { %406 = vmatprep.mubr.bf16.mxu0 %v883_v34  ;;  %819 = vmatprep.mubr.msk.bf16.mxu1 %vm317_vm0, %v885_v35 }
  0x42   :  { %407 = vmatmul.mubr.bf16.gmra.mxu0 %v886_v36  ;;  %820 = vmatmul.mubr.msk.bf16.gmra.mxu1 %vm317_vm0, %v887_v37 }
  0x43   :  { %414 = vmatprep.mubr.bf16.mxu0 %v888_v38  ;;  %823 = vmatprep.mubr.msk.bf16.mxu1 %vm317_vm0, %v890_v39 }
  0x4a   :  { %415 = vmatmul.mubr.bf16.gmra.mxu0 %v891_v40  ;;  %824 = vmatmul.mubr.msk.bf16.gmra.mxu1 %vm317_vm0, %v892_v41 }
  0xe2   :  { %v749_v42 = vpop.f32.mrf.mxu0  ;;  %v1057_v43 = vpop.f32.mrf.mxu1 }
  0xe4   :  { %v750_v44 = vpop.f32.mrf.mxu0  ;;  %v1059_v45 = vpop.f32.mrf.mxu1 }
  0xe5   :  { %v751_v3 = vadd.f32 %v750_v44, %v749_v42 }
  0xe6   :  { %v752_v46 = vpop.f32.mrf.mxu0  ;;  %v1061_v47 = vpop.f32.mrf.mxu1 }
  0xe8   :  { %v753_v48 = vpop.f32.mrf.mxu0  ;;  %v1063_v49 = vpop.f32.mrf.mxu1 }
  0xe9   :  { %v754_v18 = vadd.f32 %v753_v48, %v752_v46 }
  0xea   :  { %v755_v50 = vpop.f32.mrf.mxu0  ;;  %v1065_v51 = vpop.f32.mrf.mxu1 }
  0xec   :  { %v756_v53 = vpop.f32.mrf.mxu0  ;;  %v1067_v54 = vpop.f32.mrf.mxu1 }
  0xed   :  { %v757_v61 = vadd.f32 %v756_v53, %v755_v50 }
  0xee   :  { %v758_v55 = vpop.f32.mrf.mxu0  ;;  %v1069_v56 = vpop.f32.mrf.mxu1 }
  0xf0   :  { %v759_v59 = vpop.f32.mrf.mxu0  ;;  %v1074_v60 = vpop.f32.mrf.mxu1 }
  0xf1   :  { %v760_v8 = vadd.f32 %v759_v59, %v758_v55 }
  0xf2   :  { %v761_v62 = vpop.f32.mrf.mxu0  ;;  %v813_v63 = vpop.f32.mrf.mxu1 }
  0xf3   :  { %v482_v4 = vadd.f32 %v813_v63, %v757_v61 }
  0xf4   :  { %v762_v6 = vpop.f32.mrf.mxu0  ;;  %v473_v7 = vpop.f32.mrf.mxu1 }
  0xf5   :  { %v545_v9 = vmul.f32 %v1079_v0, %v482_v4  ;;  %v474_v10 = vadd.f32 %v751_v3, %v473_v7  ;;  %v763_v31 = vadd.f32 %v762_v6, %v761_v62 }
  0xf6   :  { %v764_v12 = vpop.f32.mrf.mxu0  ;;  %v814_v13 = vpop.f32.mrf.mxu1 }
  0xf7   :  { %v568_v14 = vadd.f32 %v1084_v5, %v545_v9  ;;  %v543_v16 = vmul.f32 %v1079_v0, %v474_v10  ;;  %v485_v17 = vadd.f32 %v814_v13, %v760_v8 }
  0xf8   :  { %v765_v19 = vpop.f32.mrf.mxu0  ;;  %v476_v20 = vpop.f32.mrf.mxu1 }
  0xf9   :  { %v585_v21 = vmax.f32 %v568_v14, 0.0  ;;  %v566_v22 = vadd.f32 %v1084_v5, %v543_v16  ;;  %v546_v23 = vmul.f32 %v1079_v0, %v485_v17  ;;  %v477_v24 = vadd.f32 %v754_v18, %v476_v20 }
  0xfa   :  { %v767_v25 = vpop.f32.mrf.mxu0  ;;  %v817_v26 = vpop.f32.mrf.mxu1  ;;  %v630_v28 = vmul.f32 %v1087_v11, %v568_v14  ;;  %v766_v52 = vadd.f32 %v765_v19, %v764_v12 }
  0xfb   :  { %v607_v27 = vmul.f32 %v1090_v15, %v585_v21  ;;  %v583_v29 = vmax.f32 %v566_v22, 0.0  ;;  %v569_v30 = vadd.f32 %v1084_v5, %v546_v23  ;;  %v544_v32 = vmul.f32 %v1079_v0, %v477_v24 }
  0xfc   :  { %v768_v33 = vpop.f32.mrf.mxu0  ;;  %v489_v34 = vpop.f32.mrf.mxu1  ;;  %v628_v37 = vmul.f32 %v1087_v11, %v566_v22 }
  0xfd   :  { %v646_v35 = vadd.f32 %v630_v28, %v607_v27  ;;  %v605_v36 = vmul.f32 %v1090_v15, %v583_v29  ;;  %v586_v38 = vmax.f32 %v569_v30, 0.0  ;;  %v567_v39 = vadd.f32 %v1084_v5, %v544_v32 }
  0xfe   :  { %v769_v40 = vadd.f32 %v768_v33, %v767_v25  ;;  %v490_v41 = vadd.f32 %v763_v31, %v489_v34  ;;  %v770_v42 = vpop.f32.mrf.mxu0  ;;  %v818_v44 = vpop.f32.mrf.mxu1  ;;  %v631_v50 = vmul.f32 %v1087_v11, %v569_v30  ;;  %v793_v28 = vadd.f32 %v1067_v54, %v1065_v51 }
  0xff   :  { %663 = vst.msk [vmem:[%s1234_s5 + $0x10] sm:$0xff] %vm660_vm1, %v646_v35  ;;  %v644_v46 = vadd.f32 %v628_v37, %v605_v36  ;;  %v608_v48 = vmul.f32 %v1090_v15, %v586_v38  ;;  %v584_v53 = vmax.f32 %v567_v39, 0.0  ;;  %v629_v2 = vmul.f32 %v1087_v11, %v567_v39 }
 0x100   :  { %v498_v55 = vadd.f32 %v817_v26, %v769_v40  ;;  %v547_v57 = vmul.f32 %v1079_v0, %v490_v41  ;;  %v771_v58 = vpop.f32.mrf.mxu0  ;;  %v492_v59 = vpop.f32.mrf.mxu1 }
 0x101   :  { %661 = vst.msk [vmem:[%s1234_s5] sm:$0xff] %vm660_vm1, %v644_v46  ;;  %v647_v61 = vadd.f32 %v631_v50, %v608_v48  ;;  %v772_v62 = vadd.f32 %v771_v58, %v770_v42  ;;  %v493_v63 = vadd.f32 %v766_v52, %v492_v59  ;;  %v606_v1 = vmul.f32 %v1090_v15, %v584_v53 }
 0x102   :  { %v549_v3 = vmul.f32 %v1079_v0, %v498_v55  ;;  %v570_v4 = vadd.f32 %v1084_v5, %v547_v57  ;;  %v773_v6 = vpop.f32.mrf.mxu0  ;;  %v821_v7 = vpop.f32.mrf.mxu1  ;;  %v787_v48 = vadd.f32 %v1059_v45, %v1057_v43  ;;  %v796_v55 = vadd.f32 %v1074_v60, %v1069_v56 }
 0x103   :  { %664 = vst.msk [vmem:[%s1234_s5 + $0x18] sm:$0xff] %vm660_vm1, %v647_v61  ;;  %v501_v8 = vadd.f32 %v818_v44, %v772_v62  ;;  %v548_v9 = vmul.f32 %v1079_v0, %v493_v63  ;;  %v645_v10 = vadd.f32 %v629_v2, %v606_v1 }
 0x104   :  { %v572_v12 = vadd.f32 %v1084_v5, %v549_v3  ;;  %v587_v13 = vmax.f32 %v570_v4, 0.0  ;;  %v774_v14 = vpop.f32.mrf.mxu0  ;;  %v505_v16 = vpop.f32.mrf.mxu1  ;;  %v632_v22 = vmul.f32 %v1087_v11, %v570_v4 }
 0x105   :  { %v550_v17 = vmul.f32 %v1079_v0, %v501_v8  ;;  %v571_v18 = vadd.f32 %v1084_v5, %v548_v9  ;;  %v775_v19 = vadd.f32 %v774_v14, %v773_v6  ;;  %662 = vst.msk [vmem:[%s1234_s5 + $0x8] sm:$0xff] %vm660_vm1, %v645_v10  ;;  %v790_v10 = vadd.f32 %v1063_v49, %v1061_v47 }
 0x106   :  { %v589_v20 = vmax.f32 %v572_v12, 0.0  ;;  %v609_v21 = vmul.f32 %v1090_v15, %v587_v13  ;;  %v776_v23 = vpop.f32.mrf.mxu0  ;;  %v1131_v24 = vpop.f32.mrf.mxu1  ;;  %v634_v30 = vmul.f32 %v1087_v11, %v572_v12 }
 0x107   :  { %v573_v25 = vadd.f32 %v1084_v5, %v550_v17  ;;  %v588_v26 = vmax.f32 %v571_v18, 0.0  ;;  %v506_v27 = vadd.f32 %v775_v19, %v505_v16  ;;  %v633_v36 = vmul.f32 %v1087_v11, %v571_v18 }
 0x108   :  { %v611_v29 = vmul.f32 %v1090_v15, %v589_v20  ;;  %v648_v31 = vadd.f32 %v632_v22, %v609_v21  ;;  %v777_v32 = vpop.f32.mrf.mxu0  ;;  %v508_v33 = vpop.f32.mrf.mxu1 }
 0x109   :  { %v590_v34 = vmax.f32 %v573_v25, 0.0  ;;  %v610_v35 = vmul.f32 %v1090_v15, %v588_v26  ;;  %v551_v37 = vmul.f32 %v1079_v0, %v506_v27  ;;  %v635_v51 = vmul.f32 %v1087_v11, %v573_v25 }
 0x10a   :  { %v650_v38 = vadd.f32 %v634_v30, %v611_v29  ;;  %665 = vst.msk [vmem:[%s1234_s5 + $0x20] sm:$0xff] %vm660_vm1, %v648_v31  ;;  %v778_v54 = vadd.f32 %v777_v32, %v776_v23  ;;  %v779_v39 = vpop.f32.mrf.mxu0  ;;  %v825_v40 = vpop.f32.mrf.mxu1 }
 0x10b   :  { %v612_v41 = vmul.f32 %v1090_v15, %v590_v34  ;;  %v649_v42 = vadd.f32 %v633_v36, %v610_v35  ;;  %v574_v44 = vadd.f32 %v1084_v5, %v551_v37  ;;  %v530_v46 = vadd.f32 %v825_v40, %v793_v28 }
 0x10c   :  { %667 = vst.msk [vmem:[%s1234_s5 + $0x30] sm:$0xff] %vm660_vm1, %v650_v38  ;;  %v509_v50 = vadd.f32 %v778_v54, %v508_v33  ;;  %v780_v52 = vpop.f32.mrf.mxu0  ;;  %v521_v53 = vpop.f32.mrf.mxu1 }
 0x10d   :  { %v651_v57 = vadd.f32 %v635_v51, %v612_v41  ;;  %666 = vst.msk [vmem:[%s1234_s5 + $0x28] sm:$0xff] %vm660_vm1, %v649_v42  ;;  %v591_v58 = vmax.f32 %v574_v44, 0.0  ;;  %v557_v43 = vmul.f32 %v1079_v0, %v530_v46  ;;  %v781_v59 = vadd.f32 %v780_v52, %v779_v39 }
 0x10e   :  { %v552_v45 = vmul.f32 %v1079_v0, %v509_v50  ;;  %v522_v61 = vadd.f32 %v787_v48, %v521_v53  ;;  %v782_v62 = vpop.f32.mrf.mxu0  ;;  %v826_v63 = vpop.f32.mrf.mxu1  ;;  %v636_v60 = vmul.f32 %v1087_v11, %v574_v44 }
 0x10f   :  { %668 = vst.msk [vmem:[%s1234_s5 + $0x38] sm:$0xff] %vm660_vm1, %v651_v57  ;;  %v613_v56 = vmul.f32 %v1090_v15, %v591_v58  ;;  %v580_v1 = vadd.f32 %v1084_v5, %v557_v43  ;;  %v533_v2 = vadd.f32 %v826_v63, %v796_v55  ;;  %v514_v4 = vadd.f32 %v821_v7, %v781_v59 }
 0x110   :  { %v575_v3 = vadd.f32 %v1084_v5, %v552_v45  ;;  %v555_v6 = vmul.f32 %v1079_v0, %v522_v61  ;;  %v783_v8 = vpop.f32.mrf.mxu0  ;;  %v524_v9 = vpop.f32.mrf.mxu1 }
 0x111   :  { %v652_v12 = vadd.f32 %v636_v60, %v613_v56  ;;  %v597_v13 = vmax.f32 %v580_v1, 0.0  ;;  %v558_v14 = vmul.f32 %v1079_v0, %v533_v2  ;;  %v642_v17 = vmul.f32 %v1087_v11, %v580_v1 }
 0x112   :  { %v592_v16 = vmax.f32 %v575_v3, 0.0  ;;  %v553_v18 = vmul.f32 %v1079_v0, %v514_v4  ;;  %v578_v19 = vadd.f32 %v1084_v5, %v555_v6  ;;  %v784_v49 = vadd.f32 %v783_v8, %v782_v62 }
 0x113   :  { %669 = vst.msk [vmem:[%s1234_s5 + $0x40] sm:$0xff] %vm660_vm1, %v652_v12  ;;  %v619_v7 = vmul.f32 %v1090_v15, %v597_v13  ;;  %v581_v47 = vadd.f32 %v1084_v5, %v558_v14  ;;  %v525_v20 = vadd.f32 %v790_v10, %v524_v9  ;;  %v637_v22 = vmul.f32 %v1087_v11, %v575_v3 }
 0x114   :  { %v614_v21 = vmul.f32 %v1090_v15, %v592_v16  ;;  %v576_v23 = vadd.f32 %v1084_v5, %v553_v18  ;;  %v595_v25 = vmax.f32 %v578_v19, 0.0  ;;  %v517_v28 = vadd.f32 %v1131_v24, %v784_v49 }
 0x115   :  { %v658_v26 = vadd.f32 %v642_v17, %v619_v7  ;;  %v598_v27 = vmax.f32 %v581_v47, 0.0  ;;  %v640_v32 = vmul.f32 %v1087_v11, %v578_v19  ;;  %v643_v34 = vmul.f32 %v1087_v11, %v581_v47 }
 0x116   :  { %v653_v29 = vadd.f32 %v637_v22, %v614_v21  ;;  %v593_v30 = vmax.f32 %v576_v23, 0.0  ;;  %v617_v31 = vmul.f32 %v1090_v15, %v595_v25  ;;  %v554_v35 = vmul.f32 %v1079_v0, %v517_v28 }
 0x117   :  { %675 = vst.msk [vmem:[%s1234_s5 + $0x70] sm:$0xff] %vm660_vm1, %v658_v26  ;;  %v620_v33 = vmul.f32 %v1090_v15, %v598_v27  ;;  %v556_v36 = vmul.f32 %v1079_v0, %v525_v20  ;;  %v638_v37 = vmul.f32 %v1087_v11, %v576_v23 }
 0x118   :  { %670 = vst.msk [vmem:[%s1234_s5 + $0x48] sm:$0xff] %vm660_vm1, %v653_v29  ;;  %v615_v24 = vmul.f32 %v1090_v15, %v593_v30  ;;  %v656_v38 = vadd.f32 %v640_v32, %v617_v31  ;;  %v577_v54 = vadd.f32 %v1084_v5, %v554_v35 }
 0x119   :  { %v659_v51 = vadd.f32 %v643_v34, %v620_v33  ;;  %v579_v39 = vadd.f32 %v1084_v5, %v556_v36 }
 0x11a   :  { %v654_v40 = vadd.f32 %v638_v37, %v615_v24  ;;  %673 = vst.msk [vmem:[%s1234_s5 + $0x60] sm:$0xff] %vm660_vm1, %v656_v38  ;;  %v594_v0 = vmax.f32 %v577_v54, 0.0  ;;  %v639_v42 = vmul.f32 %v1087_v11, %v577_v54 }
 0x11b   :  { %676 = vst.msk [vmem:[%s1234_s5 + $0x78] sm:$0xff] %vm660_vm1, %v659_v51  ;;  %v596_v41 = vmax.f32 %v579_v39, 0.0  ;;  %v641_v46 = vmul.f32 %v1087_v11, %v579_v39 }
 0x11c   :  { %671 = vst.msk [vmem:[%s1234_s5 + $0x50] sm:$0xff] %vm660_vm1, %v654_v40  ;;  %v616_v5 = vmul.f32 %v1090_v15, %v594_v0 }
 0x11d   :  { %v618_v44 = vmul.f32 %v1090_v15, %v596_v41 }
 0x11e   :  { %v655_v48 = vadd.f32 %v639_v42, %v616_v5 }
 0x11f   :  { %v657_v50 = vadd.f32 %v641_v46, %v618_v44 }
 0x120   :  { %672 = vst.msk [vmem:[%s1234_s5 + $0x58] sm:$0xff] %vm660_vm1, %v655_v48 }
 0x121   :  { %674 = vst.msk [vmem:[%s1234_s5 + $0x68] sm:$0xff] %vm660_vm1, %v657_v50 }

// kernel: resnet_forward.31
= control target key start
LH: loop header
LB: loop body
LE: loop exit
PB: predicated region body
PF: predicated region fallthrough
CT: control target
= control target key end

     0   :  { %v223_v28 = vlaneseq  ;;  %v1593_v36 = vmov 1966171168   ;;  %s1949_s0 = inlined_call_operand.vmem [shape: bf16[2,1568], index: 0, kind: input, shape index: {}]   ;;  %s1950_s1 = inlined_call_operand.vmem [shape: bf16[1568,8], index: 1, kind: input, shape index: {}]   ;;  %s1951_s2 = inlined_call_operand.vmem [shape: f32[1,8], index: 2, kind: input, shape index: {}]   ;;  %s1952_s3 = inlined_call_operand.vmem [shape: f32[1,8], index: 3, kind: input, shape index: {}]   ;;  %s1953_s4 = inlined_call_operand.hbm [shape: f32[2,8], index: 4, kind: output, shape index: {}]  }
   0x1   :  { %v1471_v0 = vld [vmem:[%s1950_s1 + $0x78] sm:$0xff]   ;;  %v1475_v4 = vld [vmem:[%s1950_s1 + $0x70] sm:$0xff]   ;;  %v1479_v8 = vld [vmem:[%s1950_s1 + $0x68] sm:$0xff]   ;;  %v221_v37 = vunpack.c.l.s4 %v1593_v36 }
   0x2   :  { %v1472_v1 = vld [vmem:[%s1950_s1 + $0xf8] sm:$0xff]   ;;  %1324 = vmatprep.subr.bf16.mxu0 %v1471_v0  ;;  %v1476_v5 = vld [vmem:[%s1950_s1 + $0xf0] sm:$0xff]   ;;  %v1480_v9 = vld [vmem:[%s1950_s1 + $0xe8] sm:$0xff]   ;;  %v224_v33 = vshrl.u32 %v223_v28, 7 }
   0x3   :  { %v1473_v2 = vld [vmem:[%s1950_s1 + $0x38] sm:$0xff]   ;;  %1346 = vmatprep.subr.bf16.mxu1 %v1472_v1  ;;  %v1477_v6 = vld [vmem:[%s1950_s1 + $0x30] sm:$0xff]   ;;  %v1481_v10 = vld [vmem:[%s1950_s1 + $0x28] sm:$0xff]   ;;  %v222_v40 = vunpack.c.0.s8 %v221_v37 }
   0x4   :  { %v1474_v3 = vld [vmem:[%s1950_s1 + $0xb8] sm:$0xff]   ;;  %1325 = vmatpush3.bf16.msra.mxu0 %v1473_v2  ;;  %v1478_v7 = vld [vmem:[%s1950_s1 + $0xb0] sm:$0xff]   ;;  %v1482_v11 = vld [vmem:[%s1950_s1 + $0xa8] sm:$0xff]  }
   0x5   :  { %1347 = vmatpush3.bf16.msra.mxu1 %v1474_v3  ;;  %1326 = vmatprep.subr.bf16.mxu0 %v1475_v4  ;;  %v1483_v12 = vld [vmem:[%s1950_s1 + $0x60] sm:$0xff]   ;;  %v1487_v16 = vld [vmem:[%s1950_s1 + $0x58] sm:$0xff]   ;;  %v1491_v20 = vld [vmem:[%s1950_s1 + $0x50] sm:$0xff]   ;;  %v1727_v41 = vsub.s32 %v222_v40, %v224_v33 }
   0x6   :  { %1348 = vmatprep.subr.bf16.mxu1 %v1476_v5  ;;  %v1484_v13 = vld [vmem:[%s1950_s1 + $0xe0] sm:$0xff]   ;;  %v1488_v17 = vld [vmem:[%s1950_s1 + $0xd8] sm:$0xff]   ;;  %v1492_v21 = vld [vmem:[%s1950_s1 + $0xd0] sm:$0xff]  }
   0x7   :  { %v1485_v14 = vld [vmem:[%s1950_s1 + $0x20] sm:$0xff]   ;;  %v1489_v18 = vld [vmem:[%s1950_s1 + $0x18] sm:$0xff]   ;;  %v1493_v22 = vld [vmem:[%s1950_s1 + $0x10] sm:$0xff]  }
   0x8   :  { %1327 = vmatpush3.bf16.msra.mxu0 %v1477_v6  ;;  %v1486_v15 = vld [vmem:[%s1950_s1 + $0xa0] sm:$0xff]   ;;  %v1490_v19 = vld [vmem:[%s1950_s1 + $0x98] sm:$0xff]   ;;  %v1494_v23 = vld [vmem:[%s1950_s1 + $0x90] sm:$0xff]  }
   0x9   :  { %1349 = vmatpush3.bf16.msra.mxu1 %v1478_v7  ;;  %1328 = vmatprep.subr.bf16.mxu0 %v1479_v8  ;;  %v1495_v24 = vld [vmem:[%s1950_s1 + $0x48] sm:$0xff]   ;;  %v1499_v29 = vld [vmem:[%s1950_s1 + $0x40] sm:$0xff]   ;;  %v1504_v35 = vld [vmem:[%s1950_s1 + $0x178] sm:$0xff]  }
   0xa   :  { %1350 = vmatprep.subr.bf16.mxu1 %v1480_v9  ;;  %v1496_v25 = vld [vmem:[%s1950_s1 + $0xc8] sm:$0xff]   ;;  %v1500_v30 = vld [vmem:[%s1950_s1 + $0xc0] sm:$0xff]   ;;  %v1505_v38 = vld [vmem:[%s1950_s1 + $0x1f8] sm:$0xff]  }
   0xb   :  { %v1497_v26 = vld [vmem:[%s1950_s1 + $0x8] sm:$0xff]   ;;  %v1501_v31 = vld [vmem:[%s1950_s1] sm:$0xff]   ;;  %v1506_v48 = vld [vmem:[%s1950_s1 + $0x138] sm:$0xff]  }
   0xc   :  { %1329 = vmatpush3.bf16.msra.mxu0 %v1481_v10  ;;  %v1498_v27 = vld [vmem:[%s1950_s1 + $0x88] sm:$0xff]   ;;  %v1502_v32 = vld [vmem:[%s1950_s1 + $0x80] sm:$0xff]   ;;  %v1508_v51 = vld [vmem:[%s1950_s1 + $0x170] sm:$0xff]  }
   0xd   :  { %1351 = vmatpush3.bf16.msra.mxu1 %v1482_v11  ;;  %1330 = vmatprep.subr.bf16.mxu0 %v1483_v12  ;;  %v19_v34 = vld [vmem:[%s1949_s0] sm:$0xff]  ;;  %v1507_v53 = vld [vmem:[%s1950_s1 + $0x1b8] sm:$0xff]   ;;  %v1509_v54 = vld [vmem:[%s1950_s1 + $0x1f0] sm:$0xff]  }
   0xe   :  { %1352 = vmatprep.subr.bf16.mxu1 %v1484_v13  ;;  %v219_v39 = vcombine.high %v19_v34, %v19_v34  ;;  %v226_v42 = vrot.slane %v19_v34, %v1727_v41  ;;  %v1510_v56 = vld [vmem:[%s1950_s1 + $0x130] sm:$0xff]   ;;  %v1512_v57 = vld [vmem:[%s1950_s1 + $0x168] sm:$0xff]   ;;  %v1516_v61 = vld [vmem:[%s1950_s1 + $0x160] sm:$0xff]  }
   0xf   :  { %v1511_v58 = vld [vmem:[%s1950_s1 + $0x1b0] sm:$0xff]   ;;  %v1513_v59 = vld [vmem:[%s1950_s1 + $0x1e8] sm:$0xff]   ;;  %v1517_v63 = vld [vmem:[%s1950_s1 + $0x1e0] sm:$0xff]  }
  0x10   :  { %1331 = vmatpush3.bf16.msra.mxu0 %v1485_v14  ;;  %v1731_v43 = vrot.slane %v219_v39, %v1727_v41  ;;  %v234_v44 = vcombine.high %v226_v42, %v226_v42  ;;  %v242_v45 = vrot.slane %v226_v42, %v1727_v41  ;;  %v1514_v60 = vld [vmem:[%s1950_s1 + $0x128] sm:$0xff]   ;;  %v1518_v0 = vld [vmem:[%s1950_s1 + $0x120] sm:$0xff]   ;;  %v1520_v1 = vld [vmem:[%s1950_s1 + $0x158] sm:$0xff]  }
  0x11   :  { %1353 = vmatpush3.bf16.msra.mxu1 %v1486_v15  ;;  %1332 = vmatprep.subr.bf16.mxu0 %v1487_v16  ;;  %v1515_v62 = vld [vmem:[%s1950_s1 + $0x1a8] sm:$0xff]   ;;  %v1519_v2 = vld [vmem:[%s1950_s1 + $0x1a0] sm:$0xff]   ;;  %v1521_v3 = vld [vmem:[%s1950_s1 + $0x1d8] sm:$0xff]  }
  0x12   :  { %1354 = vmatprep.subr.bf16.mxu1 %v1488_v17  ;;  %v235_v46 = vcombine.high %v1731_v43, %v1731_v43  ;;  %v256_v47 = vrot.slane %v234_v44, %v1727_v41  ;;  %v264_v50 = vcombine.high %v242_v45, %v242_v45  ;;  %v1522_v4 = vld [vmem:[%s1950_s1 + $0x118] sm:$0xff]   ;;  %v1524_v5 = vld [vmem:[%s1950_s1 + $0x150] sm:$0xff]   ;;  %v1528_v9 = vld [vmem:[%s1950_s1 + $0x148] sm:$0xff]   ;;  %v249_v17 = vrot.slane %v1731_v43, %v1727_v41 }
  0x13   :  { %v1523_v6 = vld [vmem:[%s1950_s1 + $0x198] sm:$0xff]   ;;  %v1525_v7 = vld [vmem:[%s1950_s1 + $0x1d0] sm:$0xff]   ;;  %v1529_v11 = vld [vmem:[%s1950_s1 + $0x1c8] sm:$0xff]  }
  0x14   :  { %1333 = vmatpush3.bf16.msra.mxu0 %v1489_v18  ;;  %v263_v49 = vrot.slane %v235_v46, %v1727_v41  ;;  %943 = vmatprep.mubr.bf16.mxu0 %v256_v47  ;;  %v266_v52 = vcombine.high %v256_v47, %v256_v47  ;;  %v1526_v8 = vld [vmem:[%s1950_s1 + $0x110] sm:$0xff]   ;;  %v1530_v12 = vld [vmem:[%s1950_s1 + $0x108] sm:$0xff]   ;;  %v1532_v13 = vld [vmem:[%s1950_s1 + $0x140] sm:$0xff]  }
  0x15   :  { %1355 = vmatpush3.bf16.msra.mxu1 %v1490_v19  ;;  %1334 = vmatprep.subr.bf16.mxu0 %v1491_v20  ;;  %v1527_v10 = vld [vmem:[%s1950_s1 + $0x190] sm:$0xff]   ;;  %v1531_v14 = vld [vmem:[%s1950_s1 + $0x188] sm:$0xff]   ;;  %v1533_v15 = vld [vmem:[%s1950_s1 + $0x1c0] sm:$0xff]  }
  0x16   :  { %1356 = vmatprep.subr.bf16.mxu1 %v1492_v21  ;;  %v267_v55 = vcombine.high %v263_v49, %v263_v49  ;;  %983 = vmatprep.mubr.bf16.mxu1 %v266_v52  ;;  %v1534_v16 = vld [vmem:[%s1950_s1 + $0x100] sm:$0xff]   ;;  %v1536_v18 = vld [vmem:[%s1950_s1 + $0x278] sm:$0xff]   ;;  %v1543_v28 = vld [vmem:[%s1950_s1 + $0x2b0] sm:$0xff]  }
  0x17   :  { %v1535_v19 = vld [vmem:[%s1950_s1 + $0x180] sm:$0xff]   ;;  %v1537_v20 = vld [vmem:[%s1950_s1 + $0x2f8] sm:$0xff]   ;;  %v1556_v39 = vld [vmem:[%s1950_s1 + $0x250] sm:$0xff]  }
  0x18   :  { %1335 = vmatpush3.bf16.msra.mxu0 %v1493_v22  ;;  %v1538_v21 = vld [vmem:[%s1950_s1 + $0x238] sm:$0xff]   ;;  %v265_v22 = vcombine.high %v249_v17, %v249_v17  ;;  %v1549_v33 = vld [vmem:[%s1950_s1 + $0x2e0] sm:$0xff]   ;;  %v1557_v42 = vld [vmem:[%s1950_s1 + $0x2d0] sm:$0xff]  }
  0x19   :  { %1357 = vmatpush3.bf16.msra.mxu1 %v1494_v23  ;;  %1336 = vmatprep.subr.bf16.mxu0 %v1495_v24  ;;  %v1540_v23 = vld [vmem:[%s1950_s1 + $0x270] sm:$0xff]   ;;  %v1539_v24 = vld [vmem:[%s1950_s1 + $0x2b8] sm:$0xff]   ;;  %v1550_v34 = vld [vmem:[%s1950_s1 + $0x220] sm:$0xff]  }
  0x1a   :  { %1358 = vmatprep.subr.bf16.mxu1 %v1496_v25  ;;  %v1541_v25 = vld [vmem:[%s1950_s1 + $0x2f0] sm:$0xff]   ;;  %v1551_v36 = vld [vmem:[%s1950_s1 + $0x2a0] sm:$0xff]   ;;  %v1553_v37 = vld [vmem:[%s1950_s1 + $0x2d8] sm:$0xff]  }
  0x1b   :  { %v1555_v40 = vld [vmem:[%s1950_s1 + $0x298] sm:$0xff]   ;;  %v1558_v43 = vld [vmem:[%s1950_s1 + $0x210] sm:$0xff]   ;;  %v1560_v44 = vld [vmem:[%s1950_s1 + $0x248] sm:$0xff]  }
  0x1c   :  { %1337 = vmatpush3.bf16.msra.mxu0 %v1497_v26  ;;  %v1542_v26 = vld [vmem:[%s1950_s1 + $0x230] sm:$0xff]  }
  0x1d   :  { %1359 = vmatpush3.bf16.msra.mxu1 %v1498_v27  ;;  %1338 = vmatprep.subr.bf16.mxu0 %v1499_v29  ;;  %v1544_v27 = vld [vmem:[%s1950_s1 + $0x268] sm:$0xff]   ;;  %v1559_v46 = vld [vmem:[%s1950_s1 + $0x290] sm:$0xff]  }
  0x1e   :  { %1360 = vmatprep.subr.bf16.mxu1 %v1500_v30  ;;  %v1545_v29 = vld [vmem:[%s1950_s1 + $0x2e8] sm:$0xff]  }
  0x1f   :  { %v1546_v30 = vld [vmem:[%s1950_s1 + $0x228] sm:$0xff]  }
  0x20   :  { %1339 = vmatpush3.bf16.msra.mxu0 %v1501_v31  ;;  %v1548_v31 = vld [vmem:[%s1950_s1 + $0x260] sm:$0xff]  }
  0x21   :  { %1361 = vmatpush3.bf16.msra.mxu1 %v1502_v32  ;;  %1368 = vmatprep.subr.bf16.mxu0 %v1504_v35  ;;  %v1547_v32 = vld [vmem:[%s1950_s1 + $0x2a8] sm:$0xff]   ;;  %v1552_v35 = vld [vmem:[%s1950_s1 + $0x258] sm:$0xff]  }
  0x22   :  { %1390 = vmatprep.subr.bf16.mxu1 %v1505_v38  ;;  %v1554_v38 = vld [vmem:[%s1950_s1 + $0x218] sm:$0xff]  }
  0x23   :  { %944 = vmatmul.mubr.bf16.vlgmr.msra.gmra.mxu0 %v242_v45  ;;  %v20_v45 = vld [vmem:[%s1949_s0 + $0x8] sm:$0x1f] }
  0x24   :  { %1369 = vmatpush3.bf16.msra.mxu0 %v1506_v48  ;;  %984 = vmatmul.mubr.bf16.vlgmr.msra.gmra.mxu1 %v264_v50  ;;  %v275_v47 = vrot.slane %v20_v45, %v1727_v41  ;;  %v1561_v48 = vld [vmem:[%s1950_s1 + $0x2c8] sm:$0xff]  }
  0x25   :  { %1370 = vmatprep.subr.bf16.mxu0 %v1508_v51  ;;  %1391 = vmatpush3.bf16.msra.mxu1 %v1507_v53 }
  0x26   :  { %1023 = vmatprep.mubr.bf16.mxu0 %v263_v49  ;;  %1392 = vmatprep.subr.bf16.mxu1 %v1509_v54 }
  0x27   :  { %1063 = vmatprep.mubr.bf16.mxu1 %v267_v55 }
  0x28   :  { %1371 = vmatpush3.bf16.msra.mxu0 %v1510_v56 }
  0x29   :  { %1372 = vmatprep.subr.bf16.mxu0 %v1512_v57  ;;  %1393 = vmatpush3.bf16.msra.mxu1 %v1511_v58 }
  0x2a   :  { %1394 = vmatprep.subr.bf16.mxu1 %v1513_v59 }
  0x2c   :  { %1373 = vmatpush3.bf16.msra.mxu0 %v1514_v60 }
  0x2d   :  { %1374 = vmatprep.subr.bf16.mxu0 %v1516_v61  ;;  %1395 = vmatpush3.bf16.msra.mxu1 %v1515_v62 }
  0x2e   :  { %1396 = vmatprep.subr.bf16.mxu1 %v1517_v63 }
  0x30   :  { %1375 = vmatpush3.bf16.msra.mxu0 %v1518_v0 }
  0x31   :  { %1376 = vmatprep.subr.bf16.mxu0 %v1520_v1  ;;  %1397 = vmatpush3.bf16.msra.mxu1 %v1519_v2 }
  0x32   :  { %1398 = vmatprep.subr.bf16.mxu1 %v1521_v3 }
  0x34   :  { %1377 = vmatpush3.bf16.msra.mxu0 %v1522_v4 }
  0x35   :  { %1378 = vmatprep.subr.bf16.mxu0 %v1524_v5  ;;  %1399 = vmatpush3.bf16.msra.mxu1 %v1523_v6 }
  0x36   :  { %1400 = vmatprep.subr.bf16.mxu1 %v1525_v7 }
  0x38   :  { %1379 = vmatpush3.bf16.msra.mxu0 %v1526_v8 }
  0x39   :  { %1380 = vmatprep.subr.bf16.mxu0 %v1528_v9  ;;  %1401 = vmatpush3.bf16.msra.mxu1 %v1527_v10 }
  0x3a   :  { %1402 = vmatprep.subr.bf16.mxu1 %v1529_v11 }
  0x3c   :  { %1381 = vmatpush3.bf16.msra.mxu0 %v1530_v12 }
  0x3d   :  { %1382 = vmatprep.subr.bf16.mxu0 %v1532_v13  ;;  %1403 = vmatpush3.bf16.msra.mxu1 %v1531_v14 }
  0x3e   :  { %1404 = vmatprep.subr.bf16.mxu1 %v1533_v15 }
  0x40   :  { %1383 = vmatpush3.bf16.msra.mxu0 %v1534_v16 }
  0x41   :  { %1412 = vmatprep.subr.bf16.mxu0 %v1536_v18  ;;  %1405 = vmatpush3.bf16.msra.mxu1 %v1535_v19 }
  0x42   :  { %1434 = vmatprep.subr.bf16.mxu1 %v1537_v20 }
  0x43   :  { %1024 = vmatmul.mubr.bf16.vlgmr.msra.gmra.mxu0 %v249_v17 }
  0x44   :  { %1413 = vmatpush3.bf16.msra.mxu0 %v1538_v21  ;;  %1064 = vmatmul.mubr.bf16.vlgmr.msra.gmra.mxu1 %v265_v22 }
  0x45   :  { %1414 = vmatprep.subr.bf16.mxu0 %v1540_v23  ;;  %1435 = vmatpush3.bf16.msra.mxu1 %v1539_v24 }
  0x46   :  { %1436 = vmatprep.subr.bf16.mxu1 %v1541_v25 }
  0x48   :  { %1415 = vmatpush3.bf16.msra.mxu0 %v1542_v26 }
  0x49   :  { %1416 = vmatprep.subr.bf16.mxu0 %v1544_v27  ;;  %1437 = vmatpush3.bf16.msra.mxu1 %v1543_v28 }
  0x4a   :  { %1438 = vmatprep.subr.bf16.mxu1 %v1545_v29 }
  0x4c   :  { %1417 = vmatpush3.bf16.msra.mxu0 %v1546_v30 }
  0x4d   :  { %1418 = vmatprep.subr.bf16.mxu0 %v1548_v31  ;;  %1439 = vmatpush3.bf16.msra.mxu1 %v1547_v32 }
  0x4e   :  { %1440 = vmatprep.subr.bf16.mxu1 %v1549_v33 }
  0x50   :  { %1419 = vmatpush3.bf16.msra.mxu0 %v1550_v34 }
  0x51   :  { %1420 = vmatprep.subr.bf16.mxu0 %v1552_v35  ;;  %1441 = vmatpush3.bf16.msra.mxu1 %v1551_v36 }
  0x52   :  { %1442 = vmatprep.subr.bf16.mxu1 %v1553_v37 }
  0x54   :  { %1421 = vmatpush3.bf16.msra.mxu0 %v1554_v38 }
  0x55   :  { %1422 = vmatprep.subr.bf16.mxu0 %v1556_v39  ;;  %1443 = vmatpush3.bf16.msra.mxu1 %v1555_v40 }
  0x56   :  { %1444 = vmatprep.subr.bf16.mxu1 %v1557_v42 }
  0x57   :  { %9 = vsyncpa [#allocation3], 0  ;;  %v1562_v49 = vld [vmem:[%s1950_s1 + $0x208] sm:$0xff]   ;;  %v283_v50 = vcombine.high %v275_v47, %v275_v47  ;;  %v1564_v51 = vld [vmem:[%s1950_s1 + $0x240] sm:$0xff]   ;;  %v290_v57 = vrot.slane %v275_v47, %v1727_v41  ;;  %v268_v59 = vcombine.high %v20_v45, %v20_v45  ;;  %v1594_v62 = vmov 0.0   ;;  %s1596_s9 = smov [#allocation2]  }
  0x58   :  { %1423 = vmatpush3.bf16.msra.mxu0 %v1558_v43  ;;  %v1563_v52 = vld [vmem:[%s1950_s1 + $0x288] sm:$0xff]   ;;  %v1565_v54 = vld [vmem:[%s1950_s1 + $0x2c0] sm:$0xff]   ;;  %vm1595_vm0 = vmmov 0   ;;  %vm907_vm1 = vcmask 261120   ;;  %s1215_s10 = sshll.u32 %s1596_s9, 4  ;;  %vm1207_vm2 = vcmask 58368   ;;  %s1216_s10 = int_to_ptr.vmem [resolvable:$true] %s1215_s10 }
  0x59   :  { %1424 = vmatprep.subr.bf16.mxu0 %v1560_v44  ;;  %1445 = vmatpush3.bf16.msra.mxu1 %v1559_v46  ;;  %v304_v53 = vrot.slane %v283_v50, %v1727_v41  ;;  %v1566_v55 = vld [vmem:[%s1950_s1 + $0x200] sm:$0xff]   ;;  %v1569_v60 = vld [vmem:[%s1950_s1 + $0x308] sm:$0xff]   ;;  %v305_v61 = vcombine.high %v290_v57, %v290_v57  ;;  %v282_v63 = vrot.slane %v268_v59, %v1727_v41  ;;  %s1571_s11 = scalar_lea.vmem %s1216_s10, 32  ;;  %p1576_p1 = scmp.lt.s32.totalorder %s1216_s10, %s1216_s10 }
  0x5a   :  { %1446 = vmatprep.subr.bf16.mxu1 %v1561_v48  ;;  %v1567_v58 = vld [vmem:[%s1950_s1 + $0x280] sm:$0xff]   ;;  %p1572_p0 = scmp.ne.s32.totalorder %s1216_s10, %s1571_s11  ;;  %p1577_p2 = scmp.lt.s32.totalorder %s1571_s11, %s1571_s11 }
  0x5b   :  { %1103 = vmatprep.mubr.bf16.mxu0 %v304_v53  ;;  %v306_v56 = vcombine.high %v304_v53, %v304_v53  ;;  %v1570_v0 = vld [vmem:[%s1950_s1 + $0x300] sm:$0xff]   ;;  %v297_v1 = vrot.slane %v282_v63, %v1727_v41 }
  0x5c   :  { %1425 = vmatpush3.bf16.msra.mxu0 %v1562_v49  ;;  %v1322_v37 = vld [vmem:[%s1951_s2] ss:$0 sm:$0xff]  ;;  %p1578_p3 = por %p1577_p2, %p1576_p1 }
  0x5d   :  { %1426 = vmatprep.subr.bf16.mxu0 %v1564_v51  ;;  %1447 = vmatpush3.bf16.msra.mxu1 %v1563_v52  ;;  %v1323_v40 = vld [vmem:[%s1952_s3] ss:$0 sm:$0xff] }
  0x5e   :  { %1143 = vmatprep.mubr.bf16.mxu1 %v306_v56  ;;  %1448 = vmatprep.subr.bf16.mxu1 %v1565_v54  ;;  %p1579_p4 = pnand %p1578_p3, %p1572_p0 }
  0x60   :  { %1427 = vmatpush3.bf16.msra.mxu0 %v1566_v55 }
  0x61   :  { %1459 = vmatprep.subr.bf16.mxu0 %v1594_v62  ;;  %1449 = vmatpush3.bf16.msra.mxu1 %v1567_v58 }
  0x63   :  { %1104 = vmatmul.mubr.bf16.vlgmr.msra.gmra.mxu0 %v290_v57 }
  0x64   :  { %1460 = vmatpush3.bf16.msra.mxu0 %v1569_v60  ;;  %1463 = vmatprep.mubr.msk.bf16.mxu0 %vm1595_vm0, %v1594_v62 }
  0x65   :  { %1144 = vmatmul.mubr.bf16.vlgmr.msra.gmra.mxu1 %v305_v61  ;;  %1461 = vmatprep.subr.bf16.mxu0 %v1594_v62 }
  0x68   :  { %1462 = vmatpush3.bf16.msra.mxu0 %v1570_v0 }
  0x6b   :  { %1464 = vmatmul.mubr.msk.bf16.vlgmr.msra.gmra.mxu0 %vm907_vm1, %v297_v1 }
  0xe3   :  { %v1340_v2 = vpop.f32.mrf.mxu0 }
  0xe4   :  { %v1362_v3 = vpop.f32.mrf.mxu1 }
  0xe5   :  { %v1341_v4 = vpop.f32.mrf.mxu0 }
  0xe6   :  { %v1363_v5 = vpop.f32.mrf.mxu1  ;;  %v1342_v41 = vadd.f32 %v1341_v4, %v1340_v2 }
  0xe7   :  { %v1343_v6 = vpop.f32.mrf.mxu0  ;;  %v1364_v18 = vadd.f32 %v1363_v5, %v1362_v3 }
  0xe8   :  { %v1365_v7 = vpop.f32.mrf.mxu1 }
  0xe9   :  { %v1344_v8 = vpop.f32.mrf.mxu0  ;;  %v986_v20 = vadd.f32 %v1364_v18, %v1342_v41 }
  0xea   :  { %v1366_v9 = vpop.f32.mrf.mxu1 }
 0x103   :  { %v1384_v10 = vpop.f32.mrf.mxu0 }
 0x104   :  { %v1406_v11 = vpop.f32.mrf.mxu1 }
 0x105   :  { %v1385_v12 = vpop.f32.mrf.mxu0 }
 0x106   :  { %v1407_v13 = vpop.f32.mrf.mxu1  ;;  %v1386_v19 = vadd.f32 %v1385_v12, %v1384_v10 }
 0x107   :  { %v1387_v14 = vpop.f32.mrf.mxu0  ;;  %v1408_v22 = vadd.f32 %v1407_v13, %v1406_v11 }
 0x108   :  { %v1409_v15 = vpop.f32.mrf.mxu1  ;;  %v1026_v21 = vadd.f32 %v1386_v19, %v986_v20 }
 0x109   :  { %v1388_v16 = vpop.f32.mrf.mxu0 }
 0x10a   :  { %v1410_v17 = vpop.f32.mrf.mxu1  ;;  %v1066_v26 = vadd.f32 %v1408_v22, %v1026_v21 }
 0x123   :  { %v1428_v23 = vpop.f32.mrf.mxu0 }
 0x125   :  { %v1450_v24 = vpop.f32.mrf.mxu1  ;;  %v1429_v25 = vpop.f32.mrf.mxu0 }
 0x126   :  { %v1430_v27 = vadd.f32 %v1429_v25, %v1428_v23 }
 0x127   :  { %v1451_v28 = vpop.f32.mrf.mxu1  ;;  %v1431_v29 = vpop.f32.mrf.mxu0 }
 0x128   :  { %v1106_v30 = vadd.f32 %v1430_v27, %v1066_v26  ;;  %v1452_v31 = vadd.f32 %v1451_v28, %v1450_v24 }
 0x129   :  { %v1453_v32 = vpop.f32.mrf.mxu1  ;;  %v1432_v33 = vpop.f32.mrf.mxu0 }
 0x12a   :  { %v1146_v34 = vadd.f32 %v1452_v31, %v1106_v30 }
 0x12b   :  { %v1454_v35 = vpop.f32.mrf.mxu1  ;;  %v1185_v36 = vpop.f32.mrf.mxu0 }
 0x12c   :  { %v1186_v38 = vadd.f32 %v1185_v36, %v1146_v34 }
 0x12d   :  { %v1465_v39 = vpop.f32.mrf.mxu0 }
 0x12e   :  { %v1198_v42 = vmul.f32 %v1322_v37, %v1186_v38 }
 0x12f   :  { %v1188_v43 = vpop.f32.mrf.mxu0 }
 0x130   :  { %v1206_v44 = vadd.f32 %v1323_v40, %v1198_v42 }
 0x131   :  { %v1466_v45 = vpop.f32.mrf.mxu0 }
 0x132   :  { %1208 = vst.msk [vmem:[#allocation2] sm:$0x3] %vm1207_vm2, %v1206_v44 }
 0x133   :  { %1582 = shalt.err (!%p1579_p4)
}
 0x134   :  { %1218 = dma.vmem_to_hbm [thread:$0]  %s1216_s10, 32, %s1953_s4, [#allocation3]  }
 0x135   :  { %1591 = dma.done.wait [#allocation3], 32  }
 0x136   :  { %1592 = vsyncadd [#allocation3], 4294967264 }
 0x137   :  { %1222 = vsyncpa [#allocation3], 1 }

</bundles_post_ra>
